<compile_context>
chip_gen: v7x
topology: tpu7x:2x2x1
jax: 0.10.0
libtpu: 0.0.40
codegen_flags: <defaults>
</compile_context>

<pallas_src>
import jax
import jax.numpy as jnp
from jax import lax
from jax.experimental import pallas as pl
from jax.experimental.pallas import tpu as pltpu


def _round_up(x, m):
    return ((x + m - 1) // m) * m


# --------------------- fused fc1 + edgeMLP + depth loop + head ---------------

def _gkn_kernel(src_ref, dst_ref, ea_ref, x_ref,
                fc1w_ref, fc1b_ref,
                k1w_ref, k1b_ref, k2w_ref, k2b_ref, k3w_ref, k3b_ref,
                r_ref, s_ref, invdeg_ref,
                fc2w_ref, fc2b_ref, fc3w_ref, fc3b_ref,
                out_ref,
                h_ref, acc_ref):
    d = pl.program_id(0)            # depth step  (sequential)
    t = pl.program_id(1)            # edge tile   (sequential)
    depth = pl.num_programs(0)
    n_tiles = pl.num_programs(1)
    n_pad, width = h_ref.shape
    tile_e = src_ref.shape[0]
    in_width = x_ref.shape[1]
    f32 = jnp.float32

    # --- very first grid step: h = fc1(x), VMEM-resident from then on --------
    @pl.when((d == 0) & (t == 0))
    def _init_h():
        if in_width == 1:
            # K=1 "matmul" is an outer product: VPU broadcast-multiply, no MXU.
            h_ref[...] = x_ref[...] * fc1w_ref[...] + fc1b_ref[...]
        else:
            h_ref[...] = jnp.dot(x_ref[...], fc1w_ref[...],
                                 preferred_element_type=f32) + fc1b_ref[...]

    # --- start of each depth step: zero the (N, width) mean accumulator ------
    @pl.when(t == 0)
    def _zero_acc():
        acc_ref[...] = jnp.zeros_like(acc_ref)

    # --- fused edge MLP: recompute per-edge kernel weights for this tile -----
    a = ea_ref[...]                                                  # (tile_e, ker_in)
    h1 = jnp.maximum(jnp.dot(a, k1w_ref[...],
                             preferred_element_type=f32) + k1b_ref[...], 0.0)
    h2 = jnp.maximum(jnp.dot(h1, k2w_ref[...],
                             preferred_element_type=f32) + k2b_ref[...], 0.0)
    k_flat = jnp.dot(h2, k3w_ref[...],
                     preferred_element_type=f32) + k3b_ref[...]      # (tile_e, W*W)

    # --- vectorized gather: h_src = onehot_src @ h ---------------------------
    lane_nodes = lax.broadcasted_iota(jnp.int32, (tile_e, n_pad), 1)
    onehot_src = (lane_nodes == src_ref[...]).astype(f32)            # (tile_e, n_pad)
    h_src = jnp.dot(onehot_src, h_ref[...],
                    preferred_element_type=f32)                      # (tile_e, W)

    # --- per-edge contraction: expand (MXU) * weights (VPU) -> reduce (MXU) --
    # R[w, w*W+f] = 1 ; S[w*W+f, f] = 1 (constant 0/1 selection matrices)
    h_exp = jnp.dot(h_src, r_ref[...], preferred_element_type=f32)   # (tile_e, W*W)
    prod = h_exp * k_flat                                            # (tile_e, W*W)
    msg = jnp.dot(prod, s_ref[...], preferred_element_type=f32)      # (tile_e, W)

    # --- vectorized scatter: acc += onehot_dst^T @ msg -----------------------
    sub_nodes = lax.broadcasted_iota(jnp.int32, (n_pad, tile_e), 0)
    onehot_dst_t = (sub_nodes == dst_ref[...]).astype(f32)           # (n_pad, tile_e)
    acc_ref[...] += jnp.dot(onehot_dst_t, msg, preferred_element_type=f32)

    # --- end of each depth step: mean, relu (except last), update h / head ---
    @pl.when(t == n_tiles - 1)
    def _finish_step():
        hn = acc_ref[...] * invdeg_ref[...]                          # mean aggregation
        is_last = d == depth - 1
        h_ref[...] = jnp.where(is_last, hn, jnp.maximum(hn, 0.0))

        @pl.when(is_last)
        def _head():
            z = jnp.maximum(jnp.dot(hn, fc2w_ref[...],
                                    preferred_element_type=f32) + fc2b_ref[...], 0.0)
            out_ref[...] = (jnp.dot(z, fc3w_ref[...],
                                    preferred_element_type=f32) + fc3b_ref[...])


# ----------------------------- model wrapper --------------------------------

def init_params(key, width, ker_width, ker_in, in_width):
    """Deterministic synthetic parameters (PyTorch Linear shapes, stored (in,out))."""
    ks = jax.random.split(key, 12)

    def lin(kw, kb, fan_in, fan_out):
        s = 1.0 / jnp.sqrt(fan_in)
        w = jax.random.uniform(kw, (fan_in, fan_out), jnp.float32, -s, s)
        b = jax.random.uniform(kb, (fan_out,), jnp.float32, -s, s)
        return w, b

    p = {}
    p["fc1_w"], p["fc1_b"] = lin(ks[0], ks[1], in_width, width)
    # DenseNet([ker_in, ker_width//2, ker_width, width**2], ReLU)
    p["k1_w"], p["k1_b"] = lin(ks[2], ks[3], ker_in, ker_width // 2)
    p["k2_w"], p["k2_b"] = lin(ks[4], ks[5], ker_width // 2, ker_width)
    p["k3_w"], p["k3_b"] = lin(ks[6], ks[7], ker_width, width * width)
    p["fc2_w"], p["fc2_b"] = lin(ks[8], ks[9], width, ker_width)
    p["fc3_w"], p["fc3_b"] = lin(ks[10], ks[11], ker_width, 1)
    return p


def kernel_gkn_forward(params, x, edge_index, edge_attr, *, depth, width):
    f32 = jnp.float32
    N, in_width = x.shape
    E, ker_in = edge_attr.shape
    ker_width = params["fc2_w"].shape[1]

    src = edge_index[0].astype(jnp.int32)
    dst = edge_index[1].astype(jnp.int32)

    # Bigger tiles amortize per-grid-step overhead for realistic edge counts;
    # tile_e must be a multiple of 128 (lane-shaped dst block).
    tile_e = 512 if E > 1024 else 128
    e_pad = _round_up(E, tile_e)
    n_tiles = e_pad // tile_e
    n_pad = _round_up(N, 8)

    # Padded edges get src = dst = -1 so their one-hot rows/columns are all
    # zero: they gather 0 and scatter 0, regardless of the (biased) edge MLP.
    src_p = jnp.full((e_pad, 1), -1, jnp.int32).at[:E, 0].set(src)
    dst_p = jnp.full((1, e_pad), -1, jnp.int32).at[0, :E].set(dst)
    ea_p = jnp.zeros((e_pad, ker_in), f32).at[:E].set(edge_attr.astype(f32))
    x_p = jnp.zeros((n_pad, in_width), f32).at[:N].set(x.astype(f32))

    # In-degree -> 1/deg (0 for isolated / padded nodes): 'mean' aggregation.
    deg = jnp.zeros((N,), f32).at[dst].add(1.0)
    inv_deg = jnp.where(deg > 0, 1.0 / jnp.maximum(deg, 1.0), 0.0)
    inv_deg_p = jnp.zeros((n_pad, 1), f32).at[:N, 0].set(inv_deg)

    # Constant 0/1 selection matrices for the per-edge contraction:
    #   R[w, w*W+f] = 1 (expand h along lanes), S[w*W+f, f] = 1 (chunk reduce).
    j = jnp.arange(width * width, dtype=jnp.int32)
    w_ids = jnp.arange(width, dtype=jnp.int32)
    sel_r = (j[None, :] // width == w_ids[:, None]).astype(f32)      # (W, W*W)
    sel_s = (j[:, None] % width == w_ids[None, :]).astype(f32)       # (W*W, W)

    b = lambda v: v.reshape(1, -1).astype(f32)
    const = lambda d, t: (0, 0)

    grid_spec = pltpu.PrefetchScalarGridSpec(
        num_scalar_prefetch=0,
        grid=(depth, n_tiles),
        in_specs=[
            pl.BlockSpec((tile_e, 1), lambda d, t: (t, 0)),           # src (sublane)
            pl.BlockSpec((1, tile_e), lambda d, t: (0, t)),           # dst (lane)
            pl.BlockSpec((tile_e, ker_in), lambda d, t: (t, 0)),      # edge_attr
            pl.BlockSpec((n_pad, in_width), const),                   # x
            pl.BlockSpec((in_width, width), const),                   # fc1 w
            pl.BlockSpec((1, width), const),                          # fc1 b
            pl.BlockSpec((ker_in, ker_width // 2), const),            # k1 w
            pl.BlockSpec((1, ker_width // 2), const),                 # k1 b
            pl.BlockSpec((ker_width // 2, ker_width), const),         # k2 w
            pl.BlockSpec((1, ker_width), const),                      # k2 b
            pl.BlockSpec((ker_width, width * width), const),          # k3 w
            pl.BlockSpec((1, width * width), const),                  # k3 b
            pl.BlockSpec((width, width * width), const),              # R
            pl.BlockSpec((width * width, width), const),              # S
            pl.BlockSpec((n_pad, 1), const),                          # 1/deg
            pl.BlockSpec((width, ker_width), const),                  # fc2 w
            pl.BlockSpec((1, ker_width), const),                      # fc2 b
            pl.BlockSpec((ker_width, 1), const),                      # fc3 w
            pl.BlockSpec((1, 1), const),                              # fc3 b
        ],
        out_specs=pl.BlockSpec((n_pad, 1), const),
        scratch_shapes=[
            pltpu.VMEM((n_pad, width), jnp.float32),   # h: resident node features
            pltpu.VMEM((n_pad, width), jnp.float32),   # acc: mean numerator
        ],
    )

    out_p = pl.pallas_call(
        _gkn_kernel,
        grid_spec=grid_spec,
        out_shape=jax.ShapeDtypeStruct((n_pad, 1), jnp.float32),
        compiler_params=pltpu.CompilerParams(
            dimension_semantics=("arbitrary", "arbitrary"),
            vmem_limit_bytes=48 * 1024 * 1024),
    )(src_p, dst_p, ea_p, x_p,
      params["fc1_w"].astype(f32), b(params["fc1_b"]),
      params["k1_w"].astype(f32), b(params["k1_b"]),
      params["k2_w"].astype(f32), b(params["k2_b"]),
      params["k3_w"].astype(f32), b(params["k3_b"]),
      sel_r, sel_s, inv_deg_p,
      params["fc2_w"].astype(f32), b(params["fc2_b"]),
      params["fc3_w"].astype(f32), b(params["fc3_b"]))
    return out_p[:N]


# ----------------------------- pure-JAX reference ----------------------------

def reference_forward(params, x, edge_index, edge_attr, *, depth, width):
    src, dst = edge_index[0], edge_index[1]
    N = x.shape[0]
    h = x @ params["fc1_w"] + params["fc1_b"]
    k1 = jax.nn.relu(edge_attr @ params["k1_w"] + params["k1_b"])
    k2 = jax.nn.relu(k1 @ params["k2_w"] + params["k2_b"])
    w_e = (k2 @ params["k3_w"] + params["k3_b"]).reshape(-1, width, width)
    deg = jnp.zeros((N,), jnp.float32).at[dst].add(1.0)
    for k in range(depth):
        msg = jnp.einsum("ed,edf->ef", h[src], w_e)
        agg = jnp.zeros((N, width), jnp.float32).at[dst].add(msg)
        h = agg / jnp.maximum(deg, 1.0)[:, None]
        if k != depth - 1:
            h = jax.nn.relu(h)
    h = jax.nn.relu(h @ params["fc2_w"] + params["fc2_b"])
    return h @ params["fc3_w"] + params["fc3_b"]


# ----------------------------------- main ------------------------------------

if __name__ == "__main__":
    # Small config consistent with the module's __init__ signature.
    width, ker_width, depth, ker_in, in_width = 32, 64, 2, 6, 1
    num_nodes, num_edges = 16, 200   # 200 edges -> exercises 2 edge tiles + padding

    key = jax.random.PRNGKey(0)
    kp, kx, ks, kd, ke = jax.random.split(key, 5)

    params = init_params(kp, width, ker_width, ker_in, in_width)

    x = jax.random.normal(kx, (num_nodes, in_width), jnp.float32)
    src = jax.random.randint(ks, (num_edges,), 0, num_nodes, jnp.int32)
    dst = jax.random.randint(kd, (num_edges,), 0, num_nodes, jnp.int32)
    edge_index = jnp.stack([src, dst], axis=0)                 # (2, E)
    edge_attr = jax.random.normal(ke, (num_edges, ker_in), jnp.float32)

    out = kernel_gkn_forward(params, x, edge_index, edge_attr,
                             depth=depth, width=width)
    out = jax.block_until_ready(out)

    ref = reference_forward(params, x, edge_index, edge_attr,
                            depth=depth, width=width)
    ref = jax.block_until_ready(ref)

    assert out.shape == (num_nodes, 1), out.shape
    assert jnp.allclose(out, ref, atol=1e-4, rtol=1e-4), (
        f"max abs diff {jnp.max(jnp.abs(out - ref))}")

    print("KERNEL_OK")
</pallas_src>

<mosaic_0001>
module attributes {stable_mosaic.version = 11 : i64} {
  func.func @_gkn_kernel(%arg0: i32, %arg1: i32, %arg2: memref<128x1xi32, #tpu.memory_space<vmem>>, %arg3: memref<1x128xi32, #tpu.memory_space<vmem>>, %arg4: memref<128x6xf32, #tpu.memory_space<vmem>>, %arg5: memref<16x1xf32, #tpu.memory_space<vmem>>, %arg6: memref<1x32xf32, #tpu.memory_space<vmem>>, %arg7: memref<1x32xf32, #tpu.memory_space<vmem>>, %arg8: memref<6x32xf32, #tpu.memory_space<vmem>>, %arg9: memref<1x32xf32, #tpu.memory_space<vmem>>, %arg10: memref<32x64xf32, #tpu.memory_space<vmem>>, %arg11: memref<1x64xf32, #tpu.memory_space<vmem>>, %arg12: memref<64x1024xf32, #tpu.memory_space<vmem>>, %arg13: memref<1x1024xf32, #tpu.memory_space<vmem>>, %arg14: memref<32x1024xf32, #tpu.memory_space<vmem>>, %arg15: memref<1024x32xf32, #tpu.memory_space<vmem>>, %arg16: memref<16x1xf32, #tpu.memory_space<vmem>>, %arg17: memref<32x64xf32, #tpu.memory_space<vmem>>, %arg18: memref<1x64xf32, #tpu.memory_space<vmem>>, %arg19: memref<64x1xf32, #tpu.memory_space<vmem>>, %arg20: memref<1x1xf32, #tpu.memory_space<vmem>>, %arg21: memref<16x1xf32, #tpu.memory_space<vmem>>, %arg22: memref<16x32xf32, #tpu.memory_space<vmem>>, %arg23: memref<16x32xf32, #tpu.memory_space<vmem>>) attributes {dimension_semantics = [#tpu.dimension_semantics<arbitrary>, #tpu.dimension_semantics<arbitrary>], iteration_bounds = array<i64: 2, 2>, scalar_prefetch = 0 : i64, scratch_operands = 2 : i64, tpu.core_type = #tpu.core_type<tc>, window_params = [{transform_indices = @transform_0, window_bounds = array<i64: 128, 1>}, {transform_indices = @transform_1, window_bounds = array<i64: 1, 128>}, {transform_indices = @transform_2, window_bounds = array<i64: 128, 6>}, {pipeline_mode = #tpu.pipeline_mode<synchronous>, transform_indices = @transform_3, window_bounds = array<i64: 16, 1>}, {pipeline_mode = #tpu.pipeline_mode<synchronous>, transform_indices = @transform_4, window_bounds = array<i64: 1, 32>}, {pipeline_mode = #tpu.pipeline_mode<synchronous>, transform_indices = @transform_5, window_bounds = array<i64: 1, 32>}, {pipeline_mode = #tpu.pipeline_mode<synchronous>, transform_indices = @transform_6, window_bounds = array<i64: 6, 32>}, {pipeline_mode = #tpu.pipeline_mode<synchronous>, transform_indices = @transform_7, window_bounds = array<i64: 1, 32>}, {pipeline_mode = #tpu.pipeline_mode<synchronous>, transform_indices = @transform_8, window_bounds = array<i64: 32, 64>}, {pipeline_mode = #tpu.pipeline_mode<synchronous>, transform_indices = @transform_9, window_bounds = array<i64: 1, 64>}, {pipeline_mode = #tpu.pipeline_mode<synchronous>, transform_indices = @transform_10, window_bounds = array<i64: 64, 1024>}, {pipeline_mode = #tpu.pipeline_mode<synchronous>, transform_indices = @transform_11, window_bounds = array<i64: 1, 1024>}, {pipeline_mode = #tpu.pipeline_mode<synchronous>, transform_indices = @transform_12, window_bounds = array<i64: 32, 1024>}, {pipeline_mode = #tpu.pipeline_mode<synchronous>, transform_indices = @transform_13, window_bounds = array<i64: 1024, 32>}, {pipeline_mode = #tpu.pipeline_mode<synchronous>, transform_indices = @transform_14, window_bounds = array<i64: 16, 1>}, {pipeline_mode = #tpu.pipeline_mode<synchronous>, transform_indices = @transform_15, window_bounds = array<i64: 32, 64>}, {pipeline_mode = #tpu.pipeline_mode<synchronous>, transform_indices = @transform_16, window_bounds = array<i64: 1, 64>}, {pipeline_mode = #tpu.pipeline_mode<synchronous>, transform_indices = @transform_17, window_bounds = array<i64: 64, 1>}, {pipeline_mode = #tpu.pipeline_mode<synchronous>, transform_indices = @transform_18, window_bounds = array<i64: 1, 1>}, {pipeline_mode = #tpu.pipeline_mode<synchronous>, transform_indices = @transform_19, window_bounds = array<i64: 16, 1>}]} {
    %c0_i32 = arith.constant 0 : i32
    %0 = arith.cmpi eq, %arg0, %c0_i32 : i32
    %c0_i32_0 = arith.constant 0 : i32
    %1 = arith.cmpi eq, %arg1, %c0_i32_0 : i32
    %2 = arith.andi %0, %1 : i1
    %3 = arith.extui %2 : i1 to i32
    %c0_i32_1 = arith.constant 0 : i32
    %4 = arith.cmpi ne, %3, %c0_i32_1 : i32
    scf.if %4 {
      %c0_40 = arith.constant 0 : index
      %c0_41 = arith.constant 0 : index
      %54 = vector.load %arg5[%c0_40, %c0_41] : memref<16x1xf32, #tpu.memory_space<vmem>>, vector<16x1xf32>
      %c0_42 = arith.constant 0 : index
      %c0_43 = arith.constant 0 : index
      %55 = vector.load %arg6[%c0_42, %c0_43] : memref<1x32xf32, #tpu.memory_space<vmem>>, vector<1x32xf32>
      %56 = vector.broadcast %54 : vector<16x1xf32> to vector<16x32xf32>
      %57 = vector.broadcast %55 : vector<1x32xf32> to vector<16x32xf32>
      %58 = arith.mulf %56, %57 : vector<16x32xf32>
      %c0_44 = arith.constant 0 : index
      %c0_45 = arith.constant 0 : index
      %59 = vector.load %arg7[%c0_44, %c0_45] : memref<1x32xf32, #tpu.memory_space<vmem>>, vector<1x32xf32>
      %60 = vector.broadcast %59 : vector<1x32xf32> to vector<16x32xf32>
      %61 = arith.addf %58, %60 : vector<16x32xf32>
      %c0_46 = arith.constant 0 : index
      %c0_47 = arith.constant 0 : index
      %62 = vector.load %arg22[%c0_46, %c0_47] : memref<16x32xf32, #tpu.memory_space<vmem>>, vector<16x32xf32>
      tpu.vector_store %arg22[%c0_46, %c0_47], %61 {strides = array<i32>} : memref<16x32xf32, #tpu.memory_space<vmem>>, vector<16x32xf32>,
    } else {
    }
    %c0_i32_2 = arith.constant 0 : i32
    %5 = arith.cmpi eq, %arg1, %c0_i32_2 : i32
    %6 = arith.extui %5 : i1 to i32
    %c0_i32_3 = arith.constant 0 : i32
    %7 = arith.cmpi ne, %6, %c0_i32_3 : i32
    scf.if %7 {
      %cst_40 = arith.constant 0.000000e+00 : f32
      %54 = vector.broadcast %cst_40 : f32 to vector<16x32xf32>
      %c0_41 = arith.constant 0 : index
      %c0_42 = arith.constant 0 : index
      %55 = vector.load %arg23[%c0_41, %c0_42] : memref<16x32xf32, #tpu.memory_space<vmem>>, vector<16x32xf32>
      tpu.vector_store %arg23[%c0_41, %c0_42], %54 {strides = array<i32>} : memref<16x32xf32, #tpu.memory_space<vmem>>, vector<16x32xf32>,
    } else {
    }
    %c0 = arith.constant 0 : index
    %c0_4 = arith.constant 0 : index
    %8 = vector.load %arg4[%c0, %c0_4] : memref<128x6xf32, #tpu.memory_space<vmem>>, vector<128x6xf32>
    %c0_5 = arith.constant 0 : index
    %c0_6 = arith.constant 0 : index
    %9 = vector.load %arg8[%c0_5, %c0_6] : memref<6x32xf32, #tpu.memory_space<vmem>>, vector<6x32xf32>
    %cst = arith.constant dense<0.000000e+00> : vector<128x32xf32>
    %10 = tpu.matmul %8, %9, %cst {dimension_numbers = #tpu.dot_dimension_numbers<[1], [0], [0], [1], [0, 0, 1, 1], [], []>} : vector<128x6xf32>, vector<6x32xf32>, vector<128x32xf32> -> vector<128x32xf32>
    %c0_7 = arith.constant 0 : index
    %c0_8 = arith.constant 0 : index
    %11 = vector.load %arg9[%c0_7, %c0_8] : memref<1x32xf32, #tpu.memory_space<vmem>>, vector<1x32xf32>
    %12 = vector.broadcast %11 : vector<1x32xf32> to vector<128x32xf32>
    %13 = arith.addf %10, %12 : vector<128x32xf32>
    %cst_9 = arith.constant 0.000000e+00 : f32
    %14 = vector.broadcast %cst_9 : f32 to vector<128x32xf32>
    %15 = arith.maximumf %13, %14 : vector<128x32xf32>
    %c0_10 = arith.constant 0 : index
    %c0_11 = arith.constant 0 : index
    %16 = vector.load %arg10[%c0_10, %c0_11] : memref<32x64xf32, #tpu.memory_space<vmem>>, vector<32x64xf32>
    %cst_12 = arith.constant dense<0.000000e+00> : vector<128x64xf32>
    %17 = tpu.matmul %15, %16, %cst_12 {dimension_numbers = #tpu.dot_dimension_numbers<[1], [0], [0], [1], [0, 0, 1, 1], [], []>} : vector<128x32xf32>, vector<32x64xf32>, vector<128x64xf32> -> vector<128x64xf32>
    %c0_13 = arith.constant 0 : index
    %c0_14 = arith.constant 0 : index
    %18 = vector.load %arg11[%c0_13, %c0_14] : memref<1x64xf32, #tpu.memory_space<vmem>>, vector<1x64xf32>
    %19 = vector.broadcast %18 : vector<1x64xf32> to vector<128x64xf32>
    %20 = arith.addf %17, %19 : vector<128x64xf32>
    %cst_15 = arith.constant 0.000000e+00 : f32
    %21 = vector.broadcast %cst_15 : f32 to vector<128x64xf32>
    %22 = arith.maximumf %20, %21 : vector<128x64xf32>
    %c0_16 = arith.constant 0 : index
    %c0_17 = arith.constant 0 : index
    %23 = vector.load %arg12[%c0_16, %c0_17] : memref<64x1024xf32, #tpu.memory_space<vmem>>, vector<64x1024xf32>
    %cst_18 = arith.constant dense<0.000000e+00> : vector<128x1024xf32>
    %24 = tpu.matmul %22, %23, %cst_18 {dimension_numbers = #tpu.dot_dimension_numbers<[1], [0], [0], [1], [0, 0, 1, 1], [], []>} : vector<128x64xf32>, vector<64x1024xf32>, vector<128x1024xf32> -> vector<128x1024xf32>
    %c0_19 = arith.constant 0 : index
    %c0_20 = arith.constant 0 : index
    %25 = vector.load %arg13[%c0_19, %c0_20] : memref<1x1024xf32, #tpu.memory_space<vmem>>, vector<1x1024xf32>
    %26 = vector.broadcast %25 : vector<1x1024xf32> to vector<128x1024xf32>
    %27 = arith.addf %24, %26 : vector<128x1024xf32>
    %28 = tpu.iota {dimensions = array<i32: 1>} : vector<128x16xi32>
    %c0_21 = arith.constant 0 : index
    %c0_22 = arith.constant 0 : index
    %29 = vector.load %arg2[%c0_21, %c0_22] : memref<128x1xi32, #tpu.memory_space<vmem>>, vector<128x1xi32>
    %30 = vector.broadcast %29 : vector<128x1xi32> to vector<128x16xi32>
    %31 = arith.cmpi eq, %28, %30 : vector<128x16xi32>
    %32 = arith.extui %31 : vector<128x16xi1> to vector<128x16xi32>
    %33 = arith.sitofp %32 : vector<128x16xi32> to vector<128x16xf32>
    %c0_23 = arith.constant 0 : index
    %c0_24 = arith.constant 0 : index
    %34 = vector.load %arg22[%c0_23, %c0_24] : memref<16x32xf32, #tpu.memory_space<vmem>>, vector<16x32xf32>
    %cst_25 = arith.constant dense<0.000000e+00> : vector<128x32xf32>
    %35 = tpu.matmul %33, %34, %cst_25 {dimension_numbers = #tpu.dot_dimension_numbers<[1], [0], [0], [1], [0, 0, 1, 1], [], []>} : vector<128x16xf32>, vector<16x32xf32>, vector<128x32xf32> -> vector<128x32xf32>
    %c0_26 = arith.constant 0 : index
    %c0_27 = arith.constant 0 : index
    %36 = vector.load %arg14[%c0_26, %c0_27] : memref<32x1024xf32, #tpu.memory_space<vmem>>, vector<32x1024xf32>
    %cst_28 = arith.constant dense<0.000000e+00> : vector<128x1024xf32>
    %37 = tpu.matmul %35, %36, %cst_28 {dimension_numbers = #tpu.dot_dimension_numbers<[1], [0], [0], [1], [0, 0, 1, 1], [], []>} : vector<128x32xf32>, vector<32x1024xf32>, vector<128x1024xf32> -> vector<128x1024xf32>
    %38 = arith.mulf %37, %27 : vector<128x1024xf32>
    %c0_29 = arith.constant 0 : index
    %c0_30 = arith.constant 0 : index
    %39 = vector.load %arg15[%c0_29, %c0_30] : memref<1024x32xf32, #tpu.memory_space<vmem>>, vector<1024x32xf32>
    %cst_31 = arith.constant dense<0.000000e+00> : vector<128x32xf32>
    %40 = tpu.matmul %38, %39, %cst_31 {dimension_numbers = #tpu.dot_dimension_numbers<[1], [0], [0], [1], [0, 0, 1, 1], [], []>} : vector<128x1024xf32>, vector<1024x32xf32>, vector<128x32xf32> -> vector<128x32xf32>
    %41 = tpu.iota {dimensions = array<i32: 0>} : vector<16x128xi32>
    %c0_32 = arith.constant 0 : index
    %c0_33 = arith.constant 0 : index
    %42 = vector.load %arg3[%c0_32, %c0_33] : memref<1x128xi32, #tpu.memory_space<vmem>>, vector<1x128xi32>
    %43 = vector.broadcast %42 : vector<1x128xi32> to vector<16x128xi32>
    %44 = arith.cmpi eq, %41, %43 : vector<16x128xi32>
    %45 = arith.extui %44 : vector<16x128xi1> to vector<16x128xi32>
    %46 = arith.sitofp %45 : vector<16x128xi32> to vector<16x128xf32>
    %c0_34 = arith.constant 0 : index
    %c0_35 = arith.constant 0 : index
    %47 = vector.load %arg23[%c0_34, %c0_35] : memref<16x32xf32, #tpu.memory_space<vmem>>, vector<16x32xf32>
    %cst_36 = arith.constant dense<0.000000e+00> : vector<16x32xf32>
    %48 = tpu.matmul %46, %40, %cst_36 {dimension_numbers = #tpu.dot_dimension_numbers<[1], [0], [0], [1], [0, 0, 1, 1], [], []>} : vector<16x128xf32>, vector<128x32xf32>, vector<16x32xf32> -> vector<16x32xf32>
    %49 = arith.addf %47, %48 : vector<16x32xf32>
    %c0_37 = arith.constant 0 : index
    %c0_38 = arith.constant 0 : index
    %50 = vector.load %arg23[%c0_37, %c0_38] : memref<16x32xf32, #tpu.memory_space<vmem>>, vector<16x32xf32>
    tpu.vector_store %arg23[%c0_37, %c0_38], %49 {strides = array<i32>} : memref<16x32xf32, #tpu.memory_space<vmem>>, vector<16x32xf32>,
    %c1_i32 = arith.constant 1 : i32
    %51 = arith.cmpi eq, %arg1, %c1_i32 : i32
    %52 = arith.extui %51 : i1 to i32
    %c0_i32_39 = arith.constant 0 : i32
    %53 = arith.cmpi ne, %52, %c0_i32_39 : i32
    scf.if %53 {
      %c0_40 = arith.constant 0 : index
      %c0_41 = arith.constant 0 : index
      %54 = vector.load %arg23[%c0_40, %c0_41] : memref<16x32xf32, #tpu.memory_space<vmem>>, vector<16x32xf32>
      %c0_42 = arith.constant 0 : index
      %c0_43 = arith.constant 0 : index
      %55 = vector.load %arg16[%c0_42, %c0_43] : memref<16x1xf32, #tpu.memory_space<vmem>>, vector<16x1xf32>
      %56 = vector.broadcast %55 : vector<16x1xf32> to vector<16x32xf32>
      %57 = arith.mulf %54, %56 : vector<16x32xf32>
      %c1_i32_44 = arith.constant 1 : i32
      %58 = arith.cmpi eq, %arg0, %c1_i32_44 : i32
      %cst_45 = arith.constant 0.000000e+00 : f32
      %59 = vector.broadcast %cst_45 : f32 to vector<16x32xf32>
      %60 = arith.maximumf %57, %59 : vector<16x32xf32>
      %61 = arith.select %58, %57, %60 : vector<16x32xf32>
      %c0_46 = arith.constant 0 : index
      %c0_47 = arith.constant 0 : index
      %62 = vector.load %arg22[%c0_46, %c0_47] : memref<16x32xf32, #tpu.memory_space<vmem>>, vector<16x32xf32>
      tpu.vector_store %arg22[%c0_46, %c0_47], %61 {strides = array<i32>} : memref<16x32xf32, #tpu.memory_space<vmem>>, vector<16x32xf32>,
      %63 = arith.extui %58 : i1 to i32
      %c0_i32_48 = arith.constant 0 : i32
      %64 = arith.cmpi ne, %63, %c0_i32_48 : i32
      scf.if %64 {
        %c0_49 = arith.constant 0 : index
        %c0_50 = arith.constant 0 : index
        %65 = vector.load %arg17[%c0_49, %c0_50] : memref<32x64xf32, #tpu.memory_space<vmem>>, vector<32x64xf32>
        %cst_51 = arith.constant dense<0.000000e+00> : vector<16x64xf32>
        %66 = tpu.matmul %57, %65, %cst_51 {dimension_numbers = #tpu.dot_dimension_numbers<[1], [0], [0], [1], [0, 0, 1, 1], [], []>} : vector<16x32xf32>, vector<32x64xf32>, vector<16x64xf32> -> vector<16x64xf32>
        %c0_52 = arith.constant 0 : index
        %c0_53 = arith.constant 0 : index
        %67 = vector.load %arg18[%c0_52, %c0_53] : memref<1x64xf32, #tpu.memory_space<vmem>>, vector<1x64xf32>
        %68 = vector.broadcast %67 : vector<1x64xf32> to vector<16x64xf32>
        %69 = arith.addf %66, %68 : vector<16x64xf32>
        %cst_54 = arith.constant 0.000000e+00 : f32
        %70 = vector.broadcast %cst_54 : f32 to vector<16x64xf32>
        %71 = arith.maximumf %69, %70 : vector<16x64xf32>
        %c0_55 = arith.constant 0 : index
        %c0_56 = arith.constant 0 : index
        %72 = vector.load %arg19[%c0_55, %c0_56] : memref<64x1xf32, #tpu.memory_space<vmem>>, vector<64x1xf32>
        %cst_57 = arith.constant dense<0.000000e+00> : vector<16x1xf32>
        %73 = tpu.matmul %71, %72, %cst_57 {dimension_numbers = #tpu.dot_dimension_numbers<[1], [0], [0], [1], [0, 0, 1, 1], [], []>} : vector<16x64xf32>, vector<64x1xf32>, vector<16x1xf32> -> vector<16x1xf32>
        %c0_58 = arith.constant 0 : index
        %c0_59 = arith.constant 0 : index
        %74 = vector.load %arg20[%c0_58, %c0_59] : memref<1x1xf32, #tpu.memory_space<vmem>>, vector<1x1xf32>
        %75 = vector.broadcast %74 : vector<1x1xf32> to vector<16x1xf32>
        %76 = arith.addf %73, %75 : vector<16x1xf32>
        %c0_60 = arith.constant 0 : index
        %c0_61 = arith.constant 0 : index
        %77 = vector.load %arg21[%c0_60, %c0_61] : memref<16x1xf32, #tpu.memory_space<vmem>>, vector<16x1xf32>
        tpu.vector_store %arg21[%c0_60, %c0_61], %76 {strides = array<i32>} : memref<16x1xf32, #tpu.memory_space<vmem>>, vector<16x1xf32>,
      } else {
      }
    } else {
    }
    return
  }
  func.func @transform_0(%arg0: i32, %arg1: i32) -> (i32, i32) {
    %c0_i32 = arith.constant 0 : i32
    %c0_i32_0 = arith.constant 0 : i32
    return %arg1, %c0_i32 : i32, i32
  }
  func.func @transform_1(%arg0: i32, %arg1: i32) -> (i32, i32) {
    %c0_i32 = arith.constant 0 : i32
    %c0_i32_0 = arith.constant 0 : i32
    return %c0_i32, %arg1 : i32, i32
  }
  func.func @transform_2(%arg0: i32, %arg1: i32) -> (i32, i32) {
    %c0_i32 = arith.constant 0 : i32
    %c0_i32_0 = arith.constant 0 : i32
    return %arg1, %c0_i32 : i32, i32
  }
  func.func @transform_3(%arg0: i32, %arg1: i32) -> (i32, i32) {
    %c0_i32 = arith.constant 0 : i32
    %c0_i32_0 = arith.constant 0 : i32
    %c0_i32_1 = arith.constant 0 : i32
    return %c0_i32, %c0_i32_0 : i32, i32
  }
  func.func @transform_4(%arg0: i32, %arg1: i32) -> (i32, i32) {
    %c0_i32 = arith.constant 0 : i32
    %c0_i32_0 = arith.constant 0 : i32
    %c0_i32_1 = arith.constant 0 : i32
    return %c0_i32, %c0_i32_0 : i32, i32
  }
  func.func @transform_5(%arg0: i32, %arg1: i32) -> (i32, i32) {
    %c0_i32 = arith.constant 0 : i32
    %c0_i32_0 = arith.constant 0 : i32
    %c0_i32_1 = arith.constant 0 : i32
    return %c0_i32, %c0_i32_0 : i32, i32
  }
  func.func @transform_6(%arg0: i32, %arg1: i32) -> (i32, i32) {
    %c0_i32 = arith.constant 0 : i32
    %c0_i32_0 = arith.constant 0 : i32
    %c0_i32_1 = arith.constant 0 : i32
    return %c0_i32, %c0_i32_0 : i32, i32
  }
  func.func @transform_7(%arg0: i32, %arg1: i32) -> (i32, i32) {
    %c0_i32 = arith.constant 0 : i32
    %c0_i32_0 = arith.constant 0 : i32
    %c0_i32_1 = arith.constant 0 : i32
    return %c0_i32, %c0_i32_0 : i32, i32
  }
  func.func @transform_8(%arg0: i32, %arg1: i32) -> (i32, i32) {
    %c0_i32 = arith.constant 0 : i32
    %c0_i32_0 = arith.constant 0 : i32
    %c0_i32_1 = arith.constant 0 : i32
    return %c0_i32, %c0_i32_0 : i32, i32
  }
  func.func @transform_9(%arg0: i32, %arg1: i32) -> (i32, i32) {
    %c0_i32 = arith.constant 0 : i32
    %c0_i32_0 = arith.constant 0 : i32
    %c0_i32_1 = arith.constant 0 : i32
    return %c0_i32, %c0_i32_0 : i32, i32
  }
  func.func @transform_10(%arg0: i32, %arg1: i32) -> (i32, i32) {
    %c0_i32 = arith.constant 0 : i32
    %c0_i32_0 = arith.constant 0 : i32
    %c0_i32_1 = arith.constant 0 : i32
    return %c0_i32, %c0_i32_0 : i32, i32
  }
  func.func @transform_11(%arg0: i32, %arg1: i32) -> (i32, i32) {
    %c0_i32 = arith.constant 0 : i32
    %c0_i32_0 = arith.constant 0 : i32
    %c0_i32_1 = arith.constant 0 : i32
    return %c0_i32, %c0_i32_0 : i32, i32
  }
  func.func @transform_12(%arg0: i32, %arg1: i32) -> (i32, i32) {
    %c0_i32 = arith.constant 0 : i32
    %c0_i32_0 = arith.constant 0 : i32
    %c0_i32_1 = arith.constant 0 : i32
    return %c0_i32, %c0_i32_0 : i32, i32
  }
  func.func @transform_13(%arg0: i32, %arg1: i32) -> (i32, i32) {
    %c0_i32 = arith.constant 0 : i32
    %c0_i32_0 = arith.constant 0 : i32
    %c0_i32_1 = arith.constant 0 : i32
    return %c0_i32, %c0_i32_0 : i32, i32
  }
  func.func @transform_14(%arg0: i32, %arg1: i32) -> (i32, i32) {
    %c0_i32 = arith.constant 0 : i32
    %c0_i32_0 = arith.constant 0 : i32
    %c0_i32_1 = arith.constant 0 : i32
    return %c0_i32, %c0_i32_0 : i32, i32
  }
  func.func @transform_15(%arg0: i32, %arg1: i32) -> (i32, i32) {
    %c0_i32 = arith.constant 0 : i32
    %c0_i32_0 = arith.constant 0 : i32
    %c0_i32_1 = arith.constant 0 : i32
    return %c0_i32, %c0_i32_0 : i32, i32
  }
  func.func @transform_16(%arg0: i32, %arg1: i32) -> (i32, i32) {
    %c0_i32 = arith.constant 0 : i32
    %c0_i32_0 = arith.constant 0 : i32
    %c0_i32_1 = arith.constant 0 : i32
    return %c0_i32, %c0_i32_0 : i32, i32
  }
  func.func @transform_17(%arg0: i32, %arg1: i32) -> (i32, i32) {
    %c0_i32 = arith.constant 0 : i32
    %c0_i32_0 = arith.constant 0 : i32
    %c0_i32_1 = arith.constant 0 : i32
    return %c0_i32, %c0_i32_0 : i32, i32
  }
  func.func @transform_18(%arg0: i32, %arg1: i32) -> (i32, i32) {
    %c0_i32 = arith.constant 0 : i32
    %c0_i32_0 = arith.constant 0 : i32
    %c0_i32_1 = arith.constant 0 : i32
    return %c0_i32, %c0_i32_0 : i32, i32
  }
  func.func @transform_19(%arg0: i32, %arg1: i32) -> (i32, i32) {
    %c0_i32 = arith.constant 0 : i32
    %c0_i32_0 = arith.constant 0 : i32
    %c0_i32_1 = arith.constant 0 : i32
    return %c0_i32, %c0_i32_0 : i32, i32
  }
}

</mosaic_0001>

<bundles_post_ra>
// kernel: tpu_custom_call.1
= control target key start
LH: loop header
LB: loop body
LE: loop exit
PB: predicated region body
PF: predicated region fallthrough
CT: control target
= control target key end

     0   :  { %s5468_s20 = smov 0   ;;  %s5470_s21 = smov 0   ;;  %s7522_s0 = inlined_call_operand.vmem [shape: s32[256,1], index: 0, kind: input, shape index: {}]   ;;  %s7523_s1 = inlined_call_operand.vmem [shape: s32[1,256], index: 1, kind: input, shape index: {}]   ;;  %s7524_s2 = inlined_call_operand.vmem [shape: f32[256,6], index: 2, kind: input, shape index: {}]   ;;  %s7525_s3 = inlined_call_operand.vmem [shape: f32[16,1], index: 3, kind: input, shape index: {}]   ;;  %s7526_s4 = inlined_call_operand.vmem [shape: f32[1,32], index: 4, kind: input, shape index: {}]   ;;  %s7527_s5 = inlined_call_operand.vmem [shape: f32[1,32], index: 5, kind: input, shape index: {}]   ;;  %s7528_s6 = inlined_call_operand.vmem [shape: f32[6,32], index: 6, kind: input, shape index: {}]   ;;  %s7529_s7 = inlined_call_operand.vmem [shape: f32[1,32], index: 7, kind: input, shape index: {}]   ;;  %s7530_s8 = inlined_call_operand.vmem [shape: f32[32,64], index: 8, kind: input, shape index: {}]   ;;  %s7531_s9 = inlined_call_operand.vmem [shape: f32[1,64], index: 9, kind: input, shape index: {}]   ;;  %s7532_s10 = inlined_call_operand.vmem [shape: f32[64,1024], index: 10, kind: input, shape index: {}]   ;;  %s7533_s11 = inlined_call_operand.vmem [shape: f32[1,1024], index: 11, kind: input, shape index: {}]   ;;  %s7534_s12 = inlined_call_operand.vmem [shape: f32[32,1024], index: 12, kind: input, shape index: {}]   ;;  %s7535_s13 = inlined_call_operand.vmem [shape: f32[1024,32], index: 13, kind: input, shape index: {}]   ;;  %s7536_s14 = inlined_call_operand.vmem [shape: f32[16,1], index: 14, kind: input, shape index: {}]   ;;  %s7537_s15 = inlined_call_operand.vmem [shape: f32[32,64], index: 15, kind: input, shape index: {}]   ;;  %s7538_s16 = inlined_call_operand.vmem [shape: f32[1,64], index: 16, kind: input, shape index: {}]   ;;  %s7539_s17 = inlined_call_operand.vmem [shape: f32[64,1], index: 17, kind: input, shape index: {}]   ;;  %s7540_s18 = inlined_call_operand.<no memory space> [shape: f32[1,1], index: 18, kind: input, shape index: {}]   ;;  %s7541_s19 = inlined_call_operand.vmem [shape: f32[16,1], index: 19, kind: output, shape index: {}]  }
   0x1   :  { %7552 = sst [smem:[#allocation109_spill]] %s7522_s0  ;;  %v24_v0 = vstv %s7540_s18  ;;  %s5474_s22 = smov 0  }
   0x2   :  { %7553 = sst [smem:[#allocation110_spill]] %s7523_s1  ;;  %25 = vst [vmem:[#allocation4] sm:$0x1] %v24_v0  ;;  %s5472_s1 = smov 0  }
   0x3   :  { %7554 = sst [smem:[#allocation111_spill]] %s7524_s2  ;;  %s5476_s2 = smov 0  }
   0x4   :  { %7555 = sst [smem:[#allocation112_spill]] %s7525_s3 }
   0x5   :  { %7556 = sst [smem:[#allocation113_spill]] %s7537_s15 }
   0x6   :  { %7557 = sst [smem:[#allocation114_spill]] %s7538_s16 }
   0x7   :  { %7558 = sst [smem:[#allocation115_spill]] %s7539_s17 }
   0x8   :  { %7559 = sst [smem:[#allocation116_spill]] %s7541_s19 }
   0x9 LB: > { %7560 = sst [smem:[#allocation5_spill]] %s5349_s1  ;;  %s40_s18 = sadd.s32 1, %s5349_s1  ;;  %s5357_s2 = sphi %s5476_s2, %s31_s2   ;;  %s5353_s22 = sphi %s5474_s22, %s7778_s22   ;;  %s5349_s1 = sphi %s5472_s1, %s7777_s1   ;;  %s5345_s21 = sphi %s5470_s21, %s7776_s21   ;;  %s5341_s20 = sphi %s5468_s20, %s7775_s20  }
   0xa   : > { %7561 = sst [smem:[#allocation6_spill]] %s5353_s22  ;;  %s43_s23 = sadd.s32 1, %s5353_s22 }
   0xb   : > { %7562 = sst [smem:[#allocation7_spill]] %s5357_s2  ;;  %p41_p0 = scmp.ge.s32.totalorder %s40_s18, 2 }
   0xc   : > { %p4197_p1 = scmp.ge.s32.totalorder %s5357_s2, 1  ;;  %p566_p2 = scmp.lt.s32.totalorder %s5357_s2, 5 }
   0xd   : > { %s7780_s18 = smov (%p41_p0, %s40_s18), 0  ;;  %s7782_s23 = smov (!%p41_p0, %s43_s23), %s5353_s22 }
   0xe   : > { %7563 = sst [smem:[#allocation8_spill]] %s7780_s18  ;;  %p567_p3 = pnand %p4197_p1, %p566_p2 }
   0xf   : > { %p45_p4 = scmp.ge.s32.totalorder %s7782_s23, 2 }
  0x10   : > { %570 = sbr.rel (%p567_p3) target bundleno = 2195 (0x893), region = 96 }
  0x11   : > { %s7784_s23 = smov (%p45_p4, %s7782_s23), 0 }
  0x12   : > { %7564 = sst [smem:[#allocation9_spill]] %s7784_s23 }
  0x17   : > { %s4198_s24 = sshll.u32 %s5341_s20, 4  ;;  %p631_p5 = scmp.lt.s32.totalorder %s5341_s20, 1 }
  0x18   : > { %p626_p6 = scmp.lt.s32.totalorder %s4198_s24, 31  ;;  %p640_p7 = scmp.eq.s32.totalorder %s5345_s21, 0 }
  0x19   : > { %s5506_s25 = scalar_select %p631_p5, %s5341_s20, 1 }
  0x1a   : > { %s7786_s24 = smov (!%p626_p6, %s4198_s24), 31  ;;  %s7565_s27 = sld [smem:[#allocation110_spill]] }
  0x1b   : > { %p641_p8 = scmp.eq.s32.totalorder %s5341_s20, 0  ;;  %s4199_s29 = sshll.u32 %s7786_s24, 3 }
  0x1c   : > { %s7566_s23 = sld [smem:[#allocation109_spill]]  ;;  %s7567_s2 = sld [smem:[#allocation111_spill]] }
  0x1d   : > { %p642_p9 = pnand %p641_p8, %p640_p7 }
  0x1e   : > { %s7568_s15 = sld [smem:[#allocation112_spill]] (!%p642_p9)  ;;  %v5359_v2 = vmov (!%p642_p9), 0   ;;  %v4202_v4 = vld [vmem:[%s7526_s4] ss:$0 sm:$0xff] (!%p642_p9)  ;;  %vm676_vm0 = vcmask (!%p642_p9), 261120  }
  0x1f   : > { %645 = sbr.rel (%p642_p9) target bundleno = 174 (0xae), region = 100  ;;  %5315 = vset.pattern.permute.xlu0 (!%p642_p9), %v5359_v2  ;;  %v4203_v5 = vld [vmem:[%s7527_s5] ss:$0 sm:$0xff] (!%p642_p9) }
  0x20   : > { %s633_s28 = scalar_lea.vmem %s7565_s27, %s5506_s25 }
  0x22   : > { %s5516_s18 = scalar_lea.vmem %s7566_s23, %s4199_s29  ;;  %s5521_s19 = scalar_lea.vmem %s7567_s2, %s4199_s29 }
  0x24   : > { %v646_v1 = vld [vmem:[%s7568_s15] sm:$0xff] (!%p642_p9)  ;;  %v647_v3 = vld [vmem:[%s7568_s15 + $0x8] sm:$0xff] (!%p642_p9) }
  0x25   : > { %651 = vperm.xlu0 (!%p642_p9), %5315, %v646_v1  }
  0x29   : > { %656 = vperm.xlu0 %5315, %v647_v3  }
  0xa4   : > { %v652_v6 = vpop.permute.xlu0 %651 }
  0xa5   : > { %v665_v7 = vmul.f32 %v4202_v4, %v652_v6 }
  0xa7   : > { %v674_v8 = vadd.f32 %v4203_v5, %v665_v7 }
  0xa8   : > { %v657_v9 = vpop.permute.xlu0 %656 }
  0xa9   : > { %677 = vst.msk [vmem:[#allocation2] sm:$0xff] %vm676_vm0, %v674_v8  ;;  %v666_v10 = vmul.f32 %v4202_v4, %v657_v9 }
  0xab   : > { %v675_v11 = vadd.f32 %v4203_v5, %v666_v10 }
  0xad   : > { %678 = vst.msk [vmem:[#allocation2 + $0x8] sm:$0xff] %vm676_vm0, %v675_v11 }
  0xae PF: > { %p4204_p10 = scmp.ne.s32.totalorder %s5341_s20, 0 }
  0xaf   : > { %vm682_vm1 = vcmask (!%p4204_p10), 261120   ;;  %v5360_v12 = vmov (!%p4204_p10), 0.0  }
  0xb0   : > { %681 = sbr.rel (%p4204_p10) target bundleno = 183 (0xb7), region = 104  ;;  %683 = vst.msk [vmem:[#allocation3] sm:$0xff] (!%p4204_p10), %vm682_vm1, %v5360_v12  ;;  %684 = vst.msk [vmem:[#allocation3 + $0x8] sm:$0xff] (!%p4204_p10), %vm682_vm1, %v5360_v12 }
  0xb7 PF: > { %v701_v13 = vld [vmem:[%s7528_s6] sm:$0x3f]  ;;  %vm758_vm2 = vcmask 1045504   ;;  %vm709_vm3 = vcmask 48128   ;;  %v686_v15 = vld [vmem:[%s5521_s19 + $0x8] sm:$0xff]  ;;  %v687_v16 = vld [vmem:[%s5521_s19 + $0x10] sm:$0xff] }
  0xb8   : > { %v685_v14 = vld [vmem:[%s5521_s19] sm:$0xff]  ;;  %4824 = vmatprep.subr.msk.mxu0 %vm758_vm2, %v701_v13  ;;  %5267 = vmatprep.subr.msk.mxu1 %vm758_vm2, %v701_v13  ;;  %v694_v18 = vld [vmem:[%s5521_s19 + $0x48] sm:$0xff]  ;;  %v695_v19 = vld [vmem:[%s5521_s19 + $0x50] sm:$0xff]  ;;  %v5361_v38 = vmov 0   ;;  %vm934_vm4 = vcmask 261120   ;;  %vm1250_vm5 = vcmask 523264  }
  0xb9   : > { %4826 = vmatprep.mubr.msk.f32.mxu0 %vm709_vm3, %v685_v14  ;;  %4825 = vmatpush3.msk.msra.mxu0 %vm758_vm2, %v701_v13  ;;  %v693_v17 = vld [vmem:[%s5521_s19 + $0x40] sm:$0xff]  ;;  %v688_v20 = vld [vmem:[%s5521_s19 + $0x18] sm:$0xff]  ;;  %v924_v24 = vld [vmem:[%s7530_s8 + $0x8] sm:$0xff]  ;;  %vm2059_vm7 = vcmask 130048   ;;  %p4405_p11 = scmp.ne.s32.totalorder %s5341_s20, 1 }
  0xba   : > { %4827 = vmatmul.mubr.msk.f32.vlgmr.msra.gmra.mrb[0].mxu0 %vm709_vm3, %v686_v15  ;;  %5268 = vmatpush3.msk.msra.mxu1 %vm758_vm2, %v701_v13  ;;  %v689_v21 = vld [vmem:[%s5521_s19 + $0x20] sm:$0xff]  ;;  %v696_v23 = vld [vmem:[%s5521_s19 + $0x58] sm:$0xff]  ;;  %v690_v27 = vld [vmem:[%s5521_s19 + $0x28] sm:$0xff]  ;;  %p3928_p12 = scmp.eq.s32.totalorder (!%p4405_p11), %s5345_s21, 1  ;;  %p4406_p13 = scmp.ne.s32.totalorder (!%p4405_p11), %s5345_s21, 1 }
  0xbb   : > { %4829 = vmatprep.mubr.msk.f32.mxu0 %vm709_vm3, %v687_v16  ;;  %4838 = vmatprep.mubr.msk.f32.mxu1 %vm709_vm3, %v693_v17  ;;  %v923_v22 = vld [vmem:[%s7530_s8] sm:$0xff]  ;;  %v691_v28 = vld [vmem:[%s5521_s19 + $0x30] sm:$0xff]  ;;  %v698_v29 = vld [vmem:[%s5521_s19 + $0x68] sm:$0xff] }
  0xbc   : > { %4839 = vmatmul.mubr.msk.f32.vlgmr.msra.gmra.mrb[0].mxu1 %vm709_vm3, %v694_v18  ;;  %v697_v25 = vld [vmem:[%s5521_s19 + $0x60] sm:$0xff]  ;;  %v4975_v26 = vpack.c.bf16 %v924_v24, %v923_v22  ;;  %v699_v30 = vld [vmem:[%s5521_s19 + $0x70] sm:$0xff]  ;;  %v692_v31 = vld [vmem:[%s5521_s19 + $0x38] sm:$0xff]  ;;  %5316 = vset.pattern.permute.xlu0 %v5361_v38 }
  0xbd   : > { %4841 = vmatprep.mubr.msk.f32.mxu1 %vm709_vm3, %v695_v19  ;;  %v700_v32 = vld [vmem:[%s5521_s19 + $0x78] sm:$0xff]  ;;  %v925_v33 = vld [vmem:[%s7530_s8 + $0x10] sm:$0xff]  ;;  %v1945_v36 = vld [vmem:[%s5516_s18] sm:$0xff]  ;;  %5317 = vset.pattern.permute.xlu1 %v5361_v38 }
  0xbe   : > { %4830 = vmatmul.mubr.msk.f32.gmra.mrb[2].mxu0 %vm709_vm3, %v688_v20  ;;  %4976 = vmatprep.subr.bf16.mxu1 %v4975_v26  ;;  %v926_v34 = vld [vmem:[%s7530_s8 + $0x18] sm:$0xff]  ;;  %v1947_v37 = vld [vmem:[%s5516_s18 + $0x10] sm:$0xff]  ;;  %v1946_v39 = vld [vmem:[%s5516_s18 + $0x8] sm:$0xff] }
  0xbf   : > { %4832 = vmatprep.mubr.msk.f32.mxu0 %vm709_vm3, %v689_v21  ;;  %4978 = vmatpush3.bf16.msra.mxu1 %v4975_v26  ;;  %v4979_v35 = vpack.c.bf16 %v926_v34, %v925_v33  ;;  %v1948_v40 = vld [vmem:[%s5516_s18 + $0x18] sm:$0xff]  ;;  %v1145_v41 = vld [vmem:[%s7532_s10 + $0x8] sm:$0xff]  ;;  %v1144_v47 = vld [vmem:[%s7532_s10] sm:$0xff] }
  0xc0   : > { %4842 = vmatmul.mubr.msk.f32.gmra.mrb[2].mxu1 %vm709_vm3, %v696_v23  ;;  %1962 = vperm.xlu0 %5316, %v1945_v36   ;;  %v1153_v42 = vld [vmem:[%s7532_s10 + $0x48] sm:$0xff]  ;;  %v1147_v43 = vld [vmem:[%s7532_s10 + $0x18] sm:$0xff]  ;;  %v1152_v48 = vld [vmem:[%s7532_s10 + $0x40] sm:$0xff] }
  0xc1   : > { %4844 = vmatprep.mubr.msk.f32.mxu1 %vm709_vm3, %v697_v25  ;;  %4980 = vmatprep.subr.bf16.mxu1 %v4979_v35  ;;  %v1155_v44 = vld [vmem:[%s7532_s10 + $0x58] sm:$0xff]  ;;  %v4983_v45 = vpack.c.bf16 %v1153_v42, %v1145_v41  ;;  %v4985_v49 = vpack.c.bf16 %v1152_v48, %v1144_v47  ;;  %v1949_v50 = vld [vmem:[%s5516_s18 + $0x20] sm:$0xff]  ;;  %v1161_v51 = vld [vmem:[%s7532_s10 + $0x88] sm:$0xff] }
  0xc2   : > { %4833 = vmatmul.mubr.msk.f32.gmra.mrb[4].mxu0 %vm709_vm3, %v690_v27  ;;  %1968 = vperm.xlu1 %5317, %v1947_v37   ;;  %v4999_v46 = vpack.c.bf16 %v1155_v44, %v1147_v43  ;;  %v1169_v52 = vld [vmem:[%s7532_s10 + $0xc8] sm:$0xff]  ;;  %v1160_v55 = vld [vmem:[%s7532_s10 + $0x80] sm:$0xff]  ;;  %v1951_v62 = vld [vmem:[%s5516_s18 + $0x30] sm:$0xff] }
  0xc3   : > { %4835 = vmatprep.mubr.msk.f32.mxu0 %vm709_vm3, %v691_v28  ;;  %4982 = vmatpush3.bf16.msra.mxu1 %v4979_v35  ;;  %v1950_v53 = vld [vmem:[%s5516_s18 + $0x28] sm:$0xff]  ;;  %v4987_v54 = vpack.c.bf16 %v1169_v52, %v1161_v51  ;;  %v1168_v56 = vld [vmem:[%s7532_s10 + $0xc0] sm:$0xff]  ;;  %v1952_v63 = vld [vmem:[%s5516_s18 + $0x38] sm:$0xff] }
  0xc4   : > { %4845 = vmatmul.mubr.msk.f32.gmra.mrb[4].mxu1 %vm709_vm3, %v698_v29  ;;  %1965 = vperm.xlu0 %5316, %v1946_v39   ;;  %v4989_v57 = vpack.c.bf16 %v1168_v56, %v1160_v55  ;;  %v1177_v58 = vld [vmem:[%s7532_s10 + $0x108] sm:$0xff]  ;;  %v1176_v61 = vld [vmem:[%s7532_s10 + $0x100] sm:$0xff]  ;;  %v1955_v4 = vld [vmem:[%s5516_s18 + $0x50] sm:$0xff] }
  0xc5   : > { %4847 = vmatprep.mubr.msk.f32.mxu1 %vm709_vm3, %v699_v30  ;;  %4984 = vmatprep.subr.bf16.mxu0 %v4983_v45  ;;  %v1185_v59 = vld [vmem:[%s7532_s10 + $0x148] sm:$0xff]  ;;  %v1184_v0 = vld [vmem:[%s7532_s10 + $0x140] sm:$0xff]  ;;  %v1956_v5 = vld [vmem:[%s5516_s18 + $0x58] sm:$0xff] }
  0xc6   : > { %4836 = vmatmul.mubr.msk.f32.gmra.mrb[6].mxu0 %vm709_vm3, %v692_v31  ;;  %1971 = vperm.xlu1 %5317, %v1948_v40   ;;  %v4991_v60 = vpack.c.bf16 %v1185_v59, %v1177_v58  ;;  %v4993_v1 = vpack.c.bf16 %v1184_v0, %v1176_v61  ;;  %v1953_v2 = vld [vmem:[%s5516_s18 + $0x40] sm:$0xff]  ;;  %v1954_v3 = vld [vmem:[%s5516_s18 + $0x48] sm:$0xff]  ;;  %v1959_v7 = vld [vmem:[%s5516_s18 + $0x70] sm:$0xff] }
  0xc7   : > { %5000 = vmatprep.subr.bf16.mxu1 %v4999_v46  ;;  %4986 = vmatpush1.bf16.msra.mxu0 %v4985_v49  ;;  %v1957_v6 = vld [vmem:[%s5516_s18 + $0x60] sm:$0xff]  ;;  %v1146_v12 = vld [vmem:[%s7532_s10 + $0x10] sm:$0xff]  ;;  %v1163_v16 = vld [vmem:[%s7532_s10 + $0x98] sm:$0xff] }
  0xc8   : > { %4848 = vmatmul.mubr.msk.f32.gmra.mrb[6].mxu1 %vm709_vm3, %v700_v32  ;;  %4988 = vmatprep.subr.bf16.mxu0 %v4987_v54  ;;  %v5642_v8 = vld [vmem:[%s7529_s7] ss:$0 sm:$0xff]  ;;  %v1154_v13 = vld [vmem:[%s7532_s10 + $0x50] sm:$0xff]  ;;  %v1171_v17 = vld [vmem:[%s7532_s10 + $0xd8] sm:$0xff] }
  0xc9   : > { %1974 = vperm.xlu0 %5316, %v1949_v50   ;;  %v5001_v21 = vpack.c.bf16 %v1154_v13, %v1146_v12  ;;  %v5003_v25 = vpack.c.bf16 %v1171_v17, %v1163_v16  ;;  %v1162_v26 = vld [vmem:[%s7532_s10 + $0x90] sm:$0xff]  ;;  %v1179_v30 = vld [vmem:[%s7532_s10 + $0x118] sm:$0xff]  ;;  %v1192_v13 = vld [vmem:[%s7532_s10 + $0x180] sm:$0xff] }
  0xca   : > { %1977 = vperm.xlu1 %5317, %v1950_v53   ;;  %v1170_v27 = vld [vmem:[%s7532_s10 + $0xd0] sm:$0xff]  ;;  %v1187_v31 = vld [vmem:[%s7532_s10 + $0x158] sm:$0xff] }
  0xcb   : > { %4990 = vmatpush1.bf16.msra.mxu0 %v4989_v57  ;;  %v5005_v36 = vpack.c.bf16 %v1170_v27, %v1162_v26  ;;  %v5007_v39 = vpack.c.bf16 %v1187_v31, %v1179_v30  ;;  %v1178_v40 = vld [vmem:[%s7532_s10 + $0x110] sm:$0xff]  ;;  %v1203_v12 = vld [vmem:[%s7532_s10 + $0x1d8] sm:$0xff]  ;;  %v1148_v31 = vld [vmem:[%s7532_s10 + $0x20] sm:$0xff] }
  0xcc   : > { %4992 = vmatprep.subr.bf16.mxu0 %v4991_v60  ;;  %v1186_v41 = vld [vmem:[%s7532_s10 + $0x150] sm:$0xff]  ;;  %v1151_v26 = vld [vmem:[%s7532_s10 + $0x38] sm:$0xff] }
  0xcd   : > { %1980 = vperm.xlu0 %5316, %v1951_v62   ;;  %v5009_v49 = vpack.c.bf16 %v1186_v41, %v1178_v40  ;;  %v1194_v16 = vld [vmem:[%s7532_s10 + $0x190] sm:$0xff]  ;;  %v1159_v27 = vld [vmem:[%s7532_s10 + $0x78] sm:$0xff] }
  0xce   : > { %1983 = vperm.xlu1 %5317, %v1952_v63   ;;  %v1202_v17 = vld [vmem:[%s7532_s10 + $0x1d0] sm:$0xff]  ;;  %v1175_v40 = vld [vmem:[%s7532_s10 + $0xf8] sm:$0xff] }
  0xcf   : > { %4994 = vmatpush1.bf16.msra.mxu0 %v4993_v1 }
  0xd1   : > { %1986 = vperm.xlu0 %5316, %v1953_v2  }
  0xd2   : > { %1989 = vperm.xlu1 %5317, %v1954_v3  }
  0xd5   : > { %1992 = vperm.xlu0 %5316, %v1955_v4  }
  0xd6   : > { %1995 = vperm.xlu1 %5317, %v1956_v5  }
  0xd9   : > { %1998 = vperm.xlu0 %5316, %v1957_v6  }
  0xdd   : > { %2004 = vperm.xlu0 %5316, %v1959_v7  }
 0x18d   : > { %v4828_v9 = vpop.f32.mrb[0].mxu0 }
 0x18e   : > { %v834_v10 = vadd.f32 %v4828_v9, %v5642_v8  ;;  %v828_v11 = vpop.f32.mrb[1].mxu0  ;;  %v1193_v9 = vld [vmem:[%s7532_s10 + $0x188] sm:$0xff] }
 0x18f   : > { %v829_v14 = vadd.f32 %v5642_v8, %v828_v11  ;;  %v4840_v15 = vpop.f32.mrb[0].mxu1 }
 0x190   : > { %v868_v18 = vpop.f32.mrb[1].mxu1  ;;  %v908_v22 = vmax.f32 %v834_v10, 0.0  ;;  %v874_v55 = vadd.f32 %v4840_v15, %v5642_v8  ;;  %v1201_v10 = vld [vmem:[%s7532_s10 + $0x1c8] sm:$0xff]  ;;  %v1200_v15 = vld [vmem:[%s7532_s10 + $0x1c0] sm:$0xff] }
 0x191   : > { %v907_v19 = vmax.f32 %v829_v14, 0.0  ;;  %v4831_v20 = vpop.f32.mrb[2].mxu0  ;;  %v869_v48 = vadd.f32 %v5642_v8, %v868_v18  ;;  %v4995_v11 = vpack.c.bf16 %v1201_v10, %v1193_v9  ;;  %v4997_v18 = vpack.c.bf16 %v1200_v15, %v1192_v13  ;;  %v1207_v9 = vld [vmem:[%s7532_s10 + $0x1f8] sm:$0xff]  ;;  %v1196_v13 = vld [vmem:[%s7532_s10 + $0x1a0] sm:$0xff] }
 0x192   : > { %v844_v23 = vadd.f32 %v4831_v20, %v5642_v8  ;;  %v838_v24 = vpop.f32.mrb[3].mxu0  ;;  %v916_v60 = vmax.f32 %v874_v55, 0.0  ;;  %v1958_v20 = vld [vmem:[%s5516_s18 + $0x68] sm:$0xff]  ;;  %v1183_v55 = vld [vmem:[%s7532_s10 + $0x138] sm:$0xff] }
 0x193   : > { %v839_v28 = vadd.f32 %v5642_v8, %v838_v24  ;;  %4858 = vmatprep.mubr.msk.f32.mxu1 %vm934_vm4, %v907_v19  ;;  %v4843_v29 = vpop.f32.mrb[2].mxu1  ;;  %v915_v58 = vmax.f32 %v869_v48, 0.0  ;;  %4996 = vmatprep.subr.bf16.mxu0 %v4995_v11  ;;  %v5013_v19 = vpack.c.bf16 %v1202_v17, %v1194_v16  ;;  %v1157_v24 = vld [vmem:[%s7532_s10 + $0x68] sm:$0xff]  ;;  %v1204_v17 = vld [vmem:[%s7532_s10 + $0x1e0] sm:$0xff] }
 0x194   : > { %v910_v32 = vmax.f32 %v844_v23, 0.0  ;;  %4859 = vmatmul.mubr.msk.f32.vlgmr.msra.gmra.mrb[8].mxu1 %vm934_vm4, %v908_v22  ;;  %v878_v33 = vpop.f32.mrb[3].mxu1  ;;  %v884_v61 = vadd.f32 %v4843_v29, %v5642_v8  ;;  %4998 = vmatpush1.bf16.msra.mxu0 %v4997_v18  ;;  %v1960_v22 = vld [vmem:[%s5516_s18 + $0x78] sm:$0xff]  ;;  %v1149_v23 = vld [vmem:[%s7532_s10 + $0x28] sm:$0xff]  ;;  %v5749_v29 = vld [vmem:[%s7531_s9] ss:$0 sm:$0xff] }
 0x195   : > { %v909_v34 = vmax.f32 %v839_v28, 0.0  ;;  %v4834_v35 = vpop.f32.mrb[4].mxu0  ;;  %5002 = vmatpush1.bf16.msra.mxu1 %v5001_v21  ;;  %v879_v59 = vadd.f32 %v5642_v8, %v878_v33  ;;  %2001 = vperm.xlu1 %5317, %v1958_v20   ;;  %v7550_v21 = vmov 0.0   ;;  %v5031_v28 = vpack.c.bf16 %v1159_v27, %v1151_v26  ;;  %v1206_v20 = vld [vmem:[%s7532_s10 + $0x1f0] sm:$0xff] }
 0x196   : > { %v854_v37 = vadd.f32 %v4834_v35, %v5642_v8  ;;  %v848_v38 = vpop.f32.mrb[5].mxu0  ;;  %5004 = vmatprep.subr.bf16.mxu1 %v5003_v25  ;;  %v918_v0 = vmax.f32 %v884_v61, 0.0  ;;  %1363 = vmatprep.mubr.f32.mxu0 %v7550_v21  ;;  %v5015_v25 = vpack.c.bf16 %v1157_v24, %v1149_v23  ;;  %v1150_v35 = vld [vmem:[%s7532_s10 + $0x30] sm:$0xff]  ;;  %v1180_v61 = vld [vmem:[%s7532_s10 + $0x120] sm:$0xff]  ;;  %v2058_v23 = vld [vmem:[#allocation2 + $0x8] sm:$0xff]  ;;  %v5029_v27 = vpack.c.bf16 %v1204_v17, %v1196_v13 }
 0x197   : > { %4861 = vmatprep.mubr.msk.f32.mxu1 %vm934_vm4, %v909_v34  ;;  %v849_v42 = vadd.f32 %v5642_v8, %v848_v38  ;;  %v4846_v43 = vpop.f32.mrb[4].mxu1  ;;  %v917_v62 = vmax.f32 %v879_v59, 0.0  ;;  %v1165_v34 = vld [vmem:[%s7532_s10 + $0xa8] sm:$0xff] }
 0x198   : > { %4862 = vmatmul.mubr.msk.f32.gmra.mrb[10].mxu1 %vm934_vm4, %v910_v32  ;;  %v912_v44 = vmax.f32 %v854_v37, 0.0  ;;  %v888_v45 = vpop.f32.mrb[5].mxu1  ;;  %v894_v1 = vadd.f32 %v4846_v43, %v5642_v8  ;;  %5016 = vmatprep.subr.bf16.mxu0 %v5015_v25  ;;  %v1156_v32 = vld [vmem:[%s7532_s10 + $0x60] sm:$0xff]  ;;  %v1173_v38 = vld [vmem:[%s7532_s10 + $0xe8] sm:$0xff] }
 0x199   : > { %v911_v46 = vmax.f32 %v849_v42, 0.0  ;;  %v4837_v47 = vpop.f32.mrb[6].mxu0  ;;  %5006 = vmatpush1.bf16.msra.mxu1 %v5005_v36  ;;  %v889_v63 = vadd.f32 %v5642_v8, %v888_v45  ;;  %2007 = vperm.xlu1 %5317, %v1960_v22   ;;  %v1158_v36 = vld [vmem:[%s7532_s10 + $0x70] sm:$0xff]  ;;  %v1164_v45 = vld [vmem:[%s7532_s10 + $0xa0] sm:$0xff] }
 0x19a   : > { %v864_v50 = vadd.f32 %v4837_v47, %v5642_v8  ;;  %v858_v51 = vpop.f32.mrb[7].mxu0  ;;  %5008 = vmatprep.subr.bf16.mxu1 %v5007_v39  ;;  %v920_v4 = vmax.f32 %v894_v1, 0.0  ;;  %v1167_v39 = vld [vmem:[%s7532_s10 + $0xb8] sm:$0xff]  ;;  %v5033_v47 = vpack.c.bf16 %v1158_v36, %v1150_v35  ;;  %v2057_v22 = vld [vmem:[#allocation2] sm:$0xff] }
 0x19b   : > { %4864 = vmatprep.mubr.msk.f32.mxu1 %vm934_vm4, %v911_v46  ;;  %v859_v52 = vadd.f32 %v5642_v8, %v858_v51  ;;  %v4849_v53 = vpop.f32.mrb[6].mxu1  ;;  %v919_v2 = vmax.f32 %v889_v63, 0.0  ;;  %v1172_v46 = vld [vmem:[%s7532_s10 + $0xe0] sm:$0xff]  ;;  %v5035_v51 = vpack.c.bf16 %v1175_v40, %v1167_v39 }
 0x19c   : > { %4865 = vmatmul.mubr.msk.f32.gmra.mrb[12].mxu1 %vm934_vm4, %v912_v44  ;;  %v914_v54 = vmax.f32 %v864_v50, 0.0  ;;  %v898_v56 = vpop.f32.mrb[7].mxu1  ;;  %v904_v5 = vadd.f32 %v4849_v53, %v5642_v8  ;;  %v5017_v44 = vpack.c.bf16 %v1156_v32, %v1148_v31  ;;  %v1181_v50 = vld [vmem:[%s7532_s10 + $0x128] sm:$0xff]  ;;  %v1174_v53 = vld [vmem:[%s7532_s10 + $0xf0] sm:$0xff]  ;;  %v5866_v31 = vpack.c.bf16 %v2058_v23, %v2057_v22 }
 0x19d   : > { %v913_v57 = vmax.f32 %v859_v52, 0.0  ;;  %5010 = vmatpush1.bf16.msra.mxu1 %v5009_v49  ;;  %v899_v3 = vadd.f32 %v5642_v8, %v898_v56  ;;  %v1195_v8 = vld [vmem:[%s7532_s10 + $0x198] sm:$0xff]  ;;  %v5019_v49 = vpack.c.bf16 %v1173_v38, %v1165_v34  ;;  %v1166_v52 = vld [vmem:[%s7532_s10 + $0xb0] sm:$0xff] }
 0x19e   : > { %v922_v7 = vmax.f32 %v904_v5, 0.0  ;;  %v5011_v14 = vpack.c.bf16 %v1203_v12, %v1195_v8  ;;  %v1191_v56 = vld [vmem:[%s7532_s10 + $0x178] sm:$0xff]  ;;  %v5037_v63 = vpack.c.bf16 %v1174_v53, %v1166_v52  ;;  %v1190_v5 = vld [vmem:[%s7532_s10 + $0x170] sm:$0xff] }
 0x19f   : > { %4867 = vmatprep.mubr.msk.f32.mxu1 %vm934_vm4, %v913_v57  ;;  %v921_v6 = vmax.f32 %v899_v3, 0.0  ;;  %v5039_v3 = vpack.c.bf16 %v1191_v56, %v1183_v55 }
 0x1a0   : > { %4868 = vmatmul.mubr.msk.f32.gmra.mrb[14].mxu1 %vm934_vm4, %v914_v54  ;;  %5012 = vmatprep.subr.bf16.mxu1 %v5011_v14  ;;  %v1189_v54 = vld [vmem:[%s7532_s10 + $0x168] sm:$0xff] }
 0x1a1   : > { %4870 = vmatprep.mubr.msk.f32.mxu1 %vm934_vm4, %v915_v58  ;;  %5014 = vmatpush1.bf16.msra.mxu1 %v5013_v19  ;;  %v5023_v1 = vpack.c.bf16 %v1189_v54, %v1181_v50  ;;  %v1198_v19 = vld [vmem:[%s7532_s10 + $0x1b0] sm:$0xff] }
 0x1a2   : > { %5032 = vmatprep.subr.bf16.mxu1 %v5031_v28  ;;  %v5045_v28 = vpack.c.bf16 %v1206_v20, %v1198_v19 }
 0x1a4   : > { %4871 = vmatmul.mubr.msk.f32.gmra.mrb[16].mxu1 %vm934_vm4, %v916_v60  ;;  %v5021_v60 = vpack.c.bf16 %v1172_v46, %v1164_v45 }
 0x1a5   : > { %4873 = vmatprep.mubr.msk.f32.mxu1 %vm934_vm4, %v917_v62  ;;  %v1188_v62 = vld [vmem:[%s7532_s10 + $0x160] sm:$0xff] }
 0x1a6   : > { %v5025_v12 = vpack.c.bf16 %v1188_v62, %v1180_v61 }
 0x1a8   : > { %4874 = vmatmul.mubr.msk.f32.gmra.mrb[18].mxu1 %vm934_vm4, %v918_v0 }
 0x1a9   : > { %4876 = vmatprep.mubr.msk.f32.mxu1 %vm934_vm4, %v919_v2  ;;  %v1197_v2 = vld [vmem:[%s7532_s10 + $0x1a8] sm:$0xff] }
 0x1ac   : > { %4877 = vmatmul.mubr.msk.f32.gmra.mrb[20].mxu1 %vm934_vm4, %v920_v4  ;;  %v1182_v4 = vld [vmem:[%s7532_s10 + $0x130] sm:$0xff] }
 0x1ad   : > { %4879 = vmatprep.mubr.msk.f32.mxu1 %vm934_vm4, %v921_v6  ;;  %v1205_v6 = vld [vmem:[%s7532_s10 + $0x1e8] sm:$0xff]  ;;  %v5041_v14 = vpack.c.bf16 %v1190_v5, %v1182_v4 }
 0x1ae   : > { %v5027_v16 = vpack.c.bf16 %v1205_v6, %v1197_v2 }
 0x1b0   : > { %4880 = vmatmul.mubr.msk.f32.gmra.mrb[22].mxu1 %vm934_vm4, %v922_v7  ;;  %v1199_v7 = vld [vmem:[%s7532_s10 + $0x1b8] sm:$0xff] }
 0x1b1   : > { %1524 = vmatprep.mubr.f32.mxu1 %v7550_v21  ;;  %v5043_v18 = vpack.c.bf16 %v1207_v9, %v1199_v7 }
 0x267   : > { %v4860_v30 = vpop.f32.mrb[8].mxu1 }
 0x268   : > { %v1049_v33 = vpop.f32.mrb[9].mxu1  ;;  %v1055_v41 = vadd.f32 %v4860_v30, %v5749_v29 }
 0x269   : > { %v1050_v37 = vadd.f32 %v5749_v29, %v1049_v33 }
 0x26a   : > { %v5809_v57 = vmax.f32 %v1055_v41, 0.0 }
 0x26b   : > { %v5777_v42 = vmax.f32 %v1050_v37, 0.0  ;;  %v4863_v43 = vpop.f32.mrb[10].mxu1 }
 0x26c   : > { %v1059_v48 = vpop.f32.mrb[11].mxu1  ;;  %v1065_v10 = vadd.f32 %v4863_v43, %v5749_v29 }
 0x26d   : > { %4240 = vmatmul.mubr.msk.f32.vlgmr.msra.gmra.mrb[8].mxu0 %vm1250_vm5, %v5777_v42  ;;  %4256 = vmatmul.mubr.msk.f32.vlgmr.msra.gmra.mrb[24].mxu1 %vm1250_vm5, %v5777_v42  ;;  %v1060_v58 = vadd.f32 %v5749_v29, %v1059_v48 }
 0x26e   : > { %1369 = vmatprep.mubr.f32.mxu0 %v7550_v21  ;;  %1530 = vmatprep.mubr.f32.mxu1 %v7550_v21  ;;  %v5863_v24 = vmax.f32 %v1065_v10, 0.0 }
 0x26f   : > { %5018 = vmatpush1.bf16.msra.mxu0 %v5017_v44  ;;  %v4866_v59 = vpop.f32.mrb[12].mxu1  ;;  %5034 = vmatpush1.bf16.msra.mxu1 %v5033_v47  ;;  %v5843_v8 = vmax.f32 %v1060_v58, 0.0 }
 0x270   : > { %v1069_v0 = vpop.f32.mrb[13].mxu1  ;;  %5020 = vmatprep.subr.bf16.mxu0 %v5019_v49  ;;  %5036 = vmatprep.subr.bf16.mxu1 %v5035_v51  ;;  %v1075_v32 = vadd.f32 %v4866_v59, %v5749_v29 }
 0x271   : > { %4241 = vmatmul.mubr.msk.f32.gmra.mrb[10].mxu0 %vm1250_vm5, %v5809_v57  ;;  %4257 = vmatmul.mubr.msk.f32.gmra.mrb[26].mxu1 %vm1250_vm5, %v5809_v57  ;;  %v1070_v25 = vadd.f32 %v5749_v29, %v1069_v0 }
 0x272   : > { %1375 = vmatprep.mubr.f32.mxu0 %v7550_v21  ;;  %1536 = vmatprep.mubr.f32.mxu1 %v7550_v21  ;;  %v5884_v36 = vmax.f32 %v1075_v32, 0.0  ;;  %v2262_v32 = vld [vmem:[%s7534_s12 + $0x48] sm:$0xff] }
 0x273   : > { %v4869_v11 = vpop.f32.mrb[14].mxu1  ;;  %5022 = vmatpush1.bf16.msra.mxu0 %v5021_v60  ;;  %5038 = vmatpush1.bf16.msra.mxu1 %v5037_v63  ;;  %v5875_v33 = vmax.f32 %v1070_v25, 0.0  ;;  %v7549_v63 = vlaneseq }
 0x274   : > { %v1079_v15 = vpop.f32.mrb[15].mxu1  ;;  %5024 = vmatprep.subr.bf16.mxu0 %v5023_v1  ;;  %5040 = vmatprep.subr.bf16.mxu1 %v5039_v3  ;;  %v1085_v40 = vadd.f32 %v4869_v11, %v5749_v29 }
 0x275   : > { %4242 = vmatmul.mubr.msk.f32.gmra.mrb[12].mxu0 %vm1250_vm5, %v5843_v8  ;;  %4258 = vmatmul.mubr.msk.f32.gmra.mrb[28].mxu1 %vm1250_vm5, %v5843_v8  ;;  %v1080_v37 = vadd.f32 %v5749_v29, %v1079_v15  ;;  %v6062_v1 = vand.u32 127, %v7549_v63 }
 0x276   : > { %1381 = vmatprep.mubr.f32.mxu0 %v7550_v21  ;;  %1542 = vmatprep.mubr.f32.mxu1 %v7550_v21  ;;  %v5902_v45 = vmax.f32 %v1085_v40, 0.0  ;;  %v2269_v40 = vld [vmem:[%s7534_s12 + $0x80] sm:$0xff] }
 0x277   : > { %v4872_v26 = vpop.f32.mrb[16].mxu1  ;;  %5026 = vmatpush1.bf16.msra.mxu0 %v5025_v12  ;;  %5042 = vmatpush1.bf16.msra.mxu1 %v5041_v14  ;;  %v5894_v41 = vmax.f32 %v1080_v37, 0.0 }
 0x278   : > { %v1089_v30 = vpop.f32.mrb[17].mxu1  ;;  %5028 = vmatprep.subr.bf16.mxu0 %v5027_v16  ;;  %5044 = vmatprep.subr.bf16.mxu1 %v5043_v18  ;;  %v1095_v47 = vadd.f32 %v4872_v26, %v5749_v29 }
 0x279   : > { %4243 = vmatmul.mubr.msk.f32.gmra.mrb[14].mxu0 %vm1250_vm5, %v5863_v24  ;;  %4259 = vmatmul.mubr.msk.f32.gmra.mrb[30].mxu1 %vm1250_vm5, %v5863_v24  ;;  %v1090_v46 = vadd.f32 %v5749_v29, %v1089_v30 }
 0x27a   : > { %1387 = vmatprep.mubr.f32.mxu0 %v7550_v21  ;;  %1548 = vmatprep.mubr.f32.mxu1 %v7550_v21  ;;  %v5920_v49 = vmax.f32 %v1095_v47, 0.0 }
 0x27b   : > { %v4875_v34 = vpop.f32.mrb[18].mxu1  ;;  %5030 = vmatpush1.bf16.msra.mxu0 %v5029_v27  ;;  %5046 = vmatpush1.bf16.msra.mxu1 %v5045_v28  ;;  %v5912_v48 = vmax.f32 %v1090_v46, 0.0  ;;  %v2264_v46 = vld [vmem:[%s7534_s12 + $0x58] sm:$0xff] }
 0x27c   : > { %v1099_v35 = vpop.f32.mrb[19].mxu1  ;;  %5048 = vmatprep.subr.bf16.mxu0 %v5866_v31  ;;  %v1105_v51 = vadd.f32 %v4875_v34, %v5749_v29 }
 0x27d   : > { %4244 = vmatmul.mubr.msk.f32.gmra.mrb[16].mxu0 %vm1250_vm5, %v5875_v33  ;;  %4260 = vmatmul.mubr.msk.f32.gmra.mrb[32].mxu1 %vm1250_vm5, %v5875_v33  ;;  %v1100_v50 = vadd.f32 %v5749_v29, %v1099_v35  ;;  %v2261_v35 = vld [vmem:[%s7534_s12 + $0x40] sm:$0xff] }
 0x27e   : > { %1393 = vmatprep.mubr.f32.mxu0 %v7550_v21  ;;  %1554 = vmatprep.mubr.f32.mxu1 %v7550_v21  ;;  %v5938_v53 = vmax.f32 %v1105_v51, 0.0  ;;  %v2272_v51 = vld [vmem:[%s7534_s12 + $0x98] sm:$0xff] }
 0x27f   : > { %v4878_v38 = vpop.f32.mrb[20].mxu1  ;;  %v5930_v52 = vmax.f32 %v1100_v50, 0.0 }
 0x280   : > { %v1109_v39 = vpop.f32.mrb[21].mxu1  ;;  %v1115_v55 = vadd.f32 %v4878_v38, %v5749_v29  ;;  %v2270_v38 = vld [vmem:[%s7534_s12 + $0x88] sm:$0xff] }
 0x281   : > { %4245 = vmatmul.mubr.msk.f32.gmra.mrb[18].mxu0 %vm1250_vm5, %v5884_v36  ;;  %4261 = vmatmul.mubr.msk.f32.gmra.mrb[34].mxu1 %vm1250_vm5, %v5884_v36  ;;  %v1110_v54 = vadd.f32 %v5749_v29, %v1109_v39  ;;  %v2278_v39 = vld [vmem:[%s7534_s12 + $0xc8] sm:$0xff] }
 0x282   : > { %1399 = vmatprep.mubr.f32.mxu0 %v7550_v21  ;;  %1560 = vmatprep.mubr.f32.mxu1 %v7550_v21  ;;  %v5956_v58 = vmax.f32 %v1115_v55, 0.0  ;;  %v2279_v55 = vld [vmem:[%s7534_s12 + $0xd0] sm:$0xff] }
 0x283   : > { %v4881_v43 = vpop.f32.mrb[22].mxu1  ;;  %v5948_v56 = vmax.f32 %v1110_v54, 0.0  ;;  %v2271_v54 = vld [vmem:[%s7534_s12 + $0x90] sm:$0xff] }
 0x284   : > { %v1119_v44 = vpop.f32.mrb[23].mxu1  ;;  %v1125_v60 = vadd.f32 %v4881_v43, %v5749_v29  ;;  %v2277_v43 = vld [vmem:[%s7534_s12 + $0xc0] sm:$0xff] }
 0x285   : > { %4246 = vmatmul.mubr.msk.f32.gmra.mrb[20].mxu0 %vm1250_vm5, %v5894_v41  ;;  %4262 = vmatmul.mubr.msk.f32.gmra.mrb[36].mxu1 %vm1250_vm5, %v5894_v41  ;;  %v1120_v59 = vadd.f32 %v5749_v29, %v1119_v44  ;;  %v1963_v29 = vpop.permute.xlu0 %1962  ;;  %v5057_v44 = vpack.c.bf16 %v2277_v43, %v2269_v40 }
 0x286   : > { %1405 = vmatprep.mubr.f32.mxu0 %v7550_v21  ;;  %1566 = vmatprep.mubr.f32.mxu1 %v7550_v21  ;;  %v5974_v62 = vmax.f32 %v1125_v60, 0.0  ;;  %vm2009_vm6 = vcmp.eq.s32.totalorder %v6062_v1, %v1963_v29 }
 0x287   : > { %v5966_v61 = vmax.f32 %v1120_v59, 0.0  ;;  %v4304_v4 = vsel %vm2009_vm6, 1.0, %v7550_v21 }
 0x289   : > { %4247 = vmatmul.mubr.msk.f32.gmra.mrb[22].mxu0 %vm1250_vm5, %v5902_v45  ;;  %4263 = vmatmul.mubr.msk.f32.gmra.mrb[38].mxu1 %vm1250_vm5, %v5902_v45 }
 0x28a   : > { %1411 = vmatprep.mubr.f32.mxu0 %v7550_v21  ;;  %1572 = vmatprep.mubr.f32.mxu1 %v7550_v21 }
 0x28d   : > { %4248 = vmatmul.mubr.msk.f32.gmra.mrb[24].mxu0 %vm1250_vm5, %v5912_v48  ;;  %4264 = vmatmul.mubr.msk.f32.gmra.mrb[40].mxu1 %vm1250_vm5, %v5912_v48 }
 0x28e   : > { %1417 = vmatprep.mubr.f32.mxu0 %v7550_v21  ;;  %1578 = vmatprep.mubr.f32.mxu1 %v7550_v21 }
 0x291   : > { %4249 = vmatmul.mubr.msk.f32.gmra.mrb[26].mxu0 %vm1250_vm5, %v5920_v49  ;;  %4265 = vmatmul.mubr.msk.f32.gmra.mrb[42].mxu1 %vm1250_vm5, %v5920_v49 }
 0x292   : > { %1423 = vmatprep.mubr.f32.mxu0 %v7550_v21  ;;  %1584 = vmatprep.mubr.f32.mxu1 %v7550_v21 }
 0x295   : > { %4250 = vmatmul.mubr.msk.f32.gmra.mrb[28].mxu0 %vm1250_vm5, %v5930_v52  ;;  %4266 = vmatmul.mubr.msk.f32.gmra.mrb[44].mxu1 %vm1250_vm5, %v5930_v52 }
 0x296   : > { %1429 = vmatprep.mubr.f32.mxu0 %v7550_v21  ;;  %1590 = vmatprep.mubr.f32.mxu1 %v7550_v21 }
 0x299   : > { %4251 = vmatmul.mubr.msk.f32.gmra.mrb[30].mxu0 %vm1250_vm5, %v5938_v53  ;;  %4267 = vmatmul.mubr.msk.f32.gmra.mrb[46].mxu1 %vm1250_vm5, %v5938_v53 }
 0x29a   : > { %1435 = vmatprep.mubr.f32.mxu0 %v7550_v21  ;;  %1596 = vmatprep.mubr.f32.mxu1 %v7550_v21 }
 0x29d   : > { %4252 = vmatmul.mubr.msk.f32.gmra.mrb[32].mxu0 %vm1250_vm5, %v5948_v56  ;;  %4268 = vmatmul.mubr.msk.f32.gmra.mrb[48].mxu1 %vm1250_vm5, %v5948_v56 }
 0x29e   : > { %1441 = vmatprep.mubr.f32.mxu0 %v7550_v21  ;;  %1602 = vmatprep.mubr.f32.mxu1 %v7550_v21 }
 0x2a1   : > { %4253 = vmatmul.mubr.msk.f32.gmra.mrb[34].mxu0 %vm1250_vm5, %v5956_v58  ;;  %4269 = vmatmul.mubr.msk.f32.gmra.mrb[50].mxu1 %vm1250_vm5, %v5956_v58 }
 0x2a2   : > { %1447 = vmatprep.mubr.f32.mxu0 %v7550_v21  ;;  %1608 = vmatprep.mubr.f32.mxu1 %v7550_v21 }
 0x2a5   : > { %4254 = vmatmul.mubr.msk.f32.gmra.mrb[36].mxu0 %vm1250_vm5, %v5966_v61  ;;  %4270 = vmatmul.mubr.msk.f32.gmra.mrb[52].mxu1 %vm1250_vm5, %v5966_v61 }
 0x2a6   : > { %1453 = vmatprep.mubr.f32.mxu0 %v7550_v21  ;;  %1614 = vmatprep.mubr.f32.mxu1 %v7550_v21 }
 0x2a9   : > { %4255 = vmatmul.mubr.msk.f32.gmra.mrb[38].mxu0 %vm1250_vm5, %v5974_v62  ;;  %4271 = vmatmul.mubr.msk.f32.gmra.mrb[54].mxu1 %vm1250_vm5, %v5974_v62 }
 0x2aa   : > { %1685 = vmatprep.mubr.f32.mxu0 %v7550_v21  ;;  %1846 = vmatprep.mubr.f32.mxu1 %v7550_v21 }
 0x2ad   : > { %4272 = vmatmul.mubr.msk.f32.vlgmr.msra.gmra.mrb[40].mxu0 %vm1250_vm5, %v5777_v42  ;;  %4288 = vmatmul.mubr.msk.f32.vlgmr.msra.gmra.mrb[56].mxu1 %vm1250_vm5, %v5777_v42  ;;  %v1969_v42 = vpop.permute.xlu1 %1968 }
 0x2ae   : > { %1691 = vmatprep.mubr.f32.mxu0 %v7550_v21  ;;  %1852 = vmatprep.mubr.f32.mxu1 %v7550_v21  ;;  %vm2011_vm8 = vcmp.eq.s32.totalorder %v6062_v1, %v1969_v42 }
 0x2af   : > { %5050 = vmatpush3.bf16.msra.mxu0 %v5866_v31  ;;  %v4306_v7 = vsel %vm2011_vm8, 1.0, %v7550_v21  ;;  %v2254_v31 = vld [vmem:[%s7534_s12 + $0x8] sm:$0xff] }
 0x2b0   : > { %v5051_v34 = vpack.c.bf16 %v2262_v32, %v2254_v31 }
 0x2b1   : > { %4273 = vmatmul.mubr.msk.f32.gmra.mrb[42].mxu0 %vm1250_vm5, %v5809_v57  ;;  %4289 = vmatmul.mubr.msk.f32.gmra.mrb[58].mxu1 %vm1250_vm5, %v5809_v57  ;;  %v1966_v57 = vpop.permute.xlu0 %1965  ;;  %v1972_v0 = vpop.permute.xlu1 %1971 }
 0x2b2   : > { %1697 = vmatprep.mubr.f32.mxu0 %v7550_v21  ;;  %1858 = vmatprep.mubr.f32.mxu1 %v7550_v21  ;;  %vm2010_vm9 = vcmp.eq.s32.totalorder %v6062_v1, %v1966_v57  ;;  %vm2012_vm10 = vcmp.eq.s32.totalorder %v6062_v1, %v1972_v0  ;;  %v2258_v0 = vld [vmem:[%s7534_s12 + $0x28] sm:$0xff] }
 0x2b3   : > { %v4305_v9 = vsel %vm2010_vm9, 1.0, %v7550_v21  ;;  %5052 = vmatprep.subr.bf16.mxu1 %v5051_v34 }
 0x2b5   : > { %4274 = vmatmul.mubr.msk.f32.gmra.mrb[44].mxu0 %vm1250_vm5, %v5843_v8  ;;  %4290 = vmatmul.mubr.msk.f32.gmra.mrb[60].mxu1 %vm1250_vm5, %v5843_v8  ;;  %v1975_v2 = vpop.permute.xlu0 %1974  ;;  %v1978_v3 = vpop.permute.xlu1 %1977  ;;  %v4307_v8 = vsel %vm2012_vm10, 1.0, %v7550_v21 }
 0x2b6   : > { %1703 = vmatprep.mubr.f32.mxu0 %v7550_v21  ;;  %1864 = vmatprep.mubr.f32.mxu1 %v7550_v21  ;;  %vm2013_vm11 = vcmp.eq.s32.totalorder %v6062_v1, %v1975_v2  ;;  %vm2014_vm12 = vcmp.eq.s32.totalorder %v6062_v1, %v1978_v3 }
 0x2b7   : > { %v4308_v12 = vsel %vm2013_vm11, 1.0, %v7550_v21  ;;  %v4309_v14 = vsel %vm2014_vm12, 1.0, %v7550_v21 }
 0x2b9   : > { %4275 = vmatmul.mubr.msk.f32.gmra.mrb[46].mxu0 %vm1250_vm5, %v5863_v24  ;;  %4291 = vmatmul.mubr.msk.f32.gmra.mrb[62].mxu1 %vm1250_vm5, %v5863_v24  ;;  %v1981_v5 = vpop.permute.xlu0 %1980  ;;  %v1984_v6 = vpop.permute.xlu1 %1983 }
 0x2ba   : > { %1709 = vmatprep.mubr.f32.mxu0 %v7550_v21  ;;  %1870 = vmatprep.mubr.f32.mxu1 %v7550_v21  ;;  %vm2015_vm13 = vcmp.eq.s32.totalorder %v6062_v1, %v1981_v5  ;;  %vm2016_vm14 = vcmp.eq.s32.totalorder %v6062_v1, %v1984_v6  ;;  %v2260_v5 = vld [vmem:[%s7534_s12 + $0x38] sm:$0xff] }
 0x2bb   : > { %v4310_v15 = vsel %vm2015_vm13, 1.0, %v7550_v21  ;;  %v4311_v17 = vsel %vm2016_vm14, 1.0, %v7550_v21  ;;  %v2268_v6 = vld [vmem:[%s7534_s12 + $0x78] sm:$0xff] }
 0x2bd   : > { %4276 = vmatmul.mubr.msk.f32.gmra.mrb[48].mxu0 %vm1250_vm5, %v5875_v33  ;;  %4292 = vmatmul.mubr.msk.f32.gmra.mrb[64].mxu1 %vm1250_vm5, %v5875_v33  ;;  %v1987_v10 = vpop.permute.xlu0 %1986  ;;  %v1990_v11 = vpop.permute.xlu1 %1989  ;;  %v2253_v33 = vld [vmem:[%s7534_s12] sm:$0xff] }
 0x2be   : > { %1715 = vmatprep.mubr.f32.mxu0 %v7550_v21  ;;  %1876 = vmatprep.mubr.f32.mxu1 %v7550_v21  ;;  %vm2017_vm15 = vcmp.eq.s32.totalorder %v6062_v1, %v1987_v10  ;;  %vm2018_vm0 = vcmp.eq.s32.totalorder %v6062_v1, %v1990_v11  ;;  %v5053_v37 = vpack.c.bf16 %v2261_v35, %v2253_v33 }
 0x2bf   : > { %v4312_v18 = vsel %vm2017_vm15, 1.0, %v7550_v21  ;;  %v4313_v20 = vsel %vm2018_vm0, 1.0, %v7550_v21  ;;  %v5075_v10 = vpack.c.bf16 %v2268_v6, %v2260_v5 }
 0x2c0   : > { %5054 = vmatpush1.bf16.msra.mxu1 %v5053_v37 }
 0x2c1   : > { %4277 = vmatmul.mubr.msk.f32.gmra.mrb[50].mxu0 %vm1250_vm5, %v5884_v36  ;;  %4293 = vmatmul.mubr.msk.f32.gmra.mrb[66].mxu1 %vm1250_vm5, %v5884_v36  ;;  %v1993_v13 = vpop.permute.xlu0 %1992  ;;  %v1996_v16 = vpop.permute.xlu1 %1995 }
 0x2c2   : > { %1721 = vmatprep.mubr.f32.mxu0 %v7550_v21  ;;  %1882 = vmatprep.mubr.f32.mxu1 %v7550_v21  ;;  %vm2019_vm1 = vcmp.eq.s32.totalorder %v6062_v1, %v1993_v13  ;;  %vm2020_vm2 = vcmp.eq.s32.totalorder %v6062_v1, %v1996_v16 }
 0x2c3   : > { %v4314_v23 = vsel %vm2019_vm1, 1.0, %v7550_v21  ;;  %v4315_v25 = vsel %vm2020_vm2, 1.0, %v7550_v21 }
 0x2c5   : > { %4278 = vmatmul.mubr.msk.f32.gmra.mrb[52].mxu0 %vm1250_vm5, %v5894_v41  ;;  %4294 = vmatmul.mubr.msk.f32.gmra.mrb[68].mxu1 %vm1250_vm5, %v5894_v41  ;;  %v1999_v19 = vpop.permute.xlu0 %1998  ;;  %v2002_v22 = vpop.permute.xlu1 %2001  ;;  %v5055_v41 = vpack.c.bf16 %v2278_v39, %v2270_v38 }
 0x2c6   : > { %1727 = vmatprep.mubr.f32.mxu0 %v7550_v21  ;;  %1888 = vmatprep.mubr.f32.mxu1 %v7550_v21  ;;  %vm2021_vm3 = vcmp.eq.s32.totalorder %v6062_v1, %v1999_v19  ;;  %vm2022_vm6 = vcmp.eq.s32.totalorder %v6062_v1, %v2002_v22 }
 0x2c7   : > { %v4316_v26 = vsel %vm2021_vm3, 1.0, %v7550_v21  ;;  %v4317_v28 = vsel %vm2022_vm6, 1.0, %v7550_v21  ;;  %5056 = vmatprep.subr.bf16.mxu1 %v5055_v41 }
 0x2c8   : > { %5058 = vmatpush1.bf16.msra.mxu1 %v5057_v44 }
 0x2c9   : > { %4279 = vmatmul.mubr.msk.f32.gmra.mrb[54].mxu0 %vm1250_vm5, %v5902_v45  ;;  %4295 = vmatmul.mubr.msk.f32.gmra.mrb[70].mxu1 %vm1250_vm5, %v5902_v45  ;;  %v2005_v24 = vpop.permute.xlu0 %2004  ;;  %v2008_v27 = vpop.permute.xlu1 %2007  ;;  %v2256_v45 = vld [vmem:[%s7534_s12 + $0x18] sm:$0xff] }
 0x2ca   : > { %1733 = vmatprep.mubr.f32.mxu0 %v7550_v21  ;;  %1894 = vmatprep.mubr.f32.mxu1 %v7550_v21  ;;  %vm2023_vm8 = vcmp.eq.s32.totalorder %v6062_v1, %v2005_v24  ;;  %vm2024_vm9 = vcmp.eq.s32.totalorder %v6062_v1, %v2008_v27  ;;  %v5059_v47 = vpack.c.bf16 %v2264_v46, %v2256_v45  ;;  %v2266_v1 = vld [vmem:[%s7534_s12 + $0x68] sm:$0xff] }
 0x2cb   : > { %v4318_v30 = vsel %vm2023_vm8, 1.0, %v7550_v21  ;;  %v4319_v36 = vsel %vm2024_vm9, 1.0, %v7550_v21  ;;  %v5067_v2 = vpack.c.bf16 %v2266_v1, %v2258_v0 }
 0x2cc   : > { %5060 = vmatprep.subr.bf16.mxu0 %v5059_v47 }
 0x2cd   : > { %4280 = vmatmul.mubr.msk.f32.gmra.mrb[56].mxu0 %vm1250_vm5, %v5912_v48  ;;  %4296 = vmatmul.mubr.msk.f32.gmra.mrb[72].mxu1 %vm1250_vm5, %v5912_v48  ;;  %v2255_v48 = vld [vmem:[%s7534_s12 + $0x10] sm:$0xff] }
 0x2ce   : > { %1739 = vmatprep.mubr.f32.mxu0 %v7550_v21  ;;  %1900 = vmatprep.mubr.f32.mxu1 %v7550_v21 }
 0x2cf   : > { %5068 = vmatprep.subr.bf16.mxu1 %v5067_v2 }
 0x2d1   : > { %4281 = vmatmul.mubr.msk.f32.gmra.mrb[58].mxu0 %vm1250_vm5, %v5920_v49  ;;  %4297 = vmatmul.mubr.msk.f32.gmra.mrb[74].mxu1 %vm1250_vm5, %v5920_v49  ;;  %v2263_v49 = vld [vmem:[%s7534_s12 + $0x50] sm:$0xff] }
 0x2d2   : > { %1745 = vmatprep.mubr.f32.mxu0 %v7550_v21  ;;  %1906 = vmatprep.mubr.f32.mxu1 %v7550_v21  ;;  %v5061_v50 = vpack.c.bf16 %v2263_v49, %v2255_v48 }
 0x2d5   : > { %4282 = vmatmul.mubr.msk.f32.gmra.mrb[60].mxu0 %vm1250_vm5, %v5930_v52  ;;  %4298 = vmatmul.mubr.msk.f32.gmra.mrb[76].mxu1 %vm1250_vm5, %v5930_v52  ;;  %v2280_v52 = vld [vmem:[%s7534_s12 + $0xd8] sm:$0xff] }
 0x2d6   : > { %1751 = vmatprep.mubr.f32.mxu0 %v7550_v21  ;;  %1912 = vmatprep.mubr.f32.mxu1 %v7550_v21 }
 0x2d9   : > { %4283 = vmatmul.mubr.msk.f32.gmra.mrb[62].mxu0 %vm1250_vm5, %v5938_v53  ;;  %4299 = vmatmul.mubr.msk.f32.gmra.mrb[78].mxu1 %vm1250_vm5, %v5938_v53  ;;  %v5063_v53 = vpack.c.bf16 %v2280_v52, %v2272_v51 }
 0x2da   : > { %1757 = vmatprep.mubr.f32.mxu0 %v7550_v21  ;;  %1918 = vmatprep.mubr.f32.mxu1 %v7550_v21 }
 0x2dd   : > { %4284 = vmatmul.mubr.msk.f32.gmra.mrb[64].mxu0 %vm1250_vm5, %v5948_v56  ;;  %4300 = vmatmul.mubr.msk.f32.gmra.mrb[80].mxu1 %vm1250_vm5, %v5948_v56  ;;  %v5065_v56 = vpack.c.bf16 %v2279_v55, %v2271_v54 }
 0x2de   : > { %1763 = vmatprep.mubr.f32.mxu0 %v7550_v21  ;;  %1924 = vmatprep.mubr.f32.mxu1 %v7550_v21 }
 0x2e1   : > { %4285 = vmatmul.mubr.msk.f32.gmra.mrb[66].mxu0 %vm1250_vm5, %v5956_v58  ;;  %4301 = vmatmul.mubr.msk.f32.gmra.mrb[82].mxu1 %vm1250_vm5, %v5956_v58 }
 0x2e2   : > { %1769 = vmatprep.mubr.f32.mxu0 %v7550_v21  ;;  %1930 = vmatprep.mubr.f32.mxu1 %v7550_v21 }
 0x2e5   : > { %4286 = vmatmul.mubr.msk.f32.gmra.mrb[68].mxu0 %vm1250_vm5, %v5966_v61  ;;  %4302 = vmatmul.mubr.msk.f32.gmra.mrb[84].mxu1 %vm1250_vm5, %v5966_v61 }
 0x2e6   : > { %1775 = vmatprep.mubr.f32.mxu0 %v7550_v21  ;;  %1936 = vmatprep.mubr.f32.mxu1 %v7550_v21 }
 0x2e9   : > { %4287 = vmatmul.mubr.msk.f32.gmra.mrb[70].mxu0 %vm1250_vm5, %v5974_v62  ;;  %4303 = vmatmul.mubr.msk.f32.gmra.mrb[86].mxu1 %vm1250_vm5, %v5974_v62 }
 0x2ea   : > { %4886 = vmatprep.mubr.msk.f32.mxu0 %vm2059_vm7, %v4304_v4  ;;  %2397 = vmatprep.mubr.f32.mxu1 %v7550_v21 }
 0x2ed   : > { %4887 = vmatmul.mubr.msk.f32.vlgmr.msra.gmra.mrb[72].mxu0 %vm2059_vm7, %v4305_v9 }
 0x2ee   : > { %4889 = vmatprep.mubr.msk.f32.mxu0 %vm2059_vm7, %v4306_v7  ;;  %5062 = vmatpush1.bf16.msra.mxu0 %v5061_v50 }
 0x2ef   : > { %5064 = vmatprep.subr.bf16.mxu0 %v5063_v53 }
 0x2f1   : > { %4890 = vmatmul.mubr.msk.f32.gmra.mrb[74].mxu0 %vm2059_vm7, %v4307_v8 }
 0x2f2   : > { %4892 = vmatprep.mubr.msk.f32.mxu0 %vm2059_vm7, %v4308_v12  ;;  %5066 = vmatpush1.bf16.msra.mxu0 %v5065_v56 }
 0x2f3   : > { %5076 = vmatprep.subr.bf16.mxu0 %v5075_v10 }
 0x2f5   : > { %4893 = vmatmul.mubr.msk.f32.gmra.mrb[76].mxu0 %vm2059_vm7, %v4309_v14 }
 0x2f6   : > { %4895 = vmatprep.mubr.msk.f32.mxu0 %vm2059_vm7, %v4310_v15 }
 0x2f9   : > { %4896 = vmatmul.mubr.msk.f32.gmra.mrb[78].mxu0 %vm2059_vm7, %v4311_v17 }
 0x2fa   : > { %4898 = vmatprep.mubr.msk.f32.mxu0 %vm2059_vm7, %v4312_v18 }
 0x2fd   : > { %4899 = vmatmul.mubr.msk.f32.gmra.mrb[80].mxu0 %vm2059_vm7, %v4313_v20 }
 0x2fe   : > { %4901 = vmatprep.mubr.msk.f32.mxu0 %vm2059_vm7, %v4314_v23 }
 0x301   : > { %4902 = vmatmul.mubr.msk.f32.gmra.mrb[82].mxu0 %vm2059_vm7, %v4315_v25 }
 0x302   : > { %4904 = vmatprep.mubr.msk.f32.mxu0 %vm2059_vm7, %v4316_v26 }
 0x305   : > { %4905 = vmatmul.mubr.msk.f32.gmra.mrb[84].mxu0 %vm2059_vm7, %v4317_v28 }
 0x306   : > { %4907 = vmatprep.mubr.msk.f32.mxu0 %vm2059_vm7, %v4318_v30 }
 0x309   : > { %4908 = vmatmul.mubr.msk.f32.gmra.mrb[86].mxu0 %vm2059_vm7, %v4319_v36 }
 0x30a   : > { %2558 = vmatprep.mubr.f32.mxu0 %v7550_v21 }
 0x340   : > { %v6178_v58 = vpop.f32.mrb[8].mxu0  ;;  %v6180_v59 = vpop.f32.mrb[24].mxu1 }
 0x341   : > { %v6182_v60 = vpop.f32.mrb[9].mxu0  ;;  %v6184_v61 = vpop.f32.mrb[25].mxu1 }
 0x344   : > { %v6186_v62 = vpop.f32.mrb[10].mxu0  ;;  %v6188_v29 = vpop.f32.mrb[26].mxu1 }
 0x345   : > { %v6190_v42 = vpop.f32.mrb[11].mxu0  ;;  %v6192_v57 = vpop.f32.mrb[27].mxu1 }
 0x348   : > { %v6200_v3 = vpop.f32.mrb[12].mxu0  ;;  %v6202_v4 = vpop.f32.mrb[28].mxu1 }
 0x349   : > { %v6210_v7 = vpop.f32.mrb[13].mxu0  ;;  %v6212_v9 = vpop.f32.mrb[29].mxu1 }
 0x34c   : > { %v6214_v8 = vpop.f32.mrb[14].mxu0  ;;  %v6216_v11 = vpop.f32.mrb[30].mxu1 }
 0x34d   : > { %v6218_v12 = vpop.f32.mrb[15].mxu0  ;;  %v6220_v13 = vpop.f32.mrb[31].mxu1 }
 0x350   : > { %v6222_v14 = vpop.f32.mrb[16].mxu0  ;;  %v6224_v15 = vpop.f32.mrb[32].mxu1 }
 0x351   : > { %v6226_v16 = vpop.f32.mrb[17].mxu0  ;;  %v6228_v17 = vpop.f32.mrb[33].mxu1 }
 0x354   : > { %v6230_v18 = vpop.f32.mrb[18].mxu0  ;;  %v6232_v19 = vpop.f32.mrb[34].mxu1 }
 0x355   : > { %v6234_v20 = vpop.f32.mrb[19].mxu0  ;;  %v6236_v22 = vpop.f32.mrb[35].mxu1 }
 0x358   : > { %v6238_v23 = vpop.f32.mrb[20].mxu0  ;;  %v6240_v24 = vpop.f32.mrb[36].mxu1 }
 0x359   : > { %v6242_v25 = vpop.f32.mrb[21].mxu0  ;;  %v6244_v26 = vpop.f32.mrb[37].mxu1 }
 0x35c   : > { %v6246_v27 = vpop.f32.mrb[22].mxu0  ;;  %v6248_v28 = vpop.f32.mrb[38].mxu1 }
 0x35d   : > { %7569 = vst [vmem:[#allocation10_spill] sm:$0xff] %v6248_v28  ;;  %v6250_v30 = vpop.f32.mrb[23].mxu0  ;;  %v6252_v31 = vpop.f32.mrb[39].mxu1  ;;  %v3141_v28 = vld [vmem:[%s7535_s13 + $0x120] sm:$0xff] }
 0x35e   : > { %7570 = vst [vmem:[#allocation11_spill] sm:$0xff] %v6250_v30  ;;  %7571 = vst [vmem:[#allocation12_spill] sm:$0xff] %v6252_v31  ;;  %v3140_v31 = vld [vmem:[%s7535_s13 + $0x118] sm:$0xff] }
 0x360   : > { %v6254_v32 = vpop.f32.mrb[24].mxu0  ;;  %v6256_v33 = vpop.f32.mrb[40].mxu1 }
 0x361   : > { %7572 = vst [vmem:[#allocation13_spill] sm:$0xff] %v6254_v32  ;;  %7573 = vst [vmem:[#allocation14_spill] sm:$0xff] %v6256_v33  ;;  %v6258_v34 = vpop.f32.mrb[25].mxu0  ;;  %v6260_v35 = vpop.f32.mrb[41].mxu1  ;;  %v3139_v32 = vld [vmem:[%s7535_s13 + $0x110] sm:$0xff] }
 0x362   : > { %7574 = vst [vmem:[#allocation15_spill] sm:$0xff] %v6258_v34  ;;  %7575 = vst [vmem:[#allocation16_spill] sm:$0xff] %v6260_v35  ;;  %v3108_v35 = vld [vmem:[%s7535_s13 + $0x18] sm:$0xff] }
 0x364   : > { %v6262_v36 = vpop.f32.mrb[26].mxu0  ;;  %v6264_v37 = vpop.f32.mrb[42].mxu1 }
 0x365   : > { %7576 = vst [vmem:[#allocation17_spill] sm:$0xff] %v6262_v36  ;;  %7577 = vst [vmem:[#allocation18_spill] sm:$0xff] %v6264_v37  ;;  %v6266_v38 = vpop.f32.mrb[27].mxu0  ;;  %v6268_v39 = vpop.f32.mrb[43].mxu1  ;;  %v3107_v36 = vld [vmem:[%s7535_s13 + $0x10] sm:$0xff] }
 0x366   : > { %7578 = vst [vmem:[#allocation19_spill] sm:$0xff] %v6266_v38  ;;  %7579 = vst [vmem:[#allocation20_spill] sm:$0xff] %v6268_v39  ;;  %v3156_v39 = vld [vmem:[%s7535_s13 + $0x198] sm:$0xff] }
 0x368   : > { %v6270_v40 = vpop.f32.mrb[28].mxu0  ;;  %v6272_v41 = vpop.f32.mrb[44].mxu1 }
 0x369   : > { %7580 = vst [vmem:[#allocation21_spill] sm:$0xff] %v6270_v40  ;;  %7581 = vst [vmem:[#allocation22_spill] sm:$0xff] %v6272_v41  ;;  %v6274_v43 = vpop.f32.mrb[29].mxu0  ;;  %v6276_v44 = vpop.f32.mrb[45].mxu1  ;;  %v3124_v41 = vld [vmem:[%s7535_s13 + $0x98] sm:$0xff]  ;;  %v3155_v40 = vld [vmem:[%s7535_s13 + $0x190] sm:$0xff] }
 0x36a   : > { %7582 = vst [vmem:[#allocation23_spill] sm:$0xff] %v6274_v43  ;;  %7583 = vst [vmem:[#allocation24_spill] sm:$0xff] %v6276_v44  ;;  %v3123_v43 = vld [vmem:[%s7535_s13 + $0x90] sm:$0xff]  ;;  %v5119_v33 = vpack.c.bf16 %v3156_v39, %v3155_v40  ;;  %v3126_v39 = vld [vmem:[%s7535_s13 + $0xa8] sm:$0xff] }
 0x36b   : > { %v5087_v34 = vpack.c.bf16 %v3124_v41, %v3123_v43  ;;  %v3157_v40 = vld [vmem:[%s7535_s13 + $0x1a0] sm:$0xff]  ;;  %v3158_v41 = vld [vmem:[%s7535_s13 + $0x1a8] sm:$0xff]  ;;  %v5089_v43 = vpack.c.bf16 %v3108_v35, %v3107_v36  ;;  %v3160_v35 = vld [vmem:[%s7535_s13 + $0x1b8] sm:$0xff] }
 0x36c   : > { %v6278_v45 = vpop.f32.mrb[30].mxu0  ;;  %v6280_v46 = vpop.f32.mrb[46].mxu1  ;;  %v5123_v30 = vpack.c.bf16 %v3158_v41, %v3157_v40  ;;  %v3143_v40 = vld [vmem:[%s7535_s13 + $0x130] sm:$0xff]  ;;  %v3129_v41 = vld [vmem:[%s7535_s13 + $0xc0] sm:$0xff] }
 0x36d   : > { %7584 = vst [vmem:[#allocation25_spill] sm:$0xff] %v6278_v45  ;;  %7585 = vst [vmem:[#allocation26_spill] sm:$0xff] %v6280_v46  ;;  %v6282_v47 = vpop.f32.mrb[31].mxu0  ;;  %v6284_v48 = vpop.f32.mrb[47].mxu1 }
 0x36e   : > { %7586 = vst [vmem:[#allocation27_spill] sm:$0xff] %v6282_v47  ;;  %7587 = vst [vmem:[#allocation28_spill] sm:$0xff] %v6284_v48  ;;  %v2275_v48 = vld [vmem:[%s7534_s12 + $0xb0] sm:$0xff] }
 0x370   : > { %v6286_v49 = vpop.f32.mrb[32].mxu0  ;;  %v6288_v50 = vpop.f32.mrb[48].mxu1 }
 0x371   : > { %7588 = vst [vmem:[#allocation29_spill] sm:$0xff] %v6286_v49  ;;  %7589 = vst [vmem:[#allocation30_spill] sm:$0xff] %v6288_v50  ;;  %v6290_v51 = vpop.f32.mrb[33].mxu0  ;;  %v6292_v52 = vpop.f32.mrb[49].mxu1 }
 0x372   : > { %7590 = vst [vmem:[#allocation31_spill] sm:$0xff] %v6290_v51  ;;  %7591 = vst [vmem:[#allocation32_spill] sm:$0xff] %v6292_v52  ;;  %v2281_v52 = vld [vmem:[%s7534_s12 + $0xe0] sm:$0xff] }
 0x374   : > { %v6294_v53 = vpop.f32.mrb[34].mxu0  ;;  %v6296_v54 = vpop.f32.mrb[50].mxu1 }
 0x375   : > { %7592 = vst [vmem:[#allocation33_spill] sm:$0xff] %v6294_v53  ;;  %7593 = vst [vmem:[#allocation34_spill] sm:$0xff] %v6296_v54  ;;  %v6298_v55 = vpop.f32.mrb[35].mxu0  ;;  %v6300_v56 = vpop.f32.mrb[51].mxu1  ;;  %v2273_v53 = vld [vmem:[%s7534_s12 + $0xa0] sm:$0xff] }
 0x376   : > { %7594 = vst [vmem:[#allocation35_spill] sm:$0xff] %v6298_v55  ;;  %7595 = vst [vmem:[#allocation36_spill] sm:$0xff] %v6300_v56 }
 0x378   : > { %v6302_v0 = vpop.f32.mrb[36].mxu0  ;;  %v6304_v1 = vpop.f32.mrb[52].mxu1 }
 0x379   : > { %7596 = vst [vmem:[#allocation37_spill] sm:$0xff] %v6302_v0  ;;  %7597 = vst [vmem:[#allocation38_spill] sm:$0xff] %v6304_v1  ;;  %v6306_v2 = vpop.f32.mrb[37].mxu0  ;;  %v6308_v5 = vpop.f32.mrb[53].mxu1 }
 0x37a   : > { %7598 = vst [vmem:[#allocation39_spill] sm:$0xff] %v6306_v2  ;;  %7599 = vst [vmem:[#allocation40_spill] sm:$0xff] %v6308_v5 }
 0x37c   : > { %v6310_v6 = vpop.f32.mrb[38].mxu0  ;;  %v6312_v10 = vpop.f32.mrb[54].mxu1 }
 0x37d   : > { %7600 = vst [vmem:[#allocation41_spill] sm:$0xff] %v6310_v6  ;;  %7601 = vst [vmem:[#allocation42_spill] sm:$0xff] %v6312_v10  ;;  %v6314_v63 = vpop.f32.mrb[39].mxu0  ;;  %v6316_v21 = vpop.f32.mrb[55].mxu1 }
 0x37e   : > { %7602 = vst [vmem:[#allocation43_spill] sm:$0xff] %v6314_v63  ;;  %7603 = vst [vmem:[#allocation44_spill] sm:$0xff] %v6316_v21 }
 0x380   : > { %v6318_v54 = vpop.f32.mrb[40].mxu0  ;;  %v6320_v55 = vpop.f32.mrb[56].mxu1 }
 0x381   : > { %7604 = vst [vmem:[#allocation45_spill] sm:$0xff] %v6318_v54  ;;  %7605 = vst [vmem:[#allocation46_spill] sm:$0xff] %v6320_v55  ;;  %v6322_v56 = vpop.f32.mrb[41].mxu0  ;;  %v6324_v0 = vpop.f32.mrb[57].mxu1 }
 0x382   : > { %7606 = vst [vmem:[#allocation47_spill] sm:$0xff] %v6322_v56  ;;  %7607 = vst [vmem:[#allocation48_spill] sm:$0xff] %v6324_v0 }
 0x384   : > { %v6326_v1 = vpop.f32.mrb[42].mxu0  ;;  %v6328_v2 = vpop.f32.mrb[58].mxu1 }
 0x385   : > { %7608 = vst [vmem:[#allocation49_spill] sm:$0xff] %v6326_v1  ;;  %7609 = vst [vmem:[#allocation50_spill] sm:$0xff] %v6328_v2  ;;  %v6330_v5 = vpop.f32.mrb[43].mxu0  ;;  %v6332_v6 = vpop.f32.mrb[59].mxu1 }
 0x386   : > { %7610 = vst [vmem:[#allocation51_spill] sm:$0xff] %v6330_v5  ;;  %7611 = vst [vmem:[#allocation52_spill] sm:$0xff] %v6332_v6 }
 0x388   : > { %v6334_v10 = vpop.f32.mrb[44].mxu0  ;;  %v6336_v63 = vpop.f32.mrb[60].mxu1 }
 0x389   : > { %7612 = vst [vmem:[#allocation53_spill] sm:$0xff] %v6334_v10  ;;  %7613 = vst [vmem:[#allocation54_spill] sm:$0xff] %v6336_v63  ;;  %v6338_v21 = vpop.f32.mrb[45].mxu0  ;;  %v6340_v54 = vpop.f32.mrb[61].mxu1 }
 0x38a   : > { %7614 = vst [vmem:[#allocation55_spill] sm:$0xff] %v6338_v21  ;;  %7615 = vst [vmem:[#allocation56_spill] sm:$0xff] %v6340_v54 }
 0x38c   : > { %v6342_v55 = vpop.f32.mrb[46].mxu0  ;;  %v6344_v56 = vpop.f32.mrb[62].mxu1 }
 0x38d   : > { %7616 = vst [vmem:[#allocation57_spill] sm:$0xff] %v6342_v55  ;;  %7617 = vst [vmem:[#allocation58_spill] sm:$0xff] %v6344_v56  ;;  %v6346_v0 = vpop.f32.mrb[47].mxu0  ;;  %v6348_v1 = vpop.f32.mrb[63].mxu1 }
 0x38e   : > { %7618 = vst [vmem:[#allocation59_spill] sm:$0xff] %v6346_v0  ;;  %7619 = vst [vmem:[#allocation60_spill] sm:$0xff] %v6348_v1 }
 0x390   : > { %v6350_v2 = vpop.f32.mrb[48].mxu0  ;;  %v6352_v5 = vpop.f32.mrb[64].mxu1 }
 0x391   : > { %7620 = vst [vmem:[#allocation61_spill] sm:$0xff] %v6350_v2  ;;  %7621 = vst [vmem:[#allocation62_spill] sm:$0xff] %v6352_v5  ;;  %v6354_v6 = vpop.f32.mrb[49].mxu0  ;;  %v6356_v10 = vpop.f32.mrb[65].mxu1 }
 0x392   : > { %7622 = vst [vmem:[#allocation63_spill] sm:$0xff] %v6354_v6  ;;  %7623 = vst [vmem:[#allocation64_spill] sm:$0xff] %v6356_v10 }
 0x394   : > { %v6358_v63 = vpop.f32.mrb[50].mxu0  ;;  %v6360_v21 = vpop.f32.mrb[66].mxu1 }
 0x395   : > { %7624 = vst [vmem:[#allocation65_spill] sm:$0xff] %v6358_v63  ;;  %7625 = vst [vmem:[#allocation66_spill] sm:$0xff] %v6360_v21  ;;  %v6362_v54 = vpop.f32.mrb[51].mxu0  ;;  %v6364_v55 = vpop.f32.mrb[67].mxu1 }
 0x396   : > { %7626 = vst [vmem:[#allocation67_spill] sm:$0xff] %v6362_v54  ;;  %7627 = vst [vmem:[#allocation68_spill] sm:$0xff] %v6364_v55 }
 0x398   : > { %v6366_v56 = vpop.f32.mrb[52].mxu0  ;;  %v6368_v0 = vpop.f32.mrb[68].mxu1 }
 0x399   : > { %7628 = vst [vmem:[#allocation69_spill] sm:$0xff] %v6366_v56  ;;  %7629 = vst [vmem:[#allocation70_spill] sm:$0xff] %v6368_v0  ;;  %v6370_v1 = vpop.f32.mrb[53].mxu0  ;;  %v6372_v2 = vpop.f32.mrb[69].mxu1 }
 0x39a   : > { %7630 = vst [vmem:[#allocation71_spill] sm:$0xff] %v6370_v1  ;;  %7631 = vst [vmem:[#allocation72_spill] sm:$0xff] %v6372_v2 }
 0x39c   : > { %v6374_v5 = vpop.f32.mrb[54].mxu0  ;;  %v6376_v6 = vpop.f32.mrb[70].mxu1 }
 0x39d   : > { %7632 = vst [vmem:[#allocation73_spill] sm:$0xff] %v6374_v5  ;;  %7633 = vst [vmem:[#allocation74_spill] sm:$0xff] %v6376_v6  ;;  %v6378_v10 = vpop.f32.mrb[55].mxu0  ;;  %v6380_v63 = vpop.f32.mrb[71].mxu1 }
 0x39e   : > { %7634 = vst [vmem:[#allocation75_spill] sm:$0xff] %v6378_v10  ;;  %7635 = vst [vmem:[#allocation76_spill] sm:$0xff] %v6380_v63 }
 0x3a0   : > { %v6382_v21 = vpop.f32.mrb[56].mxu0  ;;  %v6384_v54 = vpop.f32.mrb[72].mxu1 }
 0x3a1   : > { %7636 = vst [vmem:[#allocation77_spill] sm:$0xff] %v6382_v21  ;;  %7637 = vst [vmem:[#allocation78_spill] sm:$0xff] %v6384_v54  ;;  %v6386_v55 = vpop.f32.mrb[57].mxu0  ;;  %v6388_v56 = vpop.f32.mrb[73].mxu1 }
 0x3a2   : > { %7638 = vst [vmem:[#allocation79_spill] sm:$0xff] %v6386_v55  ;;  %7639 = vst [vmem:[#allocation80_spill] sm:$0xff] %v6388_v56 }
 0x3a4   : > { %v6390_v0 = vpop.f32.mrb[58].mxu0  ;;  %v6392_v1 = vpop.f32.mrb[74].mxu1 }
 0x3a5   : > { %7640 = vst [vmem:[#allocation81_spill] sm:$0xff] %v6390_v0  ;;  %7641 = vst [vmem:[#allocation82_spill] sm:$0xff] %v6392_v1  ;;  %v6394_v2 = vpop.f32.mrb[59].mxu0  ;;  %v6396_v5 = vpop.f32.mrb[75].mxu1 }
 0x3a6   : > { %7642 = vst [vmem:[#allocation83_spill] sm:$0xff] %v6394_v2  ;;  %7643 = vst [vmem:[#allocation84_spill] sm:$0xff] %v6396_v5 }
 0x3a8   : > { %v6398_v6 = vpop.f32.mrb[60].mxu0  ;;  %v6400_v10 = vpop.f32.mrb[76].mxu1 }
 0x3a9   : > { %7644 = vst [vmem:[#allocation85_spill] sm:$0xff] %v6398_v6  ;;  %7645 = vst [vmem:[#allocation86_spill] sm:$0xff] %v6400_v10  ;;  %v6402_v63 = vpop.f32.mrb[61].mxu0  ;;  %v6404_v21 = vpop.f32.mrb[77].mxu1 }
 0x3aa   : > { %7646 = vst [vmem:[#allocation87_spill] sm:$0xff] %v6402_v63  ;;  %7647 = vst [vmem:[#allocation88_spill] sm:$0xff] %v6404_v21 }
 0x3ac   : > { %v6406_v54 = vpop.f32.mrb[62].mxu0  ;;  %v6408_v55 = vpop.f32.mrb[78].mxu1 }
 0x3ad   : > { %7648 = vst [vmem:[#allocation89_spill] sm:$0xff] %v6406_v54  ;;  %7649 = vst [vmem:[#allocation90_spill] sm:$0xff] %v6408_v55  ;;  %v6410_v56 = vpop.f32.mrb[63].mxu0  ;;  %v6412_v0 = vpop.f32.mrb[79].mxu1 }
 0x3ae   : > { %7650 = vst [vmem:[#allocation91_spill] sm:$0xff] %v6410_v56  ;;  %7651 = vst [vmem:[#allocation92_spill] sm:$0xff] %v6412_v0 }
 0x3b0   : > { %v6414_v1 = vpop.f32.mrb[64].mxu0  ;;  %v6416_v2 = vpop.f32.mrb[80].mxu1 }
 0x3b1   : > { %7652 = vst [vmem:[#allocation93_spill] sm:$0xff] %v6414_v1  ;;  %7653 = vst [vmem:[#allocation94_spill] sm:$0xff] %v6416_v2  ;;  %v6418_v5 = vpop.f32.mrb[65].mxu0  ;;  %v6420_v6 = vpop.f32.mrb[81].mxu1 }
 0x3b2   : > { %7654 = vst [vmem:[#allocation95_spill] sm:$0xff] %v6418_v5  ;;  %7655 = vst [vmem:[#allocation96_spill] sm:$0xff] %v6420_v6 }
 0x3b4   : > { %v6422_v10 = vpop.f32.mrb[66].mxu0  ;;  %v6424_v63 = vpop.f32.mrb[82].mxu1 }
 0x3b5   : > { %7656 = vst [vmem:[#allocation97_spill] sm:$0xff] %v6422_v10  ;;  %7657 = vst [vmem:[#allocation98_spill] sm:$0xff] %v6424_v63  ;;  %v6426_v21 = vpop.f32.mrb[67].mxu0  ;;  %v6428_v54 = vpop.f32.mrb[83].mxu1  ;;  %v2257_v63 = vld [vmem:[%s7534_s12 + $0x20] sm:$0xff] }
 0x3b6   : > { %7658 = vst [vmem:[#allocation99_spill] sm:$0xff] %v6426_v21  ;;  %7659 = vst [vmem:[#allocation100_spill] sm:$0xff] %v6428_v54  ;;  %v2265_v54 = vld [vmem:[%s7534_s12 + $0x60] sm:$0xff] }
 0x3b7   : > { %v5069_v10 = vpack.c.bf16 %v2265_v54, %v2257_v63  ;;  %v2283_v63 = vld [vmem:[%s7534_s12 + $0xf0] sm:$0xff]  ;;  %v3121_v54 = vld [vmem:[%s7535_s13 + $0x80] sm:$0xff] }
 0x3b8   : > { %v6430_v55 = vpop.f32.mrb[68].mxu0  ;;  %v6432_v56 = vpop.f32.mrb[84].mxu1  ;;  %v5081_v47 = vpack.c.bf16 %v2283_v63, %v2275_v48 }
 0x3b9   : > { %7660 = vst [vmem:[#allocation101_spill] sm:$0xff] %v6430_v55  ;;  %7661 = vst [vmem:[#allocation102_spill] sm:$0xff] %v6432_v56  ;;  %v6434_v0 = vpop.f32.mrb[69].mxu0  ;;  %v6436_v1 = vpop.f32.mrb[85].mxu1 }
 0x3ba   : > { %7662 = vst [vmem:[#allocation103_spill] sm:$0xff] %v6434_v0  ;;  %7663 = vst [vmem:[#allocation104_spill] sm:$0xff] %v6436_v1  ;;  %v2259_v1 = vld [vmem:[%s7534_s12 + $0x30] sm:$0xff]  ;;  %v2282_v0 = vld [vmem:[%s7534_s12 + $0xe8] sm:$0xff] }
 0x3bc   : > { %v6438_v2 = vpop.f32.mrb[70].mxu0  ;;  %v6440_v5 = vpop.f32.mrb[86].mxu1 }
 0x3bd   : > { %7664 = vst [vmem:[#allocation105_spill] sm:$0xff] %v6438_v2  ;;  %7665 = vst [vmem:[#allocation106_spill] sm:$0xff] %v6440_v5  ;;  %v6448_v21 = vpop.f32.mrb[71].mxu0  ;;  %v6450_v55 = vpop.f32.mrb[87].mxu1  ;;  %v2267_v5 = vld [vmem:[%s7534_s12 + $0x70] sm:$0xff]  ;;  %v2274_v2 = vld [vmem:[%s7534_s12 + $0xa8] sm:$0xff] }
 0x3be   : > { %7666 = vst [vmem:[#allocation107_spill] sm:$0xff] %v6448_v21  ;;  %7667 = vst [vmem:[#allocation108_spill] sm:$0xff] %v6450_v55  ;;  %v2276_v55 = vld [vmem:[%s7534_s12 + $0xb8] sm:$0xff]  ;;  %v5077_v6 = vpack.c.bf16 %v2267_v5, %v2259_v1  ;;  %v5071_v50 = vpack.c.bf16 %v2282_v0, %v2274_v2  ;;  %v3154_v0 = vld [vmem:[%s7535_s13 + $0x188] sm:$0xff]  ;;  %v7668_v1 = vmov 0.0   ;;  %v5073_v5 = vpack.c.bf16 %v2281_v52, %v2273_v53 }
 0x3bf   : > { %v2284_v21 = vld [vmem:[%s7534_s12 + $0xf8] sm:$0xff] }
 0x3c0   : > { %v6470_v56 = vpop.f32.mrb[72].mxu0  ;;  %v5079_v49 = vpack.c.bf16 %v2284_v21, %v2276_v55  ;;  %v3122_v21 = vld [vmem:[%s7535_s13 + $0x88] sm:$0xff]  ;;  %v3153_v55 = vld [vmem:[%s7535_s13 + $0x180] sm:$0xff] }
 0x3c1   : > { %v6478_v51 = vpop.f32.mrb[73].mxu0  ;;  %v5083_v45 = vpack.c.bf16 %v3122_v21, %v3121_v54  ;;  %v5115_v44 = vpack.c.bf16 %v3154_v0, %v3153_v55  ;;  %v3105_v21 = vld [vmem:[%s7535_s13] sm:$0xff]  ;;  %v3106_v55 = vld [vmem:[%s7535_s13 + $0x8] sm:$0xff] }
 0x3c2   : > { %4336 = vmatmul.mubr.msk.f32.vlgmr.msra.gmra.mrb[88].mxu1 %vm934_vm4, %v6478_v51  ;;  %4352 = vmatmul.mubr.msk.f32.vlgmr.msra.gmra.mrb[88].mxu0 %vm934_vm4, %v6478_v51  ;;  %v3137_v0 = vld [vmem:[%s7535_s13 + $0x100] sm:$0xff]  ;;  %v5085_v38 = vpack.c.bf16 %v3106_v55, %v3105_v21 }
 0x3c3   : > { %2403 = vmatprep.mubr.f32.mxu1 %v7668_v1  ;;  %2564 = vmatprep.mubr.f32.mxu0 %v7668_v1  ;;  %v3125_v21 = vld [vmem:[%s7535_s13 + $0xa0] sm:$0xff] }
 0x3c4   : > { %v6504_v2 = vpop.f32.mrb[74].mxu0  ;;  %5070 = vmatpush1.bf16.msra.mxu1 %v5069_v10  ;;  %5078 = vmatpush1.bf16.msra.mxu0 %v5077_v6  ;;  %v3109_v55 = vld [vmem:[%s7535_s13 + $0x20] sm:$0xff] }
 0x3c5   : > { %v6506_v46 = vpop.f32.mrb[75].mxu0  ;;  %5072 = vmatprep.subr.bf16.mxu1 %v5071_v50  ;;  %5080 = vmatprep.subr.bf16.mxu0 %v5079_v49 }
 0x3c6   : > { %4337 = vmatmul.mubr.msk.f32.gmra.mrb[90].mxu1 %vm934_vm4, %v6470_v56  ;;  %4353 = vmatmul.mubr.msk.f32.gmra.mrb[90].mxu0 %vm934_vm4, %v6470_v56 }
 0x3c7   : > { %2409 = vmatprep.mubr.f32.mxu1 %v7668_v1  ;;  %2570 = vmatprep.mubr.f32.mxu0 %v7668_v1 }
 0x3c8   : > { %v6514_v10 = vpop.f32.mrb[76].mxu0  ;;  %5074 = vmatpush1.bf16.msra.mxu1 %v5073_v5  ;;  %5082 = vmatpush1.bf16.msra.mxu0 %v5081_v47  ;;  %v3138_v5 = vld [vmem:[%s7535_s13 + $0x108] sm:$0xff] }
 0x3c9   : > { %v6516_v48 = vpop.f32.mrb[77].mxu0  ;;  %5084 = vmatprep.subr.bf16.mxu1 %v5083_v45  ;;  %5116 = vmatprep.subr.bf16.mxu0 %v5115_v44  ;;  %v5117_v37 = vpack.c.bf16 %v3138_v5, %v3137_v0  ;;  %v3110_v0 = vld [vmem:[%s7535_s13 + $0x28] sm:$0xff]  ;;  %v5091_v5 = vpack.c.bf16 %v3126_v39, %v3125_v21 }
 0x3ca   : > { %4338 = vmatmul.mubr.msk.f32.gmra.mrb[92].mxu1 %vm934_vm4, %v6506_v46  ;;  %4354 = vmatmul.mubr.msk.f32.gmra.mrb[92].mxu0 %vm934_vm4, %v6506_v46  ;;  %v5093_v36 = vpack.c.bf16 %v3110_v0, %v3109_v55  ;;  %v3113_v0 = vld [vmem:[%s7535_s13 + $0x40] sm:$0xff] }
 0x3cb   : > { %2415 = vmatprep.mubr.f32.mxu1 %v7668_v1  ;;  %2576 = vmatprep.mubr.f32.mxu0 %v7668_v1 }
 0x3cc   : > { %v6524_v49 = vpop.f32.mrb[78].mxu0 }
 0x3cd   : > { %v6526_v50 = vpop.f32.mrb[79].mxu0 }
 0x3ce   : > { %4339 = vmatmul.mubr.msk.f32.gmra.mrb[94].mxu1 %vm934_vm4, %v6504_v2  ;;  %4355 = vmatmul.mubr.msk.f32.gmra.mrb[94].mxu0 %vm934_vm4, %v6504_v2 }
 0x3cf   : > { %2421 = vmatprep.mubr.f32.mxu1 %v7668_v1  ;;  %2582 = vmatprep.mubr.f32.mxu0 %v7668_v1 }
 0x3d0   : > { %v6534_v44 = vpop.f32.mrb[80].mxu0 }
 0x3d1   : > { %v6536_v45 = vpop.f32.mrb[81].mxu0 }
 0x3d2   : > { %4340 = vmatmul.mubr.msk.f32.gmra.mrb[96].mxu1 %vm934_vm4, %v6516_v48  ;;  %4356 = vmatmul.mubr.msk.f32.gmra.mrb[96].mxu0 %vm934_vm4, %v6516_v48 }
 0x3d3   : > { %2427 = vmatprep.mubr.f32.mxu1 %v7668_v1  ;;  %2588 = vmatprep.mubr.f32.mxu0 %v7668_v1 }
 0x3d4   : > { %v6544_v47 = vpop.f32.mrb[82].mxu0 }
 0x3d5   : > { %v6546_v52 = vpop.f32.mrb[83].mxu0 }
 0x3d6   : > { %4341 = vmatmul.mubr.msk.f32.gmra.mrb[98].mxu1 %vm934_vm4, %v6514_v10  ;;  %4357 = vmatmul.mubr.msk.f32.gmra.mrb[98].mxu0 %vm934_vm4, %v6514_v10 }
 0x3d7   : > { %2433 = vmatprep.mubr.f32.mxu1 %v7668_v1  ;;  %2594 = vmatprep.mubr.f32.mxu0 %v7668_v1 }
 0x3d8   : > { %v6554_v53 = vpop.f32.mrb[84].mxu0 }
 0x3d9   : > { %v6556_v6 = vpop.f32.mrb[85].mxu0 }
 0x3da   : > { %4342 = vmatmul.mubr.msk.f32.gmra.mrb[100].mxu1 %vm934_vm4, %v6526_v50  ;;  %4358 = vmatmul.mubr.msk.f32.gmra.mrb[100].mxu0 %vm934_vm4, %v6526_v50 }
 0x3db   : > { %2439 = vmatprep.mubr.f32.mxu1 %v7668_v1  ;;  %2600 = vmatprep.mubr.f32.mxu0 %v7668_v1 }
 0x3dc   : > { %v6564_v63 = vpop.f32.mrb[86].mxu0 }
 0x3dd   : > { %v6566_v54 = vpop.f32.mrb[87].mxu0 }
 0x3de   : > { %4343 = vmatmul.mubr.msk.f32.gmra.mrb[102].mxu1 %vm934_vm4, %v6524_v49  ;;  %4359 = vmatmul.mubr.msk.f32.gmra.mrb[102].mxu0 %vm934_vm4, %v6524_v49 }
 0x3df   : > { %2445 = vmatprep.mubr.f32.mxu1 %v7668_v1  ;;  %2606 = vmatprep.mubr.f32.mxu0 %v7668_v1 }
 0x3e2   : > { %4344 = vmatmul.mubr.msk.f32.gmra.mrb[104].mxu1 %vm934_vm4, %v6536_v45  ;;  %4360 = vmatmul.mubr.msk.f32.gmra.mrb[104].mxu0 %vm934_vm4, %v6536_v45 }
 0x3e3   : > { %2451 = vmatprep.mubr.f32.mxu1 %v7668_v1  ;;  %2612 = vmatprep.mubr.f32.mxu0 %v7668_v1 }
 0x3e6   : > { %4345 = vmatmul.mubr.msk.f32.gmra.mrb[106].mxu1 %vm934_vm4, %v6534_v44  ;;  %4361 = vmatmul.mubr.msk.f32.gmra.mrb[106].mxu0 %vm934_vm4, %v6534_v44 }
 0x3e7   : > { %2457 = vmatprep.mubr.f32.mxu1 %v7668_v1  ;;  %2618 = vmatprep.mubr.f32.mxu0 %v7668_v1 }
 0x3ea   : > { %4346 = vmatmul.mubr.msk.f32.gmra.mrb[108].mxu1 %vm934_vm4, %v6546_v52  ;;  %4362 = vmatmul.mubr.msk.f32.gmra.mrb[108].mxu0 %vm934_vm4, %v6546_v52 }
 0x3eb   : > { %2463 = vmatprep.mubr.f32.mxu1 %v7668_v1  ;;  %2624 = vmatprep.mubr.f32.mxu0 %v7668_v1 }
 0x3ee   : > { %4347 = vmatmul.mubr.msk.f32.gmra.mrb[110].mxu1 %vm934_vm4, %v6544_v47  ;;  %4363 = vmatmul.mubr.msk.f32.gmra.mrb[110].mxu0 %vm934_vm4, %v6544_v47 }
 0x3ef   : > { %2469 = vmatprep.mubr.f32.mxu1 %v7668_v1  ;;  %2630 = vmatprep.mubr.f32.mxu0 %v7668_v1 }
 0x3f2   : > { %4348 = vmatmul.mubr.msk.f32.gmra.mrb[112].mxu1 %vm934_vm4, %v6556_v6  ;;  %4364 = vmatmul.mubr.msk.f32.gmra.mrb[112].mxu0 %vm934_vm4, %v6556_v6 }
 0x3f3   : > { %2475 = vmatprep.mubr.f32.mxu1 %v7668_v1  ;;  %2636 = vmatprep.mubr.f32.mxu0 %v7668_v1 }
 0x3f6   : > { %4349 = vmatmul.mubr.msk.f32.gmra.mrb[114].mxu1 %vm934_vm4, %v6554_v53  ;;  %4365 = vmatmul.mubr.msk.f32.gmra.mrb[114].mxu0 %vm934_vm4, %v6554_v53 }
 0x3f7   : > { %2481 = vmatprep.mubr.f32.mxu1 %v7668_v1  ;;  %2642 = vmatprep.mubr.f32.mxu0 %v7668_v1 }
 0x3fa   : > { %4350 = vmatmul.mubr.msk.f32.gmra.mrb[116].mxu1 %vm934_vm4, %v6566_v54  ;;  %4366 = vmatmul.mubr.msk.f32.gmra.mrb[116].mxu0 %vm934_vm4, %v6566_v54 }
 0x3fb   : > { %2487 = vmatprep.mubr.f32.mxu1 %v7668_v1  ;;  %2648 = vmatprep.mubr.f32.mxu0 %v7668_v1 }
 0x3fe   : > { %4351 = vmatmul.mubr.msk.f32.gmra.mrb[118].mxu1 %vm934_vm4, %v6564_v63  ;;  %4367 = vmatmul.mubr.msk.f32.gmra.mrb[118].mxu0 %vm934_vm4, %v6564_v63 }
 0x3ff   : > { %2719 = vmatprep.mubr.f32.mxu1 %v7668_v1  ;;  %2880 = vmatprep.mubr.f32.mxu0 %v7668_v1 }
 0x402   : > { %4368 = vmatmul.mubr.msk.f32.vlgmr.msra.gmra.mrb[120].mxu1 %vm934_vm4, %v6478_v51  ;;  %4384 = vmatmul.mubr.msk.f32.vlgmr.msra.gmra.mrb[120].mxu0 %vm934_vm4, %v6478_v51  ;;  %v5121_v51 = vpack.c.bf16 %v3140_v31, %v3139_v32  ;;  %v3142_v31 = vld [vmem:[%s7535_s13 + $0x128] sm:$0xff]  ;;  %v3127_v32 = vld [vmem:[%s7535_s13 + $0xb0] sm:$0xff] }
 0x403   : > { %2725 = vmatprep.mubr.f32.mxu1 %v7668_v1  ;;  %2886 = vmatprep.mubr.f32.mxu0 %v7668_v1 }
 0x404   : > { %5086 = vmatpush3.bf16.msra.mxu1 %v5085_v38  ;;  %5118 = vmatpush3.bf16.msra.mxu0 %v5117_v37  ;;  %v5125_v37 = vpack.c.bf16 %v3142_v31, %v3141_v28  ;;  %v3111_v38 = vld [vmem:[%s7535_s13 + $0x30] sm:$0xff]  ;;  %v3144_v28 = vld [vmem:[%s7535_s13 + $0x138] sm:$0xff] }
 0x405   : > { %5088 = vmatprep.subr.bf16.mxu1 %v5087_v34  ;;  %5120 = vmatprep.subr.bf16.mxu0 %v5119_v33  ;;  %v3128_v33 = vld [vmem:[%s7535_s13 + $0xb8] sm:$0xff]  ;;  %v3159_v34 = vld [vmem:[%s7535_s13 + $0x1b0] sm:$0xff] }
 0x406   : > { %4369 = vmatmul.mubr.msk.f32.gmra.mrb[122].mxu1 %vm934_vm4, %v6470_v56  ;;  %4385 = vmatmul.mubr.msk.f32.gmra.mrb[122].mxu0 %vm934_vm4, %v6470_v56  ;;  %v3112_v56 = vld [vmem:[%s7535_s13 + $0x38] sm:$0xff]  ;;  %v5095_v21 = vpack.c.bf16 %v3128_v33, %v3127_v32  ;;  %v5127_v39 = vpack.c.bf16 %v3160_v35, %v3159_v34  ;;  %v3145_v33 = vld [vmem:[%s7535_s13 + $0x140] sm:$0xff]  ;;  %v3146_v34 = vld [vmem:[%s7535_s13 + $0x148] sm:$0xff] }
 0x407   : > { %2731 = vmatprep.mubr.f32.mxu1 %v7668_v1  ;;  %2892 = vmatprep.mubr.f32.mxu0 %v7668_v1  ;;  %v5097_v55 = vpack.c.bf16 %v3112_v56, %v3111_v38  ;;  %v3131_v35 = vld [vmem:[%s7535_s13 + $0xd0] sm:$0xff]  ;;  %v3164_v38 = vld [vmem:[%s7535_s13 + $0x1d8] sm:$0xff] }
 0x408   : > { %5090 = vmatpush3.bf16.msra.mxu1 %v5089_v43  ;;  %5122 = vmatpush3.bf16.msra.mxu0 %v5121_v51  ;;  %v3161_v43 = vld [vmem:[%s7535_s13 + $0x1c0] sm:$0xff]  ;;  %v3162_v51 = vld [vmem:[%s7535_s13 + $0x1c8] sm:$0xff] }
 0x409   : > { %5092 = vmatprep.subr.bf16.mxu1 %v5091_v5  ;;  %5124 = vmatprep.subr.bf16.mxu0 %v5123_v30  ;;  %v3130_v30 = vld [vmem:[%s7535_s13 + $0xc8] sm:$0xff]  ;;  %v5131_v32 = vpack.c.bf16 %v3162_v51, %v3161_v43  ;;  %v3133_v43 = vld [vmem:[%s7535_s13 + $0xe0] sm:$0xff] }
 0x40a   : > { %4370 = vmatmul.mubr.msk.f32.gmra.mrb[124].mxu1 %vm934_vm4, %v6506_v46  ;;  %4386 = vmatmul.mubr.msk.f32.gmra.mrb[124].mxu0 %vm934_vm4, %v6506_v46  ;;  %v5129_v46 = vpack.c.bf16 %v3144_v28, %v3143_v40  ;;  %v3114_v5 = vld [vmem:[%s7535_s13 + $0x48] sm:$0xff]  ;;  %v5099_v31 = vpack.c.bf16 %v3130_v30, %v3129_v41  ;;  %v3147_v41 = vld [vmem:[%s7535_s13 + $0x150] sm:$0xff]  ;;  %v3148_v30 = vld [vmem:[%s7535_s13 + $0x158] sm:$0xff] }
 0x40b   : > { %2737 = vmatprep.mubr.f32.mxu1 %v7668_v1  ;;  %2898 = vmatprep.mubr.f32.mxu0 %v7668_v1  ;;  %v5101_v56 = vpack.c.bf16 %v3114_v5, %v3113_v0  ;;  %v3134_v51 = vld [vmem:[%s7535_s13 + $0xe8] sm:$0xff]  ;;  %v3117_v5 = vld [vmem:[%s7535_s13 + $0x60] sm:$0xff] }
 0x40c   : > { %5094 = vmatpush3.bf16.msra.mxu1 %v5093_v36  ;;  %5126 = vmatpush3.bf16.msra.mxu0 %v5125_v37  ;;  %v3132_v36 = vld [vmem:[%s7535_s13 + $0xd8] sm:$0xff]  ;;  %v3163_v37 = vld [vmem:[%s7535_s13 + $0x1d0] sm:$0xff] }
 0x40d   : > { %5096 = vmatprep.subr.bf16.mxu1 %v5095_v21  ;;  %5128 = vmatprep.subr.bf16.mxu0 %v5127_v39  ;;  %v3115_v21 = vld [vmem:[%s7535_s13 + $0x50] sm:$0xff]  ;;  %v3116_v39 = vld [vmem:[%s7535_s13 + $0x58] sm:$0xff]  ;;  %v5103_v40 = vpack.c.bf16 %v3132_v36, %v3131_v35  ;;  %v5135_v28 = vpack.c.bf16 %v3164_v38, %v3163_v37  ;;  %v3150_v35 = vld [vmem:[%s7535_s13 + $0x168] sm:$0xff] }
 0x40e   : > { %4371 = vmatmul.mubr.msk.f32.gmra.mrb[126].mxu1 %vm934_vm4, %v6504_v2  ;;  %4387 = vmatmul.mubr.msk.f32.gmra.mrb[126].mxu0 %vm934_vm4, %v6504_v2  ;;  %v5133_v2 = vpack.c.bf16 %v3146_v34, %v3145_v33  ;;  %v5105_v0 = vpack.c.bf16 %v3116_v39, %v3115_v21  ;;  %v3149_v34 = vld [vmem:[%s7535_s13 + $0x160] sm:$0xff]  ;;  %v3135_v36 = vld [vmem:[%s7535_s13 + $0xf0] sm:$0xff]  ;;  %v3136_v37 = vld [vmem:[%s7535_s13 + $0xf8] sm:$0xff] }
 0x40f   : > { %2743 = vmatprep.mubr.f32.mxu1 %v7668_v1  ;;  %2904 = vmatprep.mubr.f32.mxu0 %v7668_v1  ;;  %v3167_v38 = vld [vmem:[%s7535_s13 + $0x1f0] sm:$0xff]  ;;  %v5111_v39 = vpack.c.bf16 %v3136_v37, %v3135_v36  ;;  %v3201_v36 = vld [vmem:[%s7535_s13 + $0x300] sm:$0xff]  ;;  %v3202_v37 = vld [vmem:[%s7535_s13 + $0x308] sm:$0xff] }
 0x410   : > { %5098 = vmatpush3.bf16.msra.mxu1 %v5097_v55  ;;  %5130 = vmatpush3.bf16.msra.mxu0 %v5129_v46  ;;  %v3165_v55 = vld [vmem:[%s7535_s13 + $0x1e0] sm:$0xff]  ;;  %v3166_v46 = vld [vmem:[%s7535_s13 + $0x1e8] sm:$0xff]  ;;  %v3119_v21 = vld [vmem:[%s7535_s13 + $0x70] sm:$0xff] }
 0x411   : > { %5100 = vmatprep.subr.bf16.mxu1 %v5099_v31  ;;  %5132 = vmatprep.subr.bf16.mxu0 %v5131_v32  ;;  %v3118_v31 = vld [vmem:[%s7535_s13 + $0x68] sm:$0xff]  ;;  %v5107_v32 = vpack.c.bf16 %v3134_v51, %v3133_v43  ;;  %v5139_v33 = vpack.c.bf16 %v3166_v46, %v3165_v55 }
 0x412   : > { %4372 = vmatmul.mubr.msk.f32.gmra.mrb[128].mxu1 %vm934_vm4, %v6516_v48  ;;  %4388 = vmatmul.mubr.msk.f32.gmra.mrb[128].mxu0 %vm934_vm4, %v6516_v48  ;;  %v5137_v48 = vpack.c.bf16 %v3148_v30, %v3147_v41  ;;  %v3151_v41 = vld [vmem:[%s7535_s13 + $0x170] sm:$0xff]  ;;  %v3152_v30 = vld [vmem:[%s7535_s13 + $0x178] sm:$0xff]  ;;  %v3186_v55 = vld [vmem:[%s7535_s13 + $0x288] sm:$0xff] }
 0x413   : > { %2749 = vmatprep.mubr.f32.mxu1 %v7668_v1  ;;  %2910 = vmatprep.mubr.f32.mxu0 %v7668_v1  ;;  %v5145_v51 = vpack.c.bf16 %v3152_v30, %v3151_v41 }
 0x414   : > { %5102 = vmatpush3.bf16.msra.mxu1 %v5101_v56  ;;  %5134 = vmatpush3.bf16.msra.mxu0 %v5133_v2  ;;  %v3168_v56 = vld [vmem:[%s7535_s13 + $0x1f8] sm:$0xff]  ;;  %v5109_v2 = vpack.c.bf16 %v3118_v31, %v3117_v5 }
 0x415   : > { %5104 = vmatprep.subr.bf16.mxu1 %v5103_v40  ;;  %5136 = vmatprep.subr.bf16.mxu0 %v5135_v28  ;;  %v5143_v40 = vpack.c.bf16 %v3168_v56, %v3167_v38  ;;  %v3120_v28 = vld [vmem:[%s7535_s13 + $0x78] sm:$0xff]  ;;  %v3187_v38 = vld [vmem:[%s7535_s13 + $0x290] sm:$0xff] }
 0x416   : > { %4373 = vmatmul.mubr.msk.f32.gmra.mrb[130].mxu1 %vm934_vm4, %v6514_v10  ;;  %4389 = vmatmul.mubr.msk.f32.gmra.mrb[130].mxu0 %vm934_vm4, %v6514_v10  ;;  %v5141_v10 = vpack.c.bf16 %v3150_v35, %v3149_v34  ;;  %v5113_v43 = vpack.c.bf16 %v3120_v28, %v3119_v21  ;;  %v3219_v21 = vld [vmem:[%s7535_s13 + $0x390] sm:$0xff] }
 0x417   : > { %2755 = vmatprep.mubr.f32.mxu1 %v7668_v1  ;;  %2916 = vmatprep.mubr.f32.mxu0 %v7668_v1 }
 0x418   : > { %5106 = vmatpush3.bf16.msra.mxu1 %v5105_v0  ;;  %5138 = vmatpush3.bf16.msra.mxu0 %v5137_v48  ;;  %v3217_v0 = vld [vmem:[%s7535_s13 + $0x380] sm:$0xff] }
 0x419   : > { %5108 = vmatprep.subr.bf16.mxu1 %v5107_v32  ;;  %5140 = vmatprep.subr.bf16.mxu0 %v5139_v33  ;;  %v3169_v32 = vld [vmem:[%s7535_s13 + $0x200] sm:$0xff]  ;;  %v3170_v33 = vld [vmem:[%s7535_s13 + $0x208] sm:$0xff] }
 0x41a   : > { %4374 = vmatmul.mubr.msk.f32.gmra.mrb[132].mxu1 %vm934_vm4, %v6526_v50  ;;  %4390 = vmatmul.mubr.msk.f32.gmra.mrb[132].mxu0 %vm934_vm4, %v6526_v50  ;;  %v3185_v50 = vld [vmem:[%s7535_s13 + $0x280] sm:$0xff] }
 0x41b   : > { %2761 = vmatprep.mubr.f32.mxu1 %v7668_v1  ;;  %2922 = vmatprep.mubr.f32.mxu0 %v7668_v1  ;;  %v5147_v46 = vpack.c.bf16 %v3186_v55, %v3185_v50  ;;  %v3171_v50 = vld [vmem:[%s7535_s13 + $0x210] sm:$0xff]  ;;  %v3172_v55 = vld [vmem:[%s7535_s13 + $0x218] sm:$0xff] }
 0x41c   : > { %5110 = vmatpush3.bf16.msra.mxu1 %v5109_v2  ;;  %5142 = vmatpush3.bf16.msra.mxu0 %v5141_v10  ;;  %v3188_v10 = vld [vmem:[%s7535_s13 + $0x298] sm:$0xff] }
 0x41d   : > { %5112 = vmatprep.subr.bf16.mxu1 %v5111_v39  ;;  %5144 = vmatprep.subr.bf16.mxu0 %v5143_v40  ;;  %v3220_v39 = vld [vmem:[%s7535_s13 + $0x398] sm:$0xff] }
 0x41e   : > { %4375 = vmatmul.mubr.msk.f32.gmra.mrb[134].mxu1 %vm934_vm4, %v6524_v49  ;;  %4391 = vmatmul.mubr.msk.f32.gmra.mrb[134].mxu0 %vm934_vm4, %v6524_v49  ;;  %v3218_v49 = vld [vmem:[%s7535_s13 + $0x388] sm:$0xff] }
 0x41f   : > { %2767 = vmatprep.mubr.f32.mxu1 %v7668_v1  ;;  %2928 = vmatprep.mubr.f32.mxu0 %v7668_v1  ;;  %v5179_v48 = vpack.c.bf16 %v3218_v49, %v3217_v0  ;;  %v5151_v49 = vpack.c.bf16 %v3188_v10, %v3187_v38 }
 0x420   : > { %5114 = vmatpush3.bf16.msra.mxu1 %v5113_v43  ;;  %5146 = vmatpush3.bf16.msra.mxu0 %v5145_v51  ;;  %v5149_v43 = vpack.c.bf16 %v3170_v33, %v3169_v32  ;;  %v5181_v51 = vpack.c.bf16 %v3202_v37, %v3201_v36  ;;  %v3190_v33 = vld [vmem:[%s7535_s13 + $0x2a8] sm:$0xff]  ;;  %v5153_v37 = vpack.c.bf16 %v3172_v55, %v3171_v50  ;;  %v3223_v50 = vld [vmem:[%s7535_s13 + $0x3b0] sm:$0xff] }
 0x421   : > { %5148 = vmatprep.subr.bf16.mxu1 %v5147_v46  ;;  %5180 = vmatprep.subr.bf16.mxu0 %v5179_v48  ;;  %v5183_v48 = vpack.c.bf16 %v3220_v39, %v3219_v21 }
 0x422   : > { %4376 = vmatmul.mubr.msk.f32.gmra.mrb[136].mxu1 %vm934_vm4, %v6536_v45  ;;  %4392 = vmatmul.mubr.msk.f32.gmra.mrb[136].mxu0 %vm934_vm4, %v6536_v45 }
 0x423   : > { %2773 = vmatprep.mubr.f32.mxu1 %v7668_v1  ;;  %2934 = vmatprep.mubr.f32.mxu0 %v7668_v1 }
 0x426   : > { %4377 = vmatmul.mubr.msk.f32.gmra.mrb[138].mxu1 %vm934_vm4, %v6534_v44  ;;  %4393 = vmatmul.mubr.msk.f32.gmra.mrb[138].mxu0 %vm934_vm4, %v6534_v44  ;;  %v7669_v44 = vlaneseq }
 0x427   : > { %2779 = vmatprep.mubr.f32.mxu1 %v7668_v1  ;;  %2940 = vmatprep.mubr.f32.mxu0 %v7668_v1 }
 0x428   : > { %v6909_v45 = vshrl.u32 %v7669_v44, 7  ;;  %v3203_v44 = vld [vmem:[%s7535_s13 + $0x310] sm:$0xff] }
 0x42a   : > { %4378 = vmatmul.mubr.msk.f32.gmra.mrb[140].mxu1 %vm934_vm4, %v6546_v52  ;;  %4394 = vmatmul.mubr.msk.f32.gmra.mrb[140].mxu0 %vm934_vm4, %v6546_v52  ;;  %v1220_v52 = vsub.s32 2, %v6909_v45 }
 0x42b   : > { %2785 = vmatprep.mubr.f32.mxu1 %v7668_v1  ;;  %2946 = vmatprep.mubr.f32.mxu0 %v7668_v1 }
 0x42e   : > { %4379 = vmatmul.mubr.msk.f32.gmra.mrb[142].mxu1 %vm934_vm4, %v6544_v47  ;;  %4395 = vmatmul.mubr.msk.f32.gmra.mrb[142].mxu0 %vm934_vm4, %v6544_v47  ;;  %v1212_v47 = vsub.s32 0, %v6909_v45 }
 0x42f   : > { %2791 = vmatprep.mubr.f32.mxu1 %v7668_v1  ;;  %2952 = vmatprep.mubr.f32.mxu0 %v7668_v1 }
 0x432   : > { %4380 = vmatmul.mubr.msk.f32.gmra.mrb[144].mxu1 %vm934_vm4, %v6556_v6  ;;  %4396 = vmatmul.mubr.msk.f32.gmra.mrb[144].mxu0 %vm934_vm4, %v6556_v6  ;;  %v1224_v6 = vsub.s32 3, %v6909_v45 }
 0x433   : > { %2797 = vmatprep.mubr.f32.mxu1 %v7668_v1  ;;  %2958 = vmatprep.mubr.f32.mxu0 %v7668_v1 }
 0x436   : > { %4381 = vmatmul.mubr.msk.f32.gmra.mrb[146].mxu1 %vm934_vm4, %v6554_v53  ;;  %4397 = vmatmul.mubr.msk.f32.gmra.mrb[146].mxu0 %vm934_vm4, %v6554_v53  ;;  %v6916_v53 = vld [vmem:[%s7533_s11] sm:$0xff] }
 0x437   : > { %2803 = vmatprep.mubr.f32.mxu1 %v7668_v1  ;;  %2964 = vmatprep.mubr.f32.mxu0 %v7668_v1  ;;  %v6930_v31 = vrot.slane %v6916_v53, %v1224_v6 }
 0x43a   : > { %4382 = vmatmul.mubr.msk.f32.gmra.mrb[148].mxu1 %vm934_vm4, %v6566_v54  ;;  %4398 = vmatmul.mubr.msk.f32.gmra.mrb[148].mxu0 %vm934_vm4, %v6566_v54  ;;  %v6921_v54 = vrot.slane %v6916_v53, %v1212_v47  ;;  %v3204_v47 = vld [vmem:[%s7535_s13 + $0x318] sm:$0xff] }
 0x43b   : > { %2809 = vmatprep.mubr.f32.mxu1 %v7668_v1  ;;  %2970 = vmatprep.mubr.f32.mxu0 %v7668_v1  ;;  %v1216_v1 = vsub.s32 1, %v6909_v45 }
 0x43c   : > { %v1366_v34 = vadd.f32 %v6178_v58, %v6921_v54  ;;  %v1529_v58 = vadd.f32 %v6184_v61, %v6930_v31  ;;  %v1372_v46 = vadd.f32 %v6186_v62, %v6921_v54 }
 0x43d   : > { %v6927_v5 = vrot.slane %v6916_v53, %v1216_v1  ;;  %v1378_v1 = vadd.f32 %v6200_v3, %v6921_v54 }
 0x43e   : > { %4383 = vmatmul.mubr.msk.f32.gmra.mrb[150].mxu1 %vm934_vm4, %v6564_v63  ;;  %4399 = vmatmul.mubr.msk.f32.gmra.mrb[150].mxu0 %vm934_vm4, %v6564_v63  ;;  %v6924_v63 = vrot.slane %v6916_v53, %v1220_v52  ;;  %v3189_v52 = vld [vmem:[%s7535_s13 + $0x2a0] sm:$0xff] }
 0x43f   : > { %v1368_v56 = vadd.f32 %v6182_v60, %v6927_v5  ;;  %v1374_v62 = vadd.f32 %v6190_v42, %v6927_v5  ;;  %v3222_v42 = vld [vmem:[%s7535_s13 + $0x3a8] sm:$0xff]  ;;  %v5155_v21 = vpack.c.bf16 %v3190_v33, %v3189_v52  ;;  %v3176_v52 = vld [vmem:[%s7535_s13 + $0x238] sm:$0xff]  ;;  %v3193_v33 = vld [vmem:[%s7535_s13 + $0x2c0] sm:$0xff] }
 0x440   : > { %v1527_v35 = vadd.f32 %v6180_v59, %v6924_v63  ;;  %v1533_v0 = vadd.f32 %v6188_v29, %v6924_v63  ;;  %v1535_v29 = vadd.f32 %v6192_v57, %v6930_v31  ;;  %v1539_v10 = vadd.f32 %v6202_v4, %v6924_v63 }
 0x441   : > { %v1541_v4 = vadd.f32 %v6212_v9, %v6930_v31 }
 0x495   : > { %v2399_v2 = vpop.f32.mrb[88].mxu1  ;;  %v2560_v59 = vpop.f32.mrb[88].mxu0 }
 0x496   : > { %v2977_v40 = vmul.f32 %v2399_v2, %v1366_v34  ;;  %v2979_v28 = vmul.f32 %v2560_v59, %v1527_v35  ;;  %v2401_v60 = vpop.f32.mrb[89].mxu1  ;;  %v2562_v41 = vpop.f32.mrb[89].mxu0  ;;  %v3221_v34 = vld [vmem:[%s7535_s13 + $0x3a0] sm:$0xff]  ;;  %v3174_v59 = vld [vmem:[%s7535_s13 + $0x228] sm:$0xff] }
 0x497   : > { %v2978_v30 = vmul.f32 %v2401_v60, %v1368_v56  ;;  %v2980_v61 = vmul.f32 %v2562_v41, %v1529_v58  ;;  %v5185_v58 = vpack.c.bf16 %v3204_v47, %v3203_v44  ;;  %v3173_v2 = vld [vmem:[%s7535_s13 + $0x220] sm:$0xff]  ;;  %v5187_v39 = vpack.c.bf16 %v3222_v42, %v3221_v34  ;;  %v3191_v60 = vld [vmem:[%s7535_s13 + $0x2b0] sm:$0xff] }
 0x498   : > { %v1380_v41 = vadd.f32 %v6210_v7, %v6927_v5  ;;  %v3224_v7 = vld [vmem:[%s7535_s13 + $0x3b8] sm:$0xff]  ;;  %v3175_v47 = vld [vmem:[%s7535_s13 + $0x230] sm:$0xff]  ;;  %v1386_v34 = vadd.f32 %v6218_v12, %v6927_v5  ;;  %v1390_v42 = vadd.f32 %v6222_v14, %v6921_v54  ;;  %v3226_v12 = vld [vmem:[%s7535_s13 + $0x3c8] sm:$0xff] }
 0x499   : > { %v2405_v6 = vpop.f32.mrb[90].mxu1  ;;  %v2566_v32 = vpop.f32.mrb[90].mxu0  ;;  %3297 = vmatprep.mubr.f32.mxu1 %v2978_v30  ;;  %3442 = vmatprep.mubr.f32.mxu0 %v2980_v61  ;;  %v1384_v30 = vadd.f32 %v6214_v8, %v6921_v54 }
 0x49a   : > { %v2985_v57 = vmul.f32 %v2405_v6, %v1372_v46  ;;  %v2987_v35 = vmul.f32 %v2566_v32, %v1533_v0  ;;  %v2407_v36 = vpop.f32.mrb[91].mxu1  ;;  %v2568_v3 = vpop.f32.mrb[91].mxu0  ;;  %3298 = vmatmul.mubr.f32.vlgmr.msra.gmra.mrb[152].mxu1 %v2977_v40  ;;  %3443 = vmatmul.mubr.f32.vlgmr.msra.gmra.mrb[152].mxu0 %v2979_v28  ;;  %v3205_v40 = vld [vmem:[%s7535_s13 + $0x320] sm:$0xff]  ;;  %v3206_v28 = vld [vmem:[%s7535_s13 + $0x328] sm:$0xff]  ;;  %v5157_v0 = vpack.c.bf16 %v3174_v59, %v3173_v2  ;;  %v3207_v6 = vld [vmem:[%s7535_s13 + $0x330] sm:$0xff] }
 0x49b   : > { %v2986_v38 = vmul.f32 %v2407_v36, %v1374_v62  ;;  %v2988_v56 = vmul.f32 %v2568_v3, %v1535_v29  ;;  %5150 = vmatpush3.bf16.msra.mxu1 %v5149_v43  ;;  %5182 = vmatpush3.bf16.msra.mxu0 %v5181_v51  ;;  %v3192_v51 = vld [vmem:[%s7535_s13 + $0x2b8] sm:$0xff]  ;;  %v5189_v44 = vpack.c.bf16 %v3206_v28, %v3205_v40  ;;  %v3194_v36 = vld [vmem:[%s7535_s13 + $0x2c8] sm:$0xff]  ;;  %v3225_v3 = vld [vmem:[%s7535_s13 + $0x3c0] sm:$0xff] }
 0x49c   : > { %5152 = vmatprep.subr.bf16.mxu1 %v5151_v49  ;;  %5184 = vmatprep.subr.bf16.mxu0 %v5183_v48  ;;  %v1545_v62 = vadd.f32 %v6216_v11, %v6924_v63  ;;  %v5159_v29 = vpack.c.bf16 %v3192_v51, %v3191_v60  ;;  %v3208_v32 = vld [vmem:[%s7535_s13 + $0x338] sm:$0xff]  ;;  %v1547_v11 = vadd.f32 %v6220_v13, %v6930_v31  ;;  %v3209_v60 = vld [vmem:[%s7535_s13 + $0x340] sm:$0xff] }
 0x49d   : > { %v2411_v61 = vpop.f32.mrb[92].mxu1  ;;  %v2572_v43 = vpop.f32.mrb[92].mxu0  ;;  %3302 = vmatprep.mubr.f32.mxu1 %v2986_v38  ;;  %3447 = vmatprep.mubr.f32.mxu0 %v2988_v56  ;;  %v5161_v56 = vpack.c.bf16 %v3176_v52, %v3175_v47  ;;  %v5193_v59 = vpack.c.bf16 %v3208_v32, %v3207_v6  ;;  %v5163_v40 = vpack.c.bf16 %v3194_v36, %v3193_v33  ;;  %v3197_v6 = vld [vmem:[%s7535_s13 + $0x2e0] sm:$0xff] }
 0x49e   : > { %v2993_v9 = vmul.f32 %v2411_v61, %v1378_v1  ;;  %v2995_v55 = vmul.f32 %v2572_v43, %v1539_v10  ;;  %v2413_v46 = vpop.f32.mrb[93].mxu1  ;;  %v2574_v8 = vpop.f32.mrb[93].mxu0  ;;  %3303 = vmatmul.mubr.f32.gmra.mrb[154].mxu1 %v2985_v57  ;;  %3448 = vmatmul.mubr.f32.gmra.mrb[154].mxu0 %v2987_v35  ;;  %v5191_v1 = vpack.c.bf16 %v3224_v7, %v3223_v50  ;;  %v3177_v10 = vld [vmem:[%s7535_s13 + $0x240] sm:$0xff]  ;;  %v3196_v50 = vld [vmem:[%s7535_s13 + $0x2d8] sm:$0xff]  ;;  %v3227_v7 = vld [vmem:[%s7535_s13 + $0x3d0] sm:$0xff] }
 0x49f   : > { %v2994_v49 = vmul.f32 %v2413_v46, %v1380_v41  ;;  %v2996_v48 = vmul.f32 %v2574_v8, %v1541_v4  ;;  %5154 = vmatpush3.bf16.msra.mxu1 %v5153_v37  ;;  %5186 = vmatpush3.bf16.msra.mxu0 %v5185_v58  ;;  %v5195_v28 = vpack.c.bf16 %v3226_v12, %v3225_v3  ;;  %v3210_v41 = vld [vmem:[%s7535_s13 + $0x348] sm:$0xff]  ;;  %v3195_v4 = vld [vmem:[%s7535_s13 + $0x2d0] sm:$0xff] }
 0x4a0   : > { %5156 = vmatprep.subr.bf16.mxu1 %v5155_v21  ;;  %5188 = vmatprep.subr.bf16.mxu0 %v5187_v39  ;;  %v3178_v21 = vld [vmem:[%s7535_s13 + $0x248] sm:$0xff]  ;;  %v1551_v39 = vadd.f32 %v6224_v15, %v6924_v63  ;;  %v1553_v15 = vadd.f32 %v6228_v17, %v6930_v31  ;;  %v1396_v61 = vadd.f32 %v6230_v18, %v6921_v54 }
 0x4a1   : > { %v2417_v57 = vpop.f32.mrb[94].mxu1  ;;  %v2578_v35 = vpop.f32.mrb[94].mxu0  ;;  %3307 = vmatprep.mubr.f32.mxu1 %v2994_v49  ;;  %3452 = vmatprep.mubr.f32.mxu0 %v2996_v48  ;;  %v5165_v46 = vpack.c.bf16 %v3178_v21, %v3177_v10  ;;  %v5197_v49 = vpack.c.bf16 %v3210_v41, %v3209_v60  ;;  %v3179_v48 = vld [vmem:[%s7535_s13 + $0x250] sm:$0xff]  ;;  %v1557_v47 = vadd.f32 %v6232_v19, %v6924_v63  ;;  %v3214_v10 = vld [vmem:[%s7535_s13 + $0x368] sm:$0xff]  ;;  %v3200_v41 = vld [vmem:[%s7535_s13 + $0x2f8] sm:$0xff] }
 0x4a2   : > { %v3001_v13 = vmul.f32 %v2417_v57, %v1384_v30  ;;  %v3003_v37 = vmul.f32 %v2578_v35, %v1545_v62  ;;  %v2419_v38 = vpop.f32.mrb[95].mxu1  ;;  %v2580_v14 = vpop.f32.mrb[95].mxu0  ;;  %3308 = vmatmul.mubr.f32.gmra.mrb[156].mxu1 %v2993_v9  ;;  %3453 = vmatmul.mubr.f32.gmra.mrb[156].mxu0 %v2995_v55  ;;  %v1392_v30 = vadd.f32 %v6226_v16, %v6927_v5  ;;  %v3228_v16 = vld [vmem:[%s7535_s13 + $0x3d8] sm:$0xff]  ;;  %v3229_v57 = vld [vmem:[%s7535_s13 + $0x3e0] sm:$0xff]  ;;  %v3199_v21 = vld [vmem:[%s7535_s13 + $0x2f0] sm:$0xff] }
 0x4a3   : > { %v3002_v58 = vmul.f32 %v2419_v38, %v1386_v34  ;;  %v3004_v2 = vmul.f32 %v2580_v14, %v1547_v11  ;;  %5158 = vmatpush3.bf16.msra.mxu1 %v5157_v0  ;;  %5190 = vmatpush3.bf16.msra.mxu0 %v5189_v44  ;;  %v3180_v44 = vld [vmem:[%s7535_s13 + $0x258] sm:$0xff]  ;;  %v5167_v52 = vpack.c.bf16 %v3196_v50, %v3195_v4  ;;  %v3181_v38 = vld [vmem:[%s7535_s13 + $0x260] sm:$0xff]  ;;  %v3182_v14 = vld [vmem:[%s7535_s13 + $0x268] sm:$0xff] }
 0x4a4   : > { %5160 = vmatprep.subr.bf16.mxu1 %v5159_v29  ;;  %5192 = vmatprep.subr.bf16.mxu0 %v5191_v1  ;;  %v5199_v62 = vpack.c.bf16 %v3228_v16, %v3227_v7  ;;  %v3211_v29 = vld [vmem:[%s7535_s13 + $0x350] sm:$0xff]  ;;  %v3212_v1 = vld [vmem:[%s7535_s13 + $0x358] sm:$0xff]  ;;  %v1398_v32 = vadd.f32 %v6234_v20, %v6927_v5  ;;  %v1559_v19 = vadd.f32 %v6236_v22, %v6930_v31  ;;  %v3230_v20 = vld [vmem:[%s7535_s13 + $0x3e8] sm:$0xff] }
 0x4a5   : > { %v2423_v43 = vpop.f32.mrb[96].mxu1  ;;  %v2584_v51 = vpop.f32.mrb[96].mxu0  ;;  %3312 = vmatprep.mubr.f32.mxu1 %v3002_v58  ;;  %3457 = vmatprep.mubr.f32.mxu0 %v3004_v2  ;;  %v1402_v33 = vadd.f32 %v6238_v23, %v6921_v54  ;;  %v5169_v3 = vpack.c.bf16 %v3180_v44, %v3179_v48  ;;  %v5203_v2 = vpack.c.bf16 %v3230_v20, %v3229_v57  ;;  %v3231_v4 = vld [vmem:[%s7535_s13 + $0x3f0] sm:$0xff]  ;;  %v3184_v16 = vld [vmem:[%s7535_s13 + $0x278] sm:$0xff]  ;;  %v7674_v57 = vld [vmem:[#allocation14_spill] sm:$0xff] }
 0x4a6   : > { %v3009_v17 = vmul.f32 %v2423_v43, %v1390_v42  ;;  %v3011_v9 = vmul.f32 %v2584_v51, %v1551_v39  ;;  %v2425_v55 = vpop.f32.mrb[97].mxu1  ;;  %v2586_v18 = vpop.f32.mrb[97].mxu0  ;;  %3313 = vmatmul.mubr.f32.gmra.mrb[158].mxu1 %v3001_v13  ;;  %3458 = vmatmul.mubr.f32.gmra.mrb[158].mxu0 %v3003_v37  ;;  %v3198_v42 = vld [vmem:[%s7535_s13 + $0x2e8] sm:$0xff]  ;;  %v5201_v37 = vpack.c.bf16 %v3212_v1, %v3211_v29  ;;  %v3183_v7 = vld [vmem:[%s7535_s13 + $0x270] sm:$0xff] }
 0x4a7   : > { %v3010_v8 = vmul.f32 %v2425_v55, %v1392_v30  ;;  %v3012_v0 = vmul.f32 %v2586_v18, %v1553_v15  ;;  %5162 = vmatpush3.bf16.msra.mxu1 %v5161_v56  ;;  %5194 = vmatpush3.bf16.msra.mxu0 %v5193_v59  ;;  %v1563_v56 = vadd.f32 %v6240_v24, %v6924_v63  ;;  %v3213_v59 = vld [vmem:[%s7535_s13 + $0x360] sm:$0xff]  ;;  %v7672_v48 = vld [vmem:[#allocation12_spill] sm:$0xff] }
 0x4a8   : > { %5164 = vmatprep.subr.bf16.mxu1 %v5163_v40  ;;  %5196 = vmatprep.subr.bf16.mxu0 %v5195_v28  ;;  %v5171_v58 = vpack.c.bf16 %v3198_v42, %v3197_v6  ;;  %v1404_v39 = vadd.f32 %v6242_v25, %v6927_v5  ;;  %v1565_v24 = vadd.f32 %v6244_v26, %v6930_v31  ;;  %v3232_v25 = vld [vmem:[%s7535_s13 + $0x3f8] sm:$0xff] }
 0x4a9   : > { %v2429_v34 = vpop.f32.mrb[98].mxu1  ;;  %v2590_v11 = vpop.f32.mrb[98].mxu0  ;;  %3317 = vmatprep.mubr.f32.mxu1 %v3010_v8  ;;  %3462 = vmatprep.mubr.f32.mxu0 %v3012_v0  ;;  %v1408_v40 = vadd.f32 %v6246_v27, %v6921_v54  ;;  %v5205_v50 = vpack.c.bf16 %v3214_v10, %v3213_v59  ;;  %v5175_v55 = vpack.c.bf16 %v3200_v41, %v3199_v21  ;;  %v3216_v8 = vld [vmem:[%s7535_s13 + $0x378] sm:$0xff]  ;;  %v7671_v0 = vld [vmem:[#allocation11_spill] sm:$0xff]  ;;  %v7678_v10 = vld [vmem:[#allocation18_spill] sm:$0xff] }
 0x4aa   : > { %v3017_v22 = vmul.f32 %v2429_v34, %v1396_v61  ;;  %v3019_v35 = vmul.f32 %v2590_v11, %v1557_v47  ;;  %v2431_v36 = vpop.f32.mrb[99].mxu1  ;;  %v2592_v23 = vpop.f32.mrb[99].mxu0  ;;  %3318 = vmatmul.mubr.f32.gmra.mrb[160].mxu1 %v3009_v17  ;;  %3463 = vmatmul.mubr.f32.gmra.mrb[160].mxu0 %v3011_v9  ;;  %v5173_v61 = vpack.c.bf16 %v3182_v14, %v3181_v38  ;;  %v7670_v17 = vld [vmem:[#allocation10_spill] sm:$0xff]  ;;  %v7673_v11 = vld [vmem:[#allocation13_spill] sm:$0xff] }
 0x4ab   : > { %v3018_v12 = vmul.f32 %v2431_v36, %v1398_v32  ;;  %v3020_v13 = vmul.f32 %v2592_v23, %v1559_v19  ;;  %5166 = vmatpush3.bf16.msra.mxu1 %v5165_v46  ;;  %5198 = vmatpush3.bf16.msra.mxu0 %v5197_v49  ;;  %v1569_v9 = vadd.f32 %v7670_v17, %v6924_v63  ;;  %v3215_v46 = vld [vmem:[%s7535_s13 + $0x370] sm:$0xff] }
 0x4ac   : > { %5168 = vmatprep.subr.bf16.mxu1 %v5167_v52  ;;  %5200 = vmatprep.subr.bf16.mxu0 %v5199_v62  ;;  %v5207_v18 = vpack.c.bf16 %v3232_v25, %v3231_v4  ;;  %v1410_v49 = vadd.f32 %v7671_v0, %v6927_v5  ;;  %v1571_v44 = vadd.f32 %v7672_v48, %v6930_v31  ;;  %v7676_v36 = vld [vmem:[#allocation16_spill] sm:$0xff] }
 0x4ad   : > { %v2435_v28 = vpop.f32.mrb[100].mxu1  ;;  %v2596_v60 = vpop.f32.mrb[100].mxu0  ;;  %3322 = vmatprep.mubr.f32.mxu1 %v3018_v12  ;;  %3467 = vmatprep.mubr.f32.mxu0 %v3020_v13  ;;  %v5177_v32 = vpack.c.bf16 %v3184_v16, %v3183_v7  ;;  %v5209_v34 = vpack.c.bf16 %v3216_v8, %v3215_v46  ;;  %v1414_v42 = vadd.f32 %v7673_v11, %v6921_v54  ;;  %v7683_v7 = vld [vmem:[#allocation23_spill] sm:$0xff]  ;;  %v7684_v17 = vld [vmem:[#allocation24_spill] sm:$0xff] }
 0x4ae   : > { %v3025_v26 = vmul.f32 %v2435_v28, %v1402_v33  ;;  %v3027_v30 = vmul.f32 %v2596_v60, %v1563_v56  ;;  %v2437_v15 = vpop.f32.mrb[101].mxu1  ;;  %v2598_v27 = vpop.f32.mrb[101].mxu0  ;;  %3323 = vmatmul.mubr.f32.gmra.mrb[162].mxu1 %v3017_v22  ;;  %3468 = vmatmul.mubr.f32.gmra.mrb[162].mxu0 %v3019_v35  ;;  %v1575_v20 = vadd.f32 %v7674_v57, %v6924_v63  ;;  %v7675_v22 = vld [vmem:[#allocation15_spill] sm:$0xff] }
 0x4af   : > { %v3026_v43 = vmul.f32 %v2437_v15, %v1404_v39  ;;  %v3028_v51 = vmul.f32 %v2598_v27, %v1565_v24  ;;  %5170 = vmatpush3.bf16.msra.mxu1 %v5169_v3  ;;  %5202 = vmatpush3.bf16.msra.mxu0 %v5201_v37  ;;  %v1416_v35 = vadd.f32 %v7675_v22, %v6927_v5  ;;  %v7679_v39 = vld [vmem:[#allocation19_spill] sm:$0xff] }
 0x4b0   : > { %5172 = vmatprep.subr.bf16.mxu1 %v5171_v58  ;;  %5204 = vmatprep.subr.bf16.mxu0 %v5203_v2  ;;  %v1577_v23 = vadd.f32 %v7676_v36, %v6930_v31  ;;  %v7677_v2 = vld [vmem:[#allocation17_spill] sm:$0xff]  ;;  %v1581_v21 = vadd.f32 %v7678_v10, %v6924_v63  ;;  %v1422_v24 = vadd.f32 %v7679_v39, %v6927_v5 }
 0x4b1   : > { %v2441_v47 = vpop.f32.mrb[102].mxu1  ;;  %v2602_v52 = vpop.f32.mrb[102].mxu0  ;;  %3327 = vmatprep.mubr.f32.mxu1 %v3026_v43  ;;  %3472 = vmatprep.mubr.f32.mxu0 %v3028_v51  ;;  %v1420_v59 = vadd.f32 %v7677_v2, %v6921_v54  ;;  %v7682_v51 = vld [vmem:[#allocation22_spill] sm:$0xff]  ;;  %v1428_v16 = vadd.f32 %v7683_v7, %v6927_v5  ;;  %v7689_v36 = vld [vmem:[#allocation29_spill] sm:$0xff]  ;;  %v1228_v7 = vsub.s32 4, %v6909_v45 }
 0x4b2   : > { %v3033_v62 = vmul.f32 %v2441_v47, %v1408_v40  ;;  %v3035_v29 = vmul.f32 %v2602_v52, %v1569_v9  ;;  %v2443_v1 = vpop.f32.mrb[103].mxu1  ;;  %v2604_v6 = vpop.f32.mrb[103].mxu0  ;;  %3328 = vmatmul.mubr.f32.gmra.mrb[164].mxu1 %v3025_v26  ;;  %3473 = vmatmul.mubr.f32.gmra.mrb[164].mxu0 %v3027_v30  ;;  %v7680_v40 = vld [vmem:[#allocation20_spill] sm:$0xff]  ;;  %v1589_v9 = vadd.f32 %v7684_v17, %v6930_v31  ;;  %v7685_v47 = vld [vmem:[#allocation25_spill] sm:$0xff] }
 0x4b3   : > { %v3034_v19 = vmul.f32 %v2443_v1, %v1410_v49  ;;  %v3036_v33 = vmul.f32 %v2604_v6, %v1571_v44  ;;  %5174 = vmatpush3.bf16.msra.mxu1 %v5173_v61  ;;  %5206 = vmatpush3.bf16.msra.mxu0 %v5205_v50  ;;  %v1583_v28 = vadd.f32 %v7680_v40, %v6930_v31  ;;  %v7681_v61 = vld [vmem:[#allocation21_spill] sm:$0xff]  ;;  %v7687_v1 = vld [vmem:[#allocation27_spill] sm:$0xff] }
 0x4b4   : > { %5176 = vmatprep.subr.bf16.mxu1 %v5175_v55  ;;  %5208 = vmatprep.subr.bf16.mxu0 %v5207_v18  ;;  %v1426_v43 = vadd.f32 %v7681_v61, %v6921_v54  ;;  %v1587_v50 = vadd.f32 %v7682_v51, %v6924_v63  ;;  %v1432_v52 = vadd.f32 %v7685_v47, %v6921_v54  ;;  %v7693_v40 = vld [vmem:[#allocation33_spill] sm:$0xff] }
 0x4b5   : > { %v2447_v3 = vpop.f32.mrb[104].mxu1  ;;  %v2608_v12 = vpop.f32.mrb[104].mxu0  ;;  %3332 = vmatprep.mubr.f32.mxu1 %v3034_v19  ;;  %3477 = vmatprep.mubr.f32.mxu0 %v3036_v33  ;;  %v1434_v6 = vadd.f32 %v7687_v1, %v6927_v5 }
 0x4b6   : > { %v3041_v13 = vmul.f32 %v2447_v3, %v1414_v42  ;;  %v3043_v37 = vmul.f32 %v2608_v12, %v1575_v20  ;;  %v2449_v38 = vpop.f32.mrb[105].mxu1  ;;  %v2610_v14 = vpop.f32.mrb[105].mxu0  ;;  %3333 = vmatmul.mubr.f32.gmra.mrb[166].mxu1 %v3033_v62  ;;  %3478 = vmatmul.mubr.f32.gmra.mrb[166].mxu0 %v3035_v29  ;;  %v7686_v62 = vld [vmem:[#allocation26_spill] sm:$0xff] }
 0x4b7   : > { %v3042_v56 = vmul.f32 %v2449_v38, %v1416_v35  ;;  %v3044_v58 = vmul.f32 %v2610_v14, %v1577_v23  ;;  %5178 = vmatpush3.bf16.msra.mxu1 %v5177_v32  ;;  %5210 = vmatpush3.bf16.msra.mxu0 %v5209_v34  ;;  %v1593_v29 = vadd.f32 %v7686_v62, %v6924_v63  ;;  %v7688_v32 = vld [vmem:[#allocation28_spill] sm:$0xff]  ;;  %v7690_v3 = vld [vmem:[#allocation30_spill] sm:$0xff] }
 0x4b8   : > { %v1595_v19 = vadd.f32 %v7688_v32, %v6930_v31  ;;  %v1438_v23 = vadd.f32 %v7689_v36, %v6921_v54  ;;  %v1599_v12 = vadd.f32 %v7690_v3, %v6924_v63  ;;  %v7692_v38 = vld [vmem:[#allocation32_spill] sm:$0xff] }
 0x4b9   : > { %v2453_v60 = vpop.f32.mrb[106].mxu1  ;;  %v2614_v41 = vpop.f32.mrb[106].mxu0  ;;  %3337 = vmatprep.mubr.f32.mxu1 %v3042_v56  ;;  %3482 = vmatprep.mubr.f32.mxu0 %v3044_v58  ;;  %v1601_v14 = vadd.f32 %v7692_v38, %v6930_v31 }
 0x4ba   : > { %v3049_v4 = vmul.f32 %v2453_v60, %v1420_v59  ;;  %v3051_v25 = vmul.f32 %v2614_v41, %v1581_v21  ;;  %v2455_v26 = vpop.f32.mrb[107].mxu1  ;;  %v2616_v30 = vpop.f32.mrb[107].mxu0  ;;  %3338 = vmatmul.mubr.f32.gmra.mrb[168].mxu1 %v3041_v13  ;;  %3483 = vmatmul.mubr.f32.gmra.mrb[168].mxu0 %v3043_v37  ;;  %v7691_v13 = vld [vmem:[#allocation31_spill] sm:$0xff]  ;;  %v7694_v60 = vld [vmem:[#allocation34_spill] sm:$0xff] }
 0x4bb   : > { %v3050_v15 = vmul.f32 %v2455_v26, %v1422_v24  ;;  %v3052_v27 = vmul.f32 %v2616_v30, %v1583_v28  ;;  %v1440_v37 = vadd.f32 %v7691_v13, %v6927_v5  ;;  %v1444_v28 = vadd.f32 %v7693_v40, %v6921_v54  ;;  %v7696_v26 = vld [vmem:[#allocation36_spill] sm:$0xff] }
 0x4bc   : > { %v1605_v41 = vadd.f32 %v7694_v60, %v6924_v63  ;;  %v1607_v30 = vadd.f32 %v7696_v26, %v6930_v31 }
 0x4bd   : > { %v2459_v55 = vpop.f32.mrb[108].mxu1  ;;  %v2620_v18 = vpop.f32.mrb[108].mxu0  ;;  %3342 = vmatprep.mubr.f32.mxu1 %v3050_v15  ;;  %3487 = vmatprep.mubr.f32.mxu0 %v3052_v27 }
 0x4be   : > { %v3057_v46 = vmul.f32 %v2459_v55, %v1426_v43  ;;  %v3059_v8 = vmul.f32 %v2620_v18, %v1587_v50  ;;  %v2461_v0 = vpop.f32.mrb[109].mxu1  ;;  %v2622_v49 = vpop.f32.mrb[109].mxu0  ;;  %3343 = vmatmul.mubr.f32.gmra.mrb[170].mxu1 %v3049_v4  ;;  %3488 = vmatmul.mubr.f32.gmra.mrb[170].mxu0 %v3051_v25  ;;  %v7695_v4 = vld [vmem:[#allocation35_spill] sm:$0xff]  ;;  %v7698_v18 = vld [vmem:[#allocation38_spill] sm:$0xff] }
 0x4bf   : > { %v3058_v48 = vmul.f32 %v2461_v0, %v1428_v16  ;;  %v3060_v44 = vmul.f32 %v2622_v49, %v1589_v9  ;;  %v1446_v25 = vadd.f32 %v7695_v4, %v6927_v5  ;;  %v7697_v9 = vld [vmem:[#allocation37_spill] sm:$0xff]  ;;  %v1232_v0 = vsub.s32 5, %v6909_v45  ;;  %v7699_v49 = vld [vmem:[#allocation39_spill] sm:$0xff] }
 0x4c0   : > { %v1450_v55 = vadd.f32 %v7697_v9, %v6921_v54 }
 0x4c1   : > { %v2465_v33 = vpop.f32.mrb[110].mxu1  ;;  %v2626_v34 = vpop.f32.mrb[110].mxu0  ;;  %3347 = vmatprep.mubr.f32.mxu1 %v3058_v48  ;;  %3492 = vmatprep.mubr.f32.mxu0 %v3060_v44  ;;  %v1452_v48 = vadd.f32 %v7699_v49, %v6927_v5  ;;  %v7700_v44 = vld [vmem:[#allocation40_spill] sm:$0xff]  ;;  %v7247_v36 = vrot.slane %v6916_v53, %v1232_v0 }
 0x4c2   : > { %v3065_v11 = vmul.f32 %v2465_v33, %v1432_v52  ;;  %v3067_v42 = vmul.f32 %v2626_v34, %v1593_v29  ;;  %v2467_v57 = vpop.f32.mrb[111].mxu1  ;;  %v2628_v20 = vpop.f32.mrb[111].mxu0  ;;  %3348 = vmatmul.mubr.f32.gmra.mrb[172].mxu1 %v3057_v46  ;;  %3493 = vmatmul.mubr.f32.gmra.mrb[172].mxu0 %v3059_v8  ;;  %v1611_v46 = vadd.f32 %v7698_v18, %v6924_v63  ;;  %v1236_v8 = vsub.s32 6, %v6909_v45 }
 0x4c3   : > { %v3066_v22 = vmul.f32 %v2467_v57, %v1434_v6  ;;  %v3068_v35 = vmul.f32 %v2628_v20, %v1595_v19  ;;  %v1613_v47 = vadd.f32 %v7700_v44, %v6930_v31  ;;  %v1240_v52 = vsub.s32 7, %v6909_v45  ;;  %v7702_v20 = vld [vmem:[#allocation42_spill] sm:$0xff]  ;;  %v7713_v44 = vld [vmem:[#allocation53_spill] sm:$0xff] }
 0x4c4   : > { %v7237_v33 = vrot.slane %v6916_v53, %v1228_v7 }
 0x4c5   : > { %v2471_v56 = vpop.f32.mrb[112].mxu1  ;;  %v2632_v58 = vpop.f32.mrb[112].mxu0  ;;  %3352 = vmatprep.mubr.f32.mxu1 %v3066_v22  ;;  %3497 = vmatprep.mubr.f32.mxu0 %v3068_v35  ;;  %v1617_v22 = vadd.f32 %v7702_v20, %v6924_v63  ;;  %v7244_v35 = vrot.slane %v6916_v53, %v1236_v8 }
 0x4c6   : > { %v3073_v2 = vmul.f32 %v2471_v56, %v1438_v23  ;;  %v3075_v59 = vmul.f32 %v2632_v58, %v1599_v12  ;;  %v2473_v10 = vpop.f32.mrb[113].mxu1  ;;  %v2634_v21 = vpop.f32.mrb[113].mxu0  ;;  %3353 = vmatmul.mubr.f32.gmra.mrb[174].mxu1 %v3065_v11  ;;  %3498 = vmatmul.mubr.f32.gmra.mrb[174].mxu0 %v3067_v42  ;;  %v7701_v42 = vld [vmem:[#allocation41_spill] sm:$0xff]  ;;  %v7703_v23 = vld [vmem:[#allocation43_spill] sm:$0xff]  ;;  %v7704_v12 = vld [vmem:[#allocation44_spill] sm:$0xff] }
 0x4c7   : > { %v3074_v39 = vmul.f32 %v2473_v10, %v1440_v37  ;;  %v3076_v24 = vmul.f32 %v2634_v21, %v1601_v14  ;;  %v1456_v57 = vadd.f32 %v7701_v42, %v6921_v54  ;;  %v1458_v3 = vadd.f32 %v7703_v23, %v6927_v5  ;;  %v7705_v5 = vld [vmem:[#allocation45_spill] sm:$0xff] }
 0x4c8   : > { %v1619_v13 = vadd.f32 %v7704_v12, %v6930_v31  ;;  %v7254_v37 = vrot.slane %v6916_v53, %v1240_v52  ;;  %v1688_v10 = vadd.f32 %v7705_v5, %v7237_v33  ;;  %v7706_v31 = vld [vmem:[#allocation46_spill] sm:$0xff]  ;;  %v7707_v53 = vld [vmem:[#allocation47_spill] sm:$0xff] }
 0x4c9   : > { %v2477_v15 = vpop.f32.mrb[114].mxu1  ;;  %v2638_v27 = vpop.f32.mrb[114].mxu0  ;;  %3357 = vmatprep.mubr.f32.mxu1 %v3074_v39  ;;  %3502 = vmatprep.mubr.f32.mxu0 %v3076_v24  ;;  %v1849_v21 = vadd.f32 %v7706_v31, %v7244_v35  ;;  %v1690_v39 = vadd.f32 %v7707_v53, %v7247_v36  ;;  %v7708_v24 = vld [vmem:[#allocation48_spill] sm:$0xff]  ;;  %v7714_v52 = vld [vmem:[#allocation54_spill] sm:$0xff] }
 0x4ca   : > { %v3081_v61 = vmul.f32 %v2477_v15, %v1444_v28  ;;  %v3083_v43 = vmul.f32 %v2638_v27, %v1605_v41  ;;  %v2479_v51 = vpop.f32.mrb[115].mxu1  ;;  %v2640_v50 = vpop.f32.mrb[115].mxu0  ;;  %3358 = vmatmul.mubr.f32.gmra.mrb[176].mxu1 %v3073_v2  ;;  %3503 = vmatmul.mubr.f32.gmra.mrb[176].mxu0 %v3075_v59  ;;  %v1851_v40 = vadd.f32 %v7708_v24, %v7254_v37  ;;  %v7709_v27 = vld [vmem:[#allocation49_spill] sm:$0xff] }
 0x4cb   : > { %v3082_v16 = vmul.f32 %v2479_v51, %v1446_v25  ;;  %v3084_v17 = vmul.f32 %v2640_v50, %v1607_v30  ;;  %v7711_v50 = vld [vmem:[#allocation51_spill] sm:$0xff] }
 0x4cc   : > { %v1696_v7 = vadd.f32 %v7711_v50, %v7247_v36 }
 0x4cd   : > { %v2483_v62 = vpop.f32.mrb[116].mxu1  ;;  %v2644_v29 = vpop.f32.mrb[116].mxu0  ;;  %3362 = vmatprep.mubr.f32.mxu1 %v3082_v16  ;;  %3507 = vmatprep.mubr.f32.mxu0 %v3084_v17  ;;  %v7712_v16 = vld [vmem:[#allocation52_spill] sm:$0xff] }
 0x4ce   : > { %v3089_v1 = vmul.f32 %v2483_v62, %v1450_v55  ;;  %v3091_v6 = vmul.f32 %v2644_v29, %v1611_v46  ;;  %v2485_v32 = vpop.f32.mrb[117].mxu1  ;;  %v2646_v19 = vpop.f32.mrb[117].mxu0  ;;  %3363 = vmatmul.mubr.f32.gmra.mrb[178].mxu1 %v3081_v61  ;;  %3508 = vmatmul.mubr.f32.gmra.mrb[178].mxu0 %v3083_v43  ;;  %v1694_v61 = vadd.f32 %v7709_v27, %v7237_v33  ;;  %v7710_v43 = vld [vmem:[#allocation50_spill] sm:$0xff]  ;;  %v7715_v29 = vld [vmem:[#allocation55_spill] sm:$0xff] }
 0x4cf   : > { %v3090_v34 = vmul.f32 %v2485_v32, %v1452_v48  ;;  %v3092_v11 = vmul.f32 %v2646_v19, %v1613_v47  ;;  %v1855_v51 = vadd.f32 %v7710_v43, %v7244_v35  ;;  %v1857_v17 = vadd.f32 %v7712_v16, %v7254_v37 }
 0x4d0   : > { %v1700_v47 = vadd.f32 %v7713_v44, %v7237_v33  ;;  %v1861_v62 = vadd.f32 %v7714_v52, %v7244_v35 }
 0x4d1   : > { %v2489_v38 = vpop.f32.mrb[118].mxu1  ;;  %v2650_v54 = vpop.f32.mrb[118].mxu0  ;;  %3367 = vmatprep.mubr.f32.mxu1 %v3090_v34  ;;  %3512 = vmatprep.mubr.f32.mxu0 %v3092_v11 }
 0x4d2   : > { %v3097_v63 = vmul.f32 %v2489_v38, %v1456_v57  ;;  %v3099_v14 = vmul.f32 %v2650_v54, %v1617_v22  ;;  %v2491_v56 = vpop.f32.mrb[119].mxu1  ;;  %v2652_v58 = vpop.f32.mrb[119].mxu0  ;;  %3368 = vmatmul.mubr.f32.gmra.mrb[180].mxu1 %v3089_v1  ;;  %3513 = vmatmul.mubr.f32.gmra.mrb[180].mxu0 %v3091_v6  ;;  %v1702_v1 = vadd.f32 %v7715_v29, %v7247_v36  ;;  %v7716_v6 = vld [vmem:[#allocation56_spill] sm:$0xff]  ;;  %v7719_v54 = vld [vmem:[#allocation59_spill] sm:$0xff] }
 0x4d3   : > { %v3098_v2 = vmul.f32 %v2491_v56, %v1458_v3  ;;  %v3100_v59 = vmul.f32 %v2652_v58, %v1619_v13  ;;  %v1863_v32 = vadd.f32 %v7716_v6, %v7254_v37  ;;  %v7717_v3 = vld [vmem:[#allocation57_spill] sm:$0xff]  ;;  %v7718_v13 = vld [vmem:[#allocation58_spill] sm:$0xff] }
 0x4d4   : > { %v1706_v12 = vadd.f32 %v7717_v3, %v7237_v33  ;;  %v1867_v38 = vadd.f32 %v7718_v13, %v7244_v35 }
 0x4d5   : > { %v2721_v28 = vpop.f32.mrb[120].mxu1  ;;  %v2882_v60 = vpop.f32.mrb[120].mxu0  ;;  %3372 = vmatprep.mubr.f32.mxu1 %v3098_v2  ;;  %3517 = vmatprep.mubr.f32.mxu0 %v3100_v59 }
 0x4d6   : > { %v2981_v41 = vmul.f32 %v2721_v28, %v1688_v10  ;;  %v2983_v4 = vmul.f32 %v2882_v60, %v1849_v21  ;;  %v2723_v25 = vpop.f32.mrb[121].mxu1  ;;  %v2884_v26 = vpop.f32.mrb[121].mxu0  ;;  %3373 = vmatmul.mubr.f32.gmra.mrb[182].mxu1 %v3097_v63  ;;  %3518 = vmatmul.mubr.f32.gmra.mrb[182].mxu0 %v3099_v14  ;;  %v1708_v63 = vadd.f32 %v7719_v54, %v7247_v36  ;;  %v7720_v14 = vld [vmem:[#allocation60_spill] sm:$0xff]  ;;  %v7723_v60 = vld [vmem:[#allocation63_spill] sm:$0xff] }
 0x4d7   : > { %v2982_v30 = vmul.f32 %v2723_v25, %v1690_v39  ;;  %v2984_v15 = vmul.f32 %v2884_v26, %v1851_v40  ;;  %v1869_v56 = vadd.f32 %v7720_v14, %v7254_v37  ;;  %v7721_v39 = vld [vmem:[#allocation61_spill] sm:$0xff]  ;;  %v7722_v40 = vld [vmem:[#allocation62_spill] sm:$0xff] }
 0x4d8   : > { %v1712_v24 = vadd.f32 %v7721_v39, %v7237_v33  ;;  %v1873_v28 = vadd.f32 %v7722_v40, %v7244_v35 }
 0x4d9   : > { %v2727_v9 = vpop.f32.mrb[122].mxu1  ;;  %v2888_v55 = vpop.f32.mrb[122].mxu0  ;;  %3587 = vmatprep.mubr.f32.mxu1 %v2982_v30  ;;  %3732 = vmatprep.mubr.f32.mxu0 %v2984_v15 }
 0x4da   : > { %v2989_v18 = vmul.f32 %v2727_v9, %v1694_v61  ;;  %v2991_v46 = vmul.f32 %v2888_v55, %v1855_v51  ;;  %v2729_v8 = vpop.f32.mrb[123].mxu1  ;;  %v2890_v0 = vpop.f32.mrb[123].mxu0  ;;  %3588 = vmatmul.mubr.f32.vlgmr.msra.gmra.mrb[184].mxu1 %v2981_v41  ;;  %3733 = vmatmul.mubr.f32.vlgmr.msra.gmra.mrb[184].mxu0 %v2983_v4  ;;  %v1714_v41 = vadd.f32 %v7723_v60, %v7247_v36  ;;  %v7724_v4 = vld [vmem:[#allocation64_spill] sm:$0xff]  ;;  %v7727_v55 = vld [vmem:[#allocation67_spill] sm:$0xff] }
 0x4db   : > { %v2990_v49 = vmul.f32 %v2729_v8, %v1696_v7  ;;  %v2992_v48 = vmul.f32 %v2890_v0, %v1857_v17  ;;  %v1875_v25 = vadd.f32 %v7724_v4, %v7254_v37  ;;  %v7725_v7 = vld [vmem:[#allocation65_spill] sm:$0xff]  ;;  %v7726_v17 = vld [vmem:[#allocation66_spill] sm:$0xff] }
 0x4dc   : > { %v1718_v16 = vadd.f32 %v7725_v7, %v7237_v33  ;;  %v1879_v9 = vadd.f32 %v7726_v17, %v7244_v35 }
 0x4dd   : > { %v2733_v19 = vpop.f32.mrb[124].mxu1  ;;  %v2894_v34 = vpop.f32.mrb[124].mxu0  ;;  %3592 = vmatprep.mubr.f32.mxu1 %v2990_v49  ;;  %3737 = vmatprep.mubr.f32.mxu0 %v2992_v48 }
 0x4de   : > { %v2997_v11 = vmul.f32 %v2733_v19, %v1700_v47  ;;  %v2999_v42 = vmul.f32 %v2894_v34, %v1861_v62  ;;  %v2735_v57 = vpop.f32.mrb[125].mxu1  ;;  %v2896_v20 = vpop.f32.mrb[125].mxu0  ;;  %3593 = vmatmul.mubr.f32.gmra.mrb[186].mxu1 %v2989_v18  ;;  %3738 = vmatmul.mubr.f32.gmra.mrb[186].mxu0 %v2991_v46  ;;  %v1720_v18 = vadd.f32 %v7727_v55, %v7247_v36  ;;  %v7728_v46 = vld [vmem:[#allocation68_spill] sm:$0xff]  ;;  %v7731_v34 = vld [vmem:[#allocation71_spill] sm:$0xff] }
 0x4df   : > { %v2998_v22 = vmul.f32 %v2735_v57, %v1702_v1  ;;  %v3000_v23 = vmul.f32 %v2896_v20, %v1863_v32  ;;  %v1881_v8 = vadd.f32 %v7728_v46, %v7254_v37  ;;  %v7729_v1 = vld [vmem:[#allocation69_spill] sm:$0xff]  ;;  %v7730_v32 = vld [vmem:[#allocation70_spill] sm:$0xff] }
 0x4e0   : > { %v1724_v6 = vadd.f32 %v7729_v1, %v7237_v33  ;;  %v1885_v19 = vadd.f32 %v7730_v32, %v7244_v35 }
 0x4e1   : > { %v2739_v58 = vpop.f32.mrb[126].mxu1  ;;  %v2900_v2 = vpop.f32.mrb[126].mxu0  ;;  %3597 = vmatprep.mubr.f32.mxu1 %v2998_v22  ;;  %3742 = vmatprep.mubr.f32.mxu0 %v3000_v23 }
 0x4e2   : > { %v3005_v59 = vmul.f32 %v2739_v58, %v1706_v12  ;;  %v3007_v5 = vmul.f32 %v2900_v2, %v1867_v38  ;;  %v2741_v10 = vpop.f32.mrb[127].mxu1  ;;  %v2902_v31 = vpop.f32.mrb[127].mxu0  ;;  %3598 = vmatmul.mubr.f32.gmra.mrb[188].mxu1 %v2997_v11  ;;  %3743 = vmatmul.mubr.f32.gmra.mrb[188].mxu0 %v2999_v42  ;;  %v1726_v11 = vadd.f32 %v7731_v34, %v7247_v36  ;;  %v7732_v42 = vld [vmem:[#allocation72_spill] sm:$0xff]  ;;  %v7735_v2 = vld [vmem:[#allocation75_spill] sm:$0xff] }
 0x4e3   : > { %v3006_v21 = vmul.f32 %v2741_v10, %v1708_v63  ;;  %v3008_v53 = vmul.f32 %v2902_v31, %v1869_v56  ;;  %v1887_v57 = vadd.f32 %v7732_v42, %v7254_v37  ;;  %v7733_v63 = vld [vmem:[#allocation73_spill] sm:$0xff]  ;;  %v7734_v56 = vld [vmem:[#allocation74_spill] sm:$0xff] }
 0x4e4   : > { %v1730_v14 = vadd.f32 %v7733_v63, %v7237_v33  ;;  %v1891_v58 = vadd.f32 %v7734_v56, %v7244_v35 }
 0x4e5   : > { %v2745_v26 = vpop.f32.mrb[128].mxu1  ;;  %v2906_v30 = vpop.f32.mrb[128].mxu0  ;;  %3602 = vmatprep.mubr.f32.mxu1 %v3006_v21  ;;  %3747 = vmatprep.mubr.f32.mxu0 %v3008_v53 }
 0x4e6   : > { %v3013_v15 = vmul.f32 %v2745_v26, %v1712_v24  ;;  %v3015_v27 = vmul.f32 %v2906_v30, %v1873_v28  ;;  %v2747_v61 = vpop.f32.mrb[129].mxu1  ;;  %v2908_v43 = vpop.f32.mrb[129].mxu0  ;;  %3603 = vmatmul.mubr.f32.gmra.mrb[190].mxu1 %v3005_v59  ;;  %3748 = vmatmul.mubr.f32.gmra.mrb[190].mxu0 %v3007_v5  ;;  %v1732_v59 = vadd.f32 %v7735_v2, %v7247_v36  ;;  %v7736_v5 = vld [vmem:[#allocation76_spill] sm:$0xff]  ;;  %v7739_v30 = vld [vmem:[#allocation79_spill] sm:$0xff] }
 0x4e7   : > { %v3014_v51 = vmul.f32 %v2747_v61, %v1714_v41  ;;  %v3016_v50 = vmul.f32 %v2908_v43, %v1875_v25  ;;  %v1893_v10 = vadd.f32 %v7736_v5, %v7254_v37  ;;  %v7737_v41 = vld [vmem:[#allocation77_spill] sm:$0xff]  ;;  %v7738_v25 = vld [vmem:[#allocation78_spill] sm:$0xff] }
 0x4e8   : > { %v1736_v4 = vadd.f32 %v7737_v41, %v7237_v33  ;;  %v1897_v26 = vadd.f32 %v7738_v25, %v7244_v35 }
 0x4e9   : > { %v2751_v0 = vpop.f32.mrb[130].mxu1  ;;  %v2912_v49 = vpop.f32.mrb[130].mxu0  ;;  %3607 = vmatprep.mubr.f32.mxu1 %v3014_v51  ;;  %3752 = vmatprep.mubr.f32.mxu0 %v3016_v50 }
 0x4ea   : > { %v3021_v48 = vmul.f32 %v2751_v0, %v1718_v16  ;;  %v3023_v44 = vmul.f32 %v2912_v49, %v1879_v9  ;;  %v2753_v47 = vpop.f32.mrb[131].mxu1  ;;  %v2914_v52 = vpop.f32.mrb[131].mxu0  ;;  %3608 = vmatmul.mubr.f32.gmra.mrb[192].mxu1 %v3013_v15  ;;  %3753 = vmatmul.mubr.f32.gmra.mrb[192].mxu0 %v3015_v27  ;;  %v1738_v15 = vadd.f32 %v7739_v30, %v7247_v36  ;;  %v7740_v27 = vld [vmem:[#allocation80_spill] sm:$0xff]  ;;  %v7743_v49 = vld [vmem:[#allocation83_spill] sm:$0xff] }
 0x4eb   : > { %v3022_v62 = vmul.f32 %v2753_v47, %v1720_v18  ;;  %v3024_v29 = vmul.f32 %v2914_v52, %v1881_v8  ;;  %v1899_v61 = vadd.f32 %v7740_v27, %v7254_v37  ;;  %v7741_v18 = vld [vmem:[#allocation81_spill] sm:$0xff]  ;;  %v7742_v8 = vld [vmem:[#allocation82_spill] sm:$0xff] }
 0x4ec   : > { %v1742_v46 = vadd.f32 %v7741_v18, %v7237_v33  ;;  %v1903_v0 = vadd.f32 %v7742_v8, %v7244_v35 }
 0x4ed   : > { %v2757_v20 = vpop.f32.mrb[132].mxu1  ;;  %v2918_v22 = vpop.f32.mrb[132].mxu0  ;;  %3612 = vmatprep.mubr.f32.mxu1 %v3022_v62  ;;  %3757 = vmatprep.mubr.f32.mxu0 %v3024_v29 }
 0x4ee   : > { %v3029_v23 = vmul.f32 %v2757_v20, %v1724_v6  ;;  %v3031_v3 = vmul.f32 %v2918_v22, %v1885_v19  ;;  %v2759_v12 = vpop.f32.mrb[133].mxu1  ;;  %v2920_v13 = vpop.f32.mrb[133].mxu0  ;;  %3613 = vmatmul.mubr.f32.gmra.mrb[194].mxu1 %v3021_v48  ;;  %3758 = vmatmul.mubr.f32.gmra.mrb[194].mxu0 %v3023_v44  ;;  %v1744_v48 = vadd.f32 %v7743_v49, %v7247_v36  ;;  %v7744_v44 = vld [vmem:[#allocation84_spill] sm:$0xff]  ;;  %v7747_v22 = vld [vmem:[#allocation87_spill] sm:$0xff] }
 0x4ef   : > { %v3030_v38 = vmul.f32 %v2759_v12, %v1726_v11  ;;  %v3032_v54 = vmul.f32 %v2920_v13, %v1887_v57  ;;  %v1905_v47 = vadd.f32 %v7744_v44, %v7254_v37  ;;  %v7745_v11 = vld [vmem:[#allocation85_spill] sm:$0xff]  ;;  %v7746_v57 = vld [vmem:[#allocation86_spill] sm:$0xff] }
 0x4f0   : > { %v1748_v42 = vadd.f32 %v7745_v11, %v7237_v33  ;;  %v1909_v20 = vadd.f32 %v7746_v57, %v7244_v35 }
 0x4f1   : > { %v2763_v31 = vpop.f32.mrb[134].mxu1  ;;  %v2924_v21 = vpop.f32.mrb[134].mxu0  ;;  %3617 = vmatprep.mubr.f32.mxu1 %v3030_v38  ;;  %3762 = vmatprep.mubr.f32.mxu0 %v3032_v54 }
 0x4f2   : > { %v3037_v53 = vmul.f32 %v2763_v31, %v1730_v14  ;;  %v3039_v39 = vmul.f32 %v2924_v21, %v1891_v58  ;;  %v2765_v24 = vpop.f32.mrb[135].mxu1  ;;  %v2926_v40 = vpop.f32.mrb[135].mxu0  ;;  %3618 = vmatmul.mubr.f32.gmra.mrb[196].mxu1 %v3029_v23  ;;  %3763 = vmatmul.mubr.f32.gmra.mrb[196].mxu0 %v3031_v3  ;;  %v1750_v23 = vadd.f32 %v7747_v22, %v7247_v36  ;;  %v7748_v3 = vld [vmem:[#allocation88_spill] sm:$0xff]  ;;  %v7751_v21 = vld [vmem:[#allocation91_spill] sm:$0xff] }
 0x4f3   : > { %v3038_v28 = vmul.f32 %v2765_v24, %v1732_v59  ;;  %v3040_v60 = vmul.f32 %v2926_v40, %v1893_v10  ;;  %v1911_v12 = vadd.f32 %v7748_v3, %v7254_v37  ;;  %v7749_v59 = vld [vmem:[#allocation89_spill] sm:$0xff]  ;;  %v7750_v10 = vld [vmem:[#allocation90_spill] sm:$0xff] }
 0x4f4   : > { %v1754_v5 = vadd.f32 %v7749_v59, %v7237_v33  ;;  %v1915_v31 = vadd.f32 %v7750_v10, %v7244_v35 }
 0x4f5   : > { %v2769_v43 = vpop.f32.mrb[136].mxu1  ;;  %v2930_v51 = vpop.f32.mrb[136].mxu0  ;;  %3622 = vmatprep.mubr.f32.mxu1 %v3038_v28  ;;  %3767 = vmatprep.mubr.f32.mxu0 %v3040_v60 }
 0x4f6   : > { %v3045_v50 = vmul.f32 %v2769_v43, %v1736_v4  ;;  %v3047_v7 = vmul.f32 %v2930_v51, %v1897_v26  ;;  %v2771_v16 = vpop.f32.mrb[137].mxu1  ;;  %v2932_v17 = vpop.f32.mrb[137].mxu0  ;;  %3623 = vmatmul.mubr.f32.gmra.mrb[198].mxu1 %v3037_v53  ;;  %3768 = vmatmul.mubr.f32.gmra.mrb[198].mxu0 %v3039_v39  ;;  %v1756_v53 = vadd.f32 %v7751_v21, %v7247_v36  ;;  %v7752_v39 = vld [vmem:[#allocation92_spill] sm:$0xff]  ;;  %v7755_v51 = vld [vmem:[#allocation95_spill] sm:$0xff] }
 0x4f7   : > { %v3046_v9 = vmul.f32 %v2771_v16, %v1738_v15  ;;  %v3048_v55 = vmul.f32 %v2932_v17, %v1899_v61  ;;  %v1917_v24 = vadd.f32 %v7752_v39, %v7254_v37  ;;  %v7753_v15 = vld [vmem:[#allocation93_spill] sm:$0xff]  ;;  %v7754_v61 = vld [vmem:[#allocation94_spill] sm:$0xff] }
 0x4f8   : > { %v1760_v27 = vadd.f32 %v7753_v15, %v7237_v33  ;;  %v1921_v43 = vadd.f32 %v7754_v61, %v7244_v35 }
 0x4f9   : > { %v2775_v52 = vpop.f32.mrb[138].mxu1  ;;  %v2936_v62 = vpop.f32.mrb[138].mxu0  ;;  %3627 = vmatprep.mubr.f32.mxu1 %v3046_v9  ;;  %3772 = vmatprep.mubr.f32.mxu0 %v3048_v55 }
 0x4fa   : > { %v3053_v29 = vmul.f32 %v2775_v52, %v1742_v46  ;;  %v3055_v1 = vmul.f32 %v2936_v62, %v1903_v0  ;;  %v2777_v6 = vpop.f32.mrb[139].mxu1  ;;  %v2938_v32 = vpop.f32.mrb[139].mxu0  ;;  %3628 = vmatmul.mubr.f32.gmra.mrb[200].mxu1 %v3045_v50  ;;  %3773 = vmatmul.mubr.f32.gmra.mrb[200].mxu0 %v3047_v7  ;;  %v1762_v50 = vadd.f32 %v7755_v51, %v7247_v36  ;;  %v7756_v7 = vld [vmem:[#allocation96_spill] sm:$0xff]  ;;  %v7759_v62 = vld [vmem:[#allocation99_spill] sm:$0xff] }
 0x4fb   : > { %v3054_v19 = vmul.f32 %v2777_v6, %v1744_v48  ;;  %v3056_v34 = vmul.f32 %v2938_v32, %v1905_v47  ;;  %v1923_v16 = vadd.f32 %v7756_v7, %v7254_v37  ;;  %v7757_v48 = vld [vmem:[#allocation97_spill] sm:$0xff]  ;;  %v7758_v47 = vld [vmem:[#allocation98_spill] sm:$0xff] }
 0x4fc   : > { %v1766_v44 = vadd.f32 %v7757_v48, %v7237_v33  ;;  %v1927_v52 = vadd.f32 %v7758_v47, %v7244_v35 }
 0x4fd   : > { %v2781_v13 = vpop.f32.mrb[140].mxu1  ;;  %v2942_v38 = vpop.f32.mrb[140].mxu0  ;;  %3632 = vmatprep.mubr.f32.mxu1 %v3054_v19  ;;  %3777 = vmatprep.mubr.f32.mxu0 %v3056_v34 }
 0x4fe   : > { %v3061_v54 = vmul.f32 %v2781_v13, %v1748_v42  ;;  %v3063_v63 = vmul.f32 %v2942_v38, %v1909_v20  ;;  %v2783_v14 = vpop.f32.mrb[141].mxu1  ;;  %v2944_v56 = vpop.f32.mrb[141].mxu0  ;;  %3633 = vmatmul.mubr.f32.gmra.mrb[202].mxu1 %v3053_v29  ;;  %3778 = vmatmul.mubr.f32.gmra.mrb[202].mxu0 %v3055_v1  ;;  %v1768_v29 = vadd.f32 %v7759_v62, %v7247_v36  ;;  %v7760_v1 = vld [vmem:[#allocation100_spill] sm:$0xff]  ;;  %v7763_v38 = vld [vmem:[#allocation103_spill] sm:$0xff]  ;;  %v5363_v62 = vmov 1.0  }
 0x4ff   : > { %v3062_v58 = vmul.f32 %v2783_v14, %v1750_v23  ;;  %v3064_v2 = vmul.f32 %v2944_v56, %v1911_v12  ;;  %v1929_v6 = vadd.f32 %v7760_v1, %v7254_v37  ;;  %v7761_v23 = vld [vmem:[#allocation101_spill] sm:$0xff]  ;;  %v7762_v12 = vld [vmem:[#allocation102_spill] sm:$0xff] }
 0x500   : > { %v1772_v3 = vadd.f32 %v7761_v23, %v7237_v33  ;;  %v1933_v13 = vadd.f32 %v7762_v12, %v7244_v35 }
 0x501   : > { %v2787_v40 = vpop.f32.mrb[142].mxu1  ;;  %v2948_v28 = vpop.f32.mrb[142].mxu0  ;;  %3637 = vmatprep.mubr.f32.mxu1 %v3062_v58  ;;  %3782 = vmatprep.mubr.f32.mxu0 %v3064_v2 }
 0x502   : > { %v3069_v60 = vmul.f32 %v2787_v40, %v1754_v5  ;;  %v3071_v41 = vmul.f32 %v2948_v28, %v1915_v31  ;;  %v2789_v4 = vpop.f32.mrb[143].mxu1  ;;  %v2950_v25 = vpop.f32.mrb[143].mxu0  ;;  %3638 = vmatmul.mubr.f32.gmra.mrb[204].mxu1 %v3061_v54  ;;  %3783 = vmatmul.mubr.f32.gmra.mrb[204].mxu0 %v3063_v63  ;;  %v1774_v54 = vadd.f32 %v7763_v38, %v7247_v36  ;;  %v7764_v63 = vld [vmem:[#allocation104_spill] sm:$0xff]  ;;  %v7767_v28 = vld [vmem:[#allocation107_spill] sm:$0xff] }
 0x503   : > { %v3070_v26 = vmul.f32 %v2789_v4, %v1756_v53  ;;  %v3072_v30 = vmul.f32 %v2950_v25, %v1917_v24  ;;  %v1935_v14 = vadd.f32 %v7764_v63, %v7254_v37  ;;  %v7765_v53 = vld [vmem:[#allocation105_spill] sm:$0xff]  ;;  %v7766_v24 = vld [vmem:[#allocation106_spill] sm:$0xff] }
 0x504   : > { %v1778_v39 = vadd.f32 %v7765_v53, %v7237_v33  ;;  %v1939_v40 = vadd.f32 %v7766_v24, %v7244_v35 }
 0x505   : > { %v2793_v17 = vpop.f32.mrb[144].mxu1  ;;  %v2954_v9 = vpop.f32.mrb[144].mxu0  ;;  %3642 = vmatprep.mubr.f32.mxu1 %v3070_v26  ;;  %3787 = vmatprep.mubr.f32.mxu0 %v3072_v30 }
 0x506   : > { %v3077_v55 = vmul.f32 %v2793_v17, %v1760_v27  ;;  %v3079_v18 = vmul.f32 %v2954_v9, %v1921_v43  ;;  %v2795_v46 = vpop.f32.mrb[145].mxu1  ;;  %v2956_v8 = vpop.f32.mrb[145].mxu0  ;;  %3643 = vmatmul.mubr.f32.gmra.mrb[206].mxu1 %v3069_v60  ;;  %3788 = vmatmul.mubr.f32.gmra.mrb[206].mxu0 %v3071_v41  ;;  %v1780_v60 = vadd.f32 %v7767_v28, %v7247_v36  ;;  %v7768_v41 = vld [vmem:[#allocation108_spill] sm:$0xff] }
 0x507   : > { %v3078_v0 = vmul.f32 %v2795_v46, %v1762_v50  ;;  %v3080_v49 = vmul.f32 %v2956_v8, %v1923_v16  ;;  %v1941_v4 = vadd.f32 %v7768_v41, %v7254_v37 }
 0x509   : > { %v2799_v32 = vpop.f32.mrb[146].mxu1  ;;  %v2960_v19 = vpop.f32.mrb[146].mxu0  ;;  %3647 = vmatprep.mubr.f32.mxu1 %v3078_v0  ;;  %3792 = vmatprep.mubr.f32.mxu0 %v3080_v49  ;;  %v7391_v0 = vld [vmem:[%s633_s28] ss:$0 sm:$0xff] }
 0x50a   : > { %v3085_v34 = vmul.f32 %v2799_v32, %v1766_v44  ;;  %v3087_v11 = vmul.f32 %v2960_v19, %v1927_v52  ;;  %v2801_v42 = vpop.f32.mrb[147].mxu1  ;;  %v2962_v57 = vpop.f32.mrb[147].mxu0  ;;  %3648 = vmatmul.mubr.f32.gmra.mrb[208].mxu1 %v3077_v55  ;;  %3793 = vmatmul.mubr.f32.gmra.mrb[208].mxu0 %v3079_v18  ;;  %vm3821_vm7 = vcmp.eq.s32.totalorder %v6909_v45, %v7391_v0 }
 0x50b   : > { %v3086_v20 = vmul.f32 %v2801_v42, %v1768_v29  ;;  %v3088_v22 = vmul.f32 %v2962_v57, %v1929_v6 }
 0x50d   : > { %v2805_v56 = vpop.f32.mrb[148].mxu1  ;;  %v2966_v58 = vpop.f32.mrb[148].mxu0  ;;  %3652 = vmatprep.mubr.f32.mxu1 %v3086_v20  ;;  %3797 = vmatprep.mubr.f32.mxu0 %v3088_v22 }
 0x50e   : > { %v3093_v2 = vmul.f32 %v2805_v56, %v1772_v3  ;;  %v3095_v59 = vmul.f32 %v2966_v58, %v1933_v13  ;;  %v2807_v5 = vpop.f32.mrb[149].mxu1  ;;  %v2968_v10 = vpop.f32.mrb[149].mxu0  ;;  %3653 = vmatmul.mubr.f32.gmra.mrb[210].mxu1 %v3085_v34  ;;  %3798 = vmatmul.mubr.f32.gmra.mrb[210].mxu0 %v3087_v11 }
 0x50f   : > { %v3094_v31 = vmul.f32 %v2807_v5, %v1774_v54  ;;  %v3096_v21 = vmul.f32 %v2968_v10, %v1935_v14 }
 0x511   : > { %v2811_v25 = vpop.f32.mrb[150].mxu1  ;;  %v2972_v26 = vpop.f32.mrb[150].mxu0  ;;  %3657 = vmatprep.mubr.f32.mxu1 %v3094_v31  ;;  %3802 = vmatprep.mubr.f32.mxu0 %v3096_v21 }
 0x512   : > { %v3101_v30 = vmul.f32 %v2811_v25, %v1778_v39  ;;  %v3103_v15 = vmul.f32 %v2972_v26, %v1939_v40  ;;  %v2813_v27 = vpop.f32.mrb[151].mxu1  ;;  %v2974_v61 = vpop.f32.mrb[151].mxu0  ;;  %3658 = vmatmul.mubr.f32.gmra.mrb[212].mxu1 %v3093_v2  ;;  %3803 = vmatmul.mubr.f32.gmra.mrb[212].mxu0 %v3095_v59 }
 0x513   : > { %v3102_v33 = vmul.f32 %v2813_v27, %v1780_v60  ;;  %v3104_v43 = vmul.f32 %v2974_v61, %v1941_v4 }
 0x515   : > { %3662 = vmatprep.mubr.f32.mxu1 %v3102_v33  ;;  %3807 = vmatprep.mubr.f32.mxu0 %v3104_v43 }
 0x516   : > { %3663 = vmatmul.mubr.f32.gmra.mrb[214].mxu1 %v3101_v30  ;;  %3808 = vmatmul.mubr.f32.gmra.mrb[214].mxu0 %v3103_v15 }
 0x517   : > { %4942 = vmatprep.mubr.msk.f32.mxu1 %vm3821_vm7, %v5363_v62 }
 0x56d   : > { %v4502_v35 = vpop.f32.mrb[152].mxu1  ;;  %v4582_v36 = vpop.f32.mrb[152].mxu0 }
 0x56e   : > { %v4503_v37 = vpop.f32.mrb[153].mxu1  ;;  %v4583_v51 = vpop.f32.mrb[153].mxu0 }
 0x56f   : > { %v4504_v50 = vadd.f32 %v4503_v37, %v4502_v35  ;;  %v4584_v7 = vadd.f32 %v4583_v51, %v4582_v36 }
 0x571   : > { %v7384_v16 = vadd.f32 %v4584_v7, %v4504_v50  ;;  %v4505_v17 = vpop.f32.mrb[154].mxu1  ;;  %v4585_v9 = vpop.f32.mrb[154].mxu0 }
 0x572   : > { %v4506_v55 = vpop.f32.mrb[155].mxu1  ;;  %v4586_v18 = vpop.f32.mrb[155].mxu0 }
 0x573   : > { %v4507_v46 = vadd.f32 %v4506_v55, %v4505_v17  ;;  %v4587_v8 = vadd.f32 %v4586_v18, %v4585_v9 }
 0x575   : > { %v7393_v49 = vadd.f32 %v4587_v8, %v4507_v46  ;;  %v4508_v48 = vpop.f32.mrb[156].mxu1  ;;  %v4588_v44 = vpop.f32.mrb[156].mxu0 }
 0x576   : > { %v4509_v47 = vpop.f32.mrb[157].mxu1  ;;  %v4589_v52 = vpop.f32.mrb[157].mxu0 }
 0x577   : > { %v4510_v29 = vadd.f32 %v4509_v47, %v4508_v48  ;;  %v4590_v1 = vadd.f32 %v4589_v52, %v4588_v44 }
 0x579   : > { %v7398_v6 = vadd.f32 %v4590_v1, %v4510_v29  ;;  %v4511_v32 = vpop.f32.mrb[158].mxu1  ;;  %v4591_v19 = vpop.f32.mrb[158].mxu0 }
 0x57a   : > { %v4512_v34 = vpop.f32.mrb[159].mxu1  ;;  %v4592_v11 = vpop.f32.mrb[159].mxu0 }
 0x57b   : > { %v4513_v42 = vadd.f32 %v4512_v34, %v4511_v32  ;;  %v4593_v57 = vadd.f32 %v4592_v11, %v4591_v19 }
 0x57d   : > { %v7400_v20 = vadd.f32 %v4593_v57, %v4513_v42  ;;  %v4514_v22 = vpop.f32.mrb[160].mxu1  ;;  %v4594_v23 = vpop.f32.mrb[160].mxu0 }
 0x57e   : > { %v4515_v3 = vpop.f32.mrb[161].mxu1  ;;  %v4595_v12 = vpop.f32.mrb[161].mxu0 }
 0x57f   : > { %v4516_v13 = vadd.f32 %v4515_v3, %v4514_v22  ;;  %v4596_v38 = vadd.f32 %v4595_v12, %v4594_v23 }
 0x581   : > { %v7402_v54 = vadd.f32 %v4596_v38, %v4516_v13  ;;  %v4517_v63 = vpop.f32.mrb[162].mxu1  ;;  %v4597_v14 = vpop.f32.mrb[162].mxu0 }
 0x582   : > { %v4518_v56 = vpop.f32.mrb[163].mxu1  ;;  %v4598_v58 = vpop.f32.mrb[163].mxu0 }
 0x583   : > { %v4519_v2 = vadd.f32 %v4518_v56, %v4517_v63  ;;  %v4599_v59 = vadd.f32 %v4598_v58, %v4597_v14 }
 0x585   : > { %v7404_v5 = vadd.f32 %v4599_v59, %v4519_v2  ;;  %v4520_v10 = vpop.f32.mrb[164].mxu1  ;;  %v4600_v31 = vpop.f32.mrb[164].mxu0 }
 0x586   : > { %v4521_v21 = vpop.f32.mrb[165].mxu1  ;;  %v4601_v53 = vpop.f32.mrb[165].mxu0 }
 0x587   : > { %v4522_v39 = vadd.f32 %v4521_v21, %v4520_v10  ;;  %v4602_v24 = vadd.f32 %v4601_v53, %v4600_v31 }
 0x589   : > { %v7406_v40 = vadd.f32 %v4602_v24, %v4522_v39  ;;  %v4523_v28 = vpop.f32.mrb[166].mxu1  ;;  %v4603_v60 = vpop.f32.mrb[166].mxu0 }
 0x58a   : > { %v4524_v41 = vpop.f32.mrb[167].mxu1  ;;  %v4604_v4 = vpop.f32.mrb[167].mxu0 }
 0x58b   : > { %v4525_v25 = vadd.f32 %v4524_v41, %v4523_v28  ;;  %v4605_v26 = vadd.f32 %v4604_v4, %v4603_v60 }
 0x58d   : > { %v7408_v30 = vadd.f32 %v4605_v26, %v4525_v25  ;;  %v4526_v15 = vpop.f32.mrb[168].mxu1  ;;  %v4606_v27 = vpop.f32.mrb[168].mxu0 }
 0x58e   : > { %v4527_v61 = vpop.f32.mrb[169].mxu1  ;;  %v4607_v33 = vpop.f32.mrb[169].mxu0 }
 0x58f   : > { %v4528_v43 = vadd.f32 %v4527_v61, %v4526_v15  ;;  %v4608_v35 = vadd.f32 %v4607_v33, %v4606_v27 }
 0x591   : > { %v7410_v36 = vadd.f32 %v4608_v35, %v4528_v43  ;;  %v4529_v37 = vpop.f32.mrb[170].mxu1  ;;  %v4609_v51 = vpop.f32.mrb[170].mxu0 }
 0x592   : > { %v4530_v50 = vpop.f32.mrb[171].mxu1  ;;  %v4610_v7 = vpop.f32.mrb[171].mxu0 }
 0x593   : > { %v4531_v17 = vadd.f32 %v4530_v50, %v4529_v37  ;;  %v4611_v9 = vadd.f32 %v4610_v7, %v4609_v51 }
 0x595   : > { %v7412_v55 = vadd.f32 %v4611_v9, %v4531_v17  ;;  %v4532_v18 = vpop.f32.mrb[172].mxu1  ;;  %v4612_v46 = vpop.f32.mrb[172].mxu0 }
 0x596   : > { %v4533_v8 = vpop.f32.mrb[173].mxu1  ;;  %v4613_v48 = vpop.f32.mrb[173].mxu0 }
 0x597   : > { %v4534_v44 = vadd.f32 %v4533_v8, %v4532_v18  ;;  %v4614_v47 = vadd.f32 %v4613_v48, %v4612_v46 }
 0x599   : > { %v7414_v52 = vadd.f32 %v4614_v47, %v4534_v44  ;;  %v4535_v29 = vpop.f32.mrb[174].mxu1  ;;  %v4615_v1 = vpop.f32.mrb[174].mxu0 }
 0x59a   : > { %v4536_v32 = vpop.f32.mrb[175].mxu1  ;;  %v4616_v19 = vpop.f32.mrb[175].mxu0 }
 0x59b   : > { %v4537_v34 = vadd.f32 %v4536_v32, %v4535_v29  ;;  %v4617_v11 = vadd.f32 %v4616_v19, %v4615_v1 }
 0x59d   : > { %v7416_v42 = vadd.f32 %v4617_v11, %v4537_v34  ;;  %v4538_v57 = vpop.f32.mrb[176].mxu1  ;;  %v4618_v22 = vpop.f32.mrb[176].mxu0 }
 0x59e   : > { %v4539_v23 = vpop.f32.mrb[177].mxu1  ;;  %v4619_v3 = vpop.f32.mrb[177].mxu0 }
 0x59f   : > { %v4540_v12 = vadd.f32 %v4539_v23, %v4538_v57  ;;  %v4620_v13 = vadd.f32 %v4619_v3, %v4618_v22 }
 0x5a1   : > { %v7418_v38 = vadd.f32 %v4620_v13, %v4540_v12  ;;  %v4541_v63 = vpop.f32.mrb[178].mxu1  ;;  %v4621_v14 = vpop.f32.mrb[178].mxu0 }
 0x5a2   : > { %v4542_v56 = vpop.f32.mrb[179].mxu1  ;;  %v4622_v58 = vpop.f32.mrb[179].mxu0 }
 0x5a3   : > { %v4543_v2 = vadd.f32 %v4542_v56, %v4541_v63  ;;  %v4623_v59 = vadd.f32 %v4622_v58, %v4621_v14 }
 0x5a5   : > { %v7420_v10 = vadd.f32 %v4623_v59, %v4543_v2  ;;  %v4544_v31 = vpop.f32.mrb[180].mxu1  ;;  %v4624_v21 = vpop.f32.mrb[180].mxu0 }
 0x5a6   : > { %v4545_v53 = vpop.f32.mrb[181].mxu1  ;;  %v4625_v39 = vpop.f32.mrb[181].mxu0 }
 0x5a7   : > { %v4546_v24 = vadd.f32 %v4545_v53, %v4544_v31  ;;  %v4626_v28 = vadd.f32 %v4625_v39, %v4624_v21 }
 0x5a9   : > { %v7422_v60 = vadd.f32 %v4626_v28, %v4546_v24  ;;  %v4547_v41 = vpop.f32.mrb[182].mxu1  ;;  %v4627_v4 = vpop.f32.mrb[182].mxu0 }
 0x5aa   : > { %v4548_v25 = vpop.f32.mrb[183].mxu1  ;;  %v4628_v26 = vpop.f32.mrb[183].mxu0 }
 0x5ab   : > { %v4549_v15 = vadd.f32 %v4548_v25, %v4547_v41  ;;  %v4629_v27 = vadd.f32 %v4628_v26, %v4627_v4 }
 0x5ad   : > { %v7424_v61 = vadd.f32 %v4629_v27, %v4549_v15  ;;  %v4662_v33 = vpop.f32.mrb[184].mxu1  ;;  %v4742_v43 = vpop.f32.mrb[184].mxu0 }
 0x5ae   : > { %v4663_v35 = vpop.f32.mrb[185].mxu1  ;;  %v4743_v37 = vpop.f32.mrb[185].mxu0 }
 0x5af   : > { %v4664_v51 = vadd.f32 %v4663_v35, %v4662_v33  ;;  %v4744_v50 = vadd.f32 %v4743_v37, %v4742_v43 }
 0x5b1   : > { %v3590_v7 = vadd.f32 %v4664_v51, %v7384_v16  ;;  %v4665_v17 = vpop.f32.mrb[186].mxu1  ;;  %v4745_v9 = vpop.f32.mrb[186].mxu0 }
 0x5b2   : > { %v4666_v18 = vpop.f32.mrb[187].mxu1  ;;  %v4746_v46 = vpop.f32.mrb[187].mxu0 }
 0x5b3   : > { %v3735_v8 = vadd.f32 %v4744_v50, %v3590_v7  ;;  %v4667_v48 = vadd.f32 %v4666_v18, %v4665_v17  ;;  %v4747_v44 = vadd.f32 %v4746_v46, %v4745_v9 }
 0x5b5   : > { %v3595_v47 = vadd.f32 %v4667_v48, %v7393_v49  ;;  %v4668_v29 = vpop.f32.mrb[188].mxu1  ;;  %v4748_v1 = vpop.f32.mrb[188].mxu0 }
 0x5b6   : > { %v4669_v32 = vpop.f32.mrb[189].mxu1  ;;  %v4749_v19 = vpop.f32.mrb[189].mxu0 }
 0x5b7   : > { %v3740_v34 = vadd.f32 %v4747_v44, %v3595_v47  ;;  %v4670_v11 = vadd.f32 %v4669_v32, %v4668_v29  ;;  %v4750_v57 = vadd.f32 %v4749_v19, %v4748_v1 }
 0x5b9   : > { %v3600_v22 = vadd.f32 %v4670_v11, %v7398_v6  ;;  %v4671_v23 = vpop.f32.mrb[190].mxu1  ;;  %v4751_v16 = vpop.f32.mrb[190].mxu0  ;;  %v5211_v3 = vpack.c.bf16 %v3740_v34, %v3735_v8 }
 0x5ba   : > { %v4672_v12 = vpop.f32.mrb[191].mxu1  ;;  %v4752_v13 = vpop.f32.mrb[191].mxu0 }
 0x5bb   : > { %v3745_v63 = vadd.f32 %v4750_v57, %v3600_v22  ;;  %v4673_v14 = vadd.f32 %v4672_v12, %v4671_v23  ;;  %v4753_v56 = vadd.f32 %v4752_v13, %v4751_v16  ;;  %5212 = vmatprep.subr.bf16.mxu1 %v5211_v3 }
 0x5bc   : > { %5214 = vmatpush3.bf16.msra.mxu1 %v5211_v3 }
 0x5bd   : > { %v3605_v49 = vadd.f32 %v4673_v14, %v7400_v20  ;;  %v4674_v58 = vpop.f32.mrb[192].mxu1  ;;  %v4754_v2 = vpop.f32.mrb[192].mxu0 }
 0x5be   : > { %v4675_v59 = vpop.f32.mrb[193].mxu1  ;;  %v4755_v31 = vpop.f32.mrb[193].mxu0 }
 0x5bf   : > { %v3750_v21 = vadd.f32 %v4753_v56, %v3605_v49  ;;  %v4676_v53 = vadd.f32 %v4675_v59, %v4674_v58  ;;  %v4756_v39 = vadd.f32 %v4755_v31, %v4754_v2 }
 0x5c1   : > { %v3610_v6 = vadd.f32 %v4676_v53, %v7402_v54  ;;  %v4677_v24 = vpop.f32.mrb[194].mxu1  ;;  %v4757_v28 = vpop.f32.mrb[194].mxu0  ;;  %v5215_v41 = vpack.c.bf16 %v3750_v21, %v3745_v63 }
 0x5c2   : > { %v4678_v4 = vpop.f32.mrb[195].mxu1  ;;  %v4758_v25 = vpop.f32.mrb[195].mxu0 }
 0x5c3   : > { %v3755_v26 = vadd.f32 %v4756_v39, %v3610_v6  ;;  %v4679_v15 = vadd.f32 %v4678_v4, %v4677_v24  ;;  %v4759_v27 = vadd.f32 %v4758_v25, %v4757_v28  ;;  %5216 = vmatprep.subr.bf16.mxu1 %v5215_v41 }
 0x5c4   : > { %5218 = vmatpush3.bf16.msra.mxu1 %v5215_v41 }
 0x5c5   : > { %v3615_v20 = vadd.f32 %v4679_v15, %v7404_v5  ;;  %v4680_v33 = vpop.f32.mrb[196].mxu1  ;;  %v4760_v43 = vpop.f32.mrb[196].mxu0 }
 0x5c6   : > { %v4681_v35 = vpop.f32.mrb[197].mxu1  ;;  %v4761_v37 = vpop.f32.mrb[197].mxu0 }
 0x5c7   : > { %v3760_v51 = vadd.f32 %v4759_v27, %v3615_v20  ;;  %v4682_v50 = vadd.f32 %v4681_v35, %v4680_v33  ;;  %v4762_v7 = vadd.f32 %v4761_v37, %v4760_v43 }
 0x5c9   : > { %v3620_v54 = vadd.f32 %v4682_v50, %v7406_v40  ;;  %v4683_v17 = vpop.f32.mrb[198].mxu1  ;;  %v4763_v9 = vpop.f32.mrb[198].mxu0  ;;  %v5219_v18 = vpack.c.bf16 %v3760_v51, %v3755_v26 }
 0x5ca   : > { %v4684_v46 = vpop.f32.mrb[199].mxu1  ;;  %v4764_v8 = vpop.f32.mrb[199].mxu0 }
 0x5cb   : > { %v3765_v48 = vadd.f32 %v4762_v7, %v3620_v54  ;;  %v4685_v44 = vadd.f32 %v4684_v46, %v4683_v17  ;;  %v4765_v47 = vadd.f32 %v4764_v8, %v4763_v9  ;;  %5220 = vmatprep.subr.bf16.mxu1 %v5219_v18 }
 0x5cc   : > { %5222 = vmatpush3.bf16.msra.mxu1 %v5219_v18 }
 0x5cd   : > { %v3625_v5 = vadd.f32 %v4685_v44, %v7408_v30  ;;  %v4686_v29 = vpop.f32.mrb[200].mxu1  ;;  %v4766_v1 = vpop.f32.mrb[200].mxu0 }
 0x5ce   : > { %v4687_v32 = vpop.f32.mrb[201].mxu1  ;;  %v4767_v19 = vpop.f32.mrb[201].mxu0 }
 0x5cf   : > { %v3770_v34 = vadd.f32 %v4765_v47, %v3625_v5  ;;  %v4688_v11 = vadd.f32 %v4687_v32, %v4686_v29  ;;  %v4768_v57 = vadd.f32 %v4767_v19, %v4766_v1 }
 0x5d1   : > { %v3630_v40 = vadd.f32 %v4688_v11, %v7410_v36  ;;  %v4689_v22 = vpop.f32.mrb[202].mxu1  ;;  %v4769_v23 = vpop.f32.mrb[202].mxu0  ;;  %v5223_v16 = vpack.c.bf16 %v3770_v34, %v3765_v48 }
 0x5d2   : > { %v4690_v3 = vpop.f32.mrb[203].mxu1  ;;  %v4770_v12 = vpop.f32.mrb[203].mxu0 }
 0x5d3   : > { %v3775_v13 = vadd.f32 %v4768_v57, %v3630_v40  ;;  %v4691_v63 = vadd.f32 %v4690_v3, %v4689_v22  ;;  %v4771_v14 = vadd.f32 %v4770_v12, %v4769_v23  ;;  %5224 = vmatprep.subr.bf16.mxu1 %v5223_v16  ;;  %v3827_v12 = vld [vmem:[#allocation3] sm:$0xff] }
 0x5d4   : > { %5226 = vmatpush3.bf16.msra.mxu1 %v5223_v16  ;;  %v3815_v16 = vadd.s32 8, %v6909_v45  ;;  %v3914_v45 = vld [vmem:[%s7536_s14] sm:$0xff] (!%p4405_p11) }
 0x5d5   : > { %v3635_v30 = vadd.f32 %v4691_v63, %v7412_v55  ;;  %v4692_v56 = vpop.f32.mrb[204].mxu1  ;;  %v4772_v49 = vpop.f32.mrb[204].mxu0 }
 0x5d6   : > { %v4693_v58 = vpop.f32.mrb[205].mxu1  ;;  %v4773_v2 = vpop.f32.mrb[205].mxu0  ;;  %vm3822_vm10 = vcmp.eq.s32.totalorder %v3815_v16, %v7391_v0  ;;  %v5364_v0 = vmov (!%p4405_p11), 0  }
 0x5d7   : > { %v3780_v59 = vadd.f32 %v4771_v14, %v3635_v30  ;;  %v4694_v31 = vadd.f32 %v4693_v58, %v4692_v56  ;;  %v4774_v21 = vadd.f32 %v4773_v2, %v4772_v49  ;;  %5318 = vset.pattern.permute.xlu0 (!%p4405_p11), %v5364_v0 }
 0x5d8   : > { %3918 = vperm.xlu0 (!%p4405_p11), %5318, %v3914_v45  }
 0x5d9   : > { %v3640_v36 = vadd.f32 %v4694_v31, %v7414_v52  ;;  %v4695_v53 = vpop.f32.mrb[206].mxu1  ;;  %v4775_v39 = vpop.f32.mrb[206].mxu0  ;;  %v5227_v6 = vpack.c.bf16 %v3780_v59, %v3775_v13 }
 0x5da   : > { %v4696_v24 = vpop.f32.mrb[207].mxu1  ;;  %v4776_v28 = vpop.f32.mrb[207].mxu0 }
 0x5db   : > { %v3785_v41 = vadd.f32 %v4774_v21, %v3640_v36  ;;  %v4697_v4 = vadd.f32 %v4696_v24, %v4695_v53  ;;  %v4777_v25 = vadd.f32 %v4776_v28, %v4775_v39  ;;  %5228 = vmatprep.subr.bf16.mxu1 %v5227_v6 }
 0x5dc   : > { %5230 = vmatpush3.bf16.msra.mxu1 %v5227_v6 }
 0x5dd   : > { %v3645_v55 = vadd.f32 %v4697_v4, %v7416_v42  ;;  %v4698_v26 = vpop.f32.mrb[208].mxu1  ;;  %v4778_v15 = vpop.f32.mrb[208].mxu0 }
 0x5de   : > { %v4699_v27 = vpop.f32.mrb[209].mxu1  ;;  %v4779_v20 = vpop.f32.mrb[209].mxu0 }
 0x5df   : > { %v3790_v33 = vadd.f32 %v4777_v25, %v3645_v55  ;;  %v4700_v43 = vadd.f32 %v4699_v27, %v4698_v26  ;;  %v4780_v35 = vadd.f32 %v4779_v20, %v4778_v15 }
 0x5e1   : > { %v3650_v52 = vadd.f32 %v4700_v43, %v7418_v38  ;;  %v4701_v37 = vpop.f32.mrb[210].mxu1  ;;  %v4781_v51 = vpop.f32.mrb[210].mxu0  ;;  %v5231_v50 = vpack.c.bf16 %v3790_v33, %v3785_v41 }
 0x5e2   : > { %v4702_v7 = vpop.f32.mrb[211].mxu1  ;;  %v4782_v54 = vpop.f32.mrb[211].mxu0 }
 0x5e3   : > { %v3795_v17 = vadd.f32 %v4780_v35, %v3650_v52  ;;  %v4703_v9 = vadd.f32 %v4702_v7, %v4701_v37  ;;  %v4783_v18 = vadd.f32 %v4782_v54, %v4781_v51  ;;  %5232 = vmatprep.subr.bf16.mxu1 %v5231_v50 }
 0x5e4   : > { %5234 = vmatpush3.bf16.msra.mxu1 %v5231_v50 }
 0x5e5   : > { %v3655_v42 = vadd.f32 %v4703_v9, %v7420_v10  ;;  %v4704_v46 = vpop.f32.mrb[212].mxu1  ;;  %v4784_v8 = vpop.f32.mrb[212].mxu0 }
 0x5e6   : > { %v4705_v48 = vpop.f32.mrb[213].mxu1  ;;  %v4785_v44 = vpop.f32.mrb[213].mxu0 }
 0x5e7   : > { %v3800_v47 = vadd.f32 %v4783_v18, %v3655_v42  ;;  %v4706_v5 = vadd.f32 %v4705_v48, %v4704_v46  ;;  %v4786_v29 = vadd.f32 %v4785_v44, %v4784_v8 }
 0x5e9   : > { %v3660_v38 = vadd.f32 %v4706_v5, %v7422_v60  ;;  %v4707_v1 = vpop.f32.mrb[214].mxu1  ;;  %v4787_v32 = vpop.f32.mrb[214].mxu0  ;;  %v5235_v19 = vpack.c.bf16 %v3800_v47, %v3795_v17  ;;  %v3828_v60 = vld [vmem:[#allocation3 + $0x8] sm:$0xff] }
 0x5ea   : > { %v4708_v34 = vpop.f32.mrb[215].mxu1  ;;  %v4788_v11 = vpop.f32.mrb[215].mxu0 }
 0x5eb   : > { %v3805_v57 = vadd.f32 %v4786_v29, %v3660_v38  ;;  %v4709_v40 = vadd.f32 %v4708_v34, %v4707_v1  ;;  %v4789_v22 = vadd.f32 %v4788_v11, %v4787_v32  ;;  %5236 = vmatprep.subr.bf16.mxu1 %v5235_v19 }
 0x5ec   : > { %5238 = vmatpush3.bf16.msra.mxu1 %v5235_v19 }
 0x5ed   : > { %v3665_v10 = vadd.f32 %v4709_v40, %v7424_v61 }
 0x5ef   : > { %v3810_v23 = vadd.f32 %v4789_v22, %v3665_v10 }
 0x5f1   : > { %v5239_v3 = vpack.c.bf16 %v3810_v23, %v3805_v57 }
 0x5f3   : > { %5240 = vmatprep.subr.bf16.mxu1 %v5239_v3 }
 0x5f4   : > { %5242 = vmatpush3.bf16.msra.mxu1 %v5239_v3 }
 0x5f7   : > { %4943 = vmatmul.mubr.msk.f32.vlgmr.msra.gmra.mrb[216].mxu1 %vm3822_vm10, %v5363_v62  ;;  %v3915_v62 = vld [vmem:[%s7536_s14 + $0x8] sm:$0xff] (!%p4405_p11) }
 0x5f8   : > { %3923 = vperm.xlu0 (!%p4405_p11), %5318, %v3915_v62  }
 0x657   : > { %v3919_v49 = vpop.permute.xlu0 (!%p4405_p11), %3918 }
 0x677   : > { %v3924_v31 = vpop.permute.xlu0 (!%p4405_p11), %3923 }
 0x6c8   : > { %3911 = sbr.rel (%p4405_p11) target bundleno = 2195 (0x893), region = 108 }
 0x6ca   : > { %v4944_v13 = vpop.f32.mrb[216].mxu1 }
 0x6cb   : > { %v3905_v63 = vadd.f32 %v4944_v13, %v3828_v60  ;;  %v3895_v14 = vpop.f32.mrb[217].mxu1 }
 0x6cc   : > { %v3904_v30 = vadd.f32 %v3895_v14, %v3827_v12 }
 0x6cd   : > { %3907 = vst.msk [vmem:[#allocation3 + $0x8] sm:$0xff] %vm934_vm4, %v3905_v63 }
 0x6ce   : > { %3906 = vst.msk [vmem:[#allocation3] sm:$0xff] %vm934_vm4, %v3904_v30 }
 0x6cf   : > { %s3931_s23 = scalar_select %p3928_p12, 1, 0 }
 0x6d0   : > { %s7770_s26 = sld [smem:[#allocation113_spill]] (!%p4406_p13)  ;;  %s7771_s29 = sld [smem:[#allocation115_spill]] (!%p4406_p13)  ;;  %v4410_v8 = vld [vmem:[#allocation4] ss:$0 sm:$0xff] (!%p4406_p13) }
 0x6d1   : > { %v3932_v56 = vstv %s3931_s23  ;;  %s7772_s27 = sld [smem:[#allocation114_spill]] (!%p4406_p13)  ;;  %s7773_s25 = sld [smem:[#allocation116_spill]] (!%p4406_p13) }
 0x6d2   : > { %vm3933_vm11 = vcmp.eq.s32.totalorder %v3932_v56, 1 }
 0x6d4   : > { %v3913_v2 = vld [vmem:[#allocation3 + $0x8] sm:$0xff] }
 0x6d5   : > { %v3912_v61 = vld [vmem:[#allocation3] sm:$0xff]  ;;  %v3927_v36 = vmul.f32 %v3924_v31, %v3913_v2  ;;  %3940 = sbr.rel (%p4406_p13) target bundleno = 2195 (0x893), region = 112 }
 0x6d6   : > { %v3926_v58 = vmul.f32 %v3919_v49, %v3912_v61  ;;  %v3941_v6 = vld [vmem:[%s7770_s26] sm:$0xff] (!%p4406_p13)  ;;  %v3942_v24 = vld [vmem:[%s7770_s26 + $0x8] sm:$0xff] (!%p4406_p13)  ;;  %v3943_v28 = vld [vmem:[%s7770_s26 + $0x10] sm:$0xff] (!%p4406_p13) }
 0x6d7   : > { %v3930_v53 = vmax.f32 %v3927_v36, 0.0  ;;  %v5243_v41 = vpack.c.bf16 (!%p4406_p13), %v3942_v24, %v3941_v6  ;;  %v3944_v4 = vld [vmem:[%s7770_s26 + $0x18] sm:$0xff] (!%p4406_p13)  ;;  %v4035_v25 = vld [vmem:[%s7771_s29] sm:$0xff] (!%p4406_p13)  ;;  %v4036_v55 = vld [vmem:[%s7771_s29 + $0x8] sm:$0xff] (!%p4406_p13) }
 0x6d8   : > { %v3929_v59 = vmax.f32 %v3926_v58, 0.0  ;;  %4953 = vmatprep.mubr.msk.f32.mxu0 (!%p4406_p13), %vm934_vm4, %v3926_v58  ;;  %v5247_v26 = vpack.c.bf16 (!%p4406_p13), %v3944_v4, %v3943_v28  ;;  %v5251_v15 = vpack.c.bf16 (!%p4406_p13), %v4036_v55, %v4035_v25  ;;  %v4037_v27 = vld [vmem:[%s7771_s29 + $0x10] sm:$0xff] (!%p4406_p13)  ;;  %v4038_v20 = vld [vmem:[%s7771_s29 + $0x18] sm:$0xff] (!%p4406_p13)  ;;  %v4039_v43 = vld [vmem:[%s7771_s29 + $0x20] sm:$0xff] (!%p4406_p13) }
 0x6d9   : > { %v3935_v39 = vsel %vm3933_vm11, %v3927_v36, %v3930_v53  ;;  %5244 = vmatprep.subr.bf16.mxu0 (!%p4406_p13), %v5243_v41  ;;  %v5255_v33 = vpack.c.bf16 (!%p4406_p13), %v4038_v20, %v4037_v27  ;;  %v4040_v35 = vld [vmem:[%s7771_s29 + $0x28] sm:$0xff] (!%p4406_p13)  ;;  %v4041_v37 = vld [vmem:[%s7771_s29 + $0x30] sm:$0xff] (!%p4406_p13)  ;;  %v4042_v51 = vld [vmem:[%s7771_s29 + $0x38] sm:$0xff] (!%p4406_p13) }
 0x6da   : > { %v3934_v21 = vsel %vm3933_vm11, %v3926_v58, %v3929_v59  ;;  %3937 = vst.msk [vmem:[#allocation2 + $0x8] sm:$0xff] %vm934_vm4, %v3935_v39  ;;  %5246 = vmatpush3.bf16.msra.mxu0 (!%p4406_p13), %v5243_v41  ;;  %5252 = vmatprep.subr.bf16.mxu1 (!%p4406_p13), %v5251_v15  ;;  %v5259_v52 = vpack.c.bf16 (!%p4406_p13), %v4040_v35, %v4039_v43  ;;  %v4407_v7 = vld [vmem:[%s7772_s27] ss:$0 sm:$0xff] (!%p4406_p13) }
 0x6db   : > { %3936 = vst.msk [vmem:[#allocation2] sm:$0xff] %vm934_vm4, %v3934_v21  ;;  %5248 = vmatprep.subr.bf16.mxu0 (!%p4406_p13), %v5247_v26  ;;  %5254 = vmatpush3.bf16.msra.mxu1 (!%p4406_p13), %v5251_v15  ;;  %v5263_v50 = vpack.c.bf16 (!%p4406_p13), %v4042_v51, %v4041_v37 }
 0x6dc   : > { %5256 = vmatprep.subr.bf16.mxu1 %v5255_v33 }
 0x6de   : > { %5250 = vmatpush3.bf16.msra.mxu0 %v5247_v26 }
 0x6df   : > { %5258 = vmatpush3.bf16.msra.mxu1 %v5255_v33 }
 0x6e0   : > { %5260 = vmatprep.subr.bf16.mxu1 %v5259_v52 }
 0x6e1   : > { %4954 = vmatmul.mubr.msk.f32.vlgmr.msra.gmra.mrb[0].mxu0 %vm934_vm4, %v3927_v36  ;;  %vm4131_vm4 = vcmask 7168  }
 0x6e3   : > { %5262 = vmatpush3.bf16.msra.mxu1 %v5259_v52 }
 0x6e4   : > { %5264 = vmatprep.subr.bf16.mxu1 %v5263_v50 }
 0x6e7   : > { %5266 = vmatpush3.bf16.msra.mxu1 %v5263_v50 }
 0x7b4   : > { %v4955_v54 = vpop.f32.mrb[0].mxu0 }
 0x7b5   : > { %v4030_v17 = vadd.f32 %v4955_v54, %v4407_v7  ;;  %v4024_v9 = vpop.f32.mrb[1].mxu0 }
 0x7b6   : > { %v4025_v18 = vadd.f32 %v4407_v7, %v4024_v9 }
 0x7b7   : > { %v4034_v46 = vmax.f32 %v4030_v17, 0.0 }
 0x7b8   : > { %v4033_v42 = vmax.f32 %v4025_v18, 0.0 }
 0x7ba   : > { %4972 = vmatprep.mubr.msk.f32.mxu1 %vm1250_vm5, %v4033_v42 }
 0x7bb   : > { %4973 = vmatmul.mubr.msk.f32.vlgmr.msra.gmra.mrb[0].mxu1 %vm1250_vm5, %v4034_v46 }
 0x88e   : > { %v4974_v48 = vpop.f32.mrb[0].mxu1 }
 0x88f   : > { %v4128_v44 = vadd.f32 %v4974_v48, %v4410_v8  ;;  %v4122_v47 = vpop.f32.mrb[1].mxu1 }
 0x890   : > { %v4123_v5 = vadd.f32 %v4410_v8, %v4122_v47 }
 0x891   : > { %4133 = vst.msk [vmem:[%s7773_s25 + $0x8] sm:$0xff] %vm4131_vm4, %v4128_v44 }
 0x892   : > { %4132 = vst.msk [vmem:[%s7773_s25] sm:$0xff] %vm4131_vm4, %v4123_v5 }
 0x893 PF: > { %s7774_s3 = sld [smem:[#allocation7_spill]]  ;;  %s7775_s20 = sld [smem:[#allocation5_spill]] }
 0x894   : > { %s7776_s21 = sld [smem:[#allocation6_spill]]  ;;  %s7777_s1 = sld [smem:[#allocation8_spill]] }
 0x895   : > { %s7778_s22 = sld [smem:[#allocation9_spill]] }
 0x899   : > { %s31_s2 = sadd.s32 1, %s7774_s3  }
 0x89a   : > { %p28_p0 = scmp.ge.s32.totalorder %s31_s2, 6  }
 0x89c   :  { %30 = sbr.rel (!%p28_p0) target bundleno = 9 (0x9), region = 144 }

</bundles_post_ra>
